<compile_context>
chip_gen: v7x
topology: tpu7x:2x2x1
jax: 0.10.0
libtpu: 0.0.40
codegen_flags: <defaults>
</compile_context>

<pallas_src>
import functools

import jax
import jax.numpy as jnp
from jax import lax
from jax.experimental import pallas as pl
from jax.experimental.pallas import tpu as pltpu

EPS = 1e-5


def _round_up(v, m):
    return (v + m - 1) // m * m


def _bottleneck_kernel(x_ref, mask_ref, w1_ref, g1_ref, b1_ref,
                       w2_ref, g2_ref, b2_ref,
                       w3_ref, g3_ref, b3_ref,
                       out_ref, h1_ref, *,
                       n, h, w, wp, g_rows, matmul_dtype):
    hp = h + 2
    r1 = n * hp * wp                  # rows of the (spatially padded) flat image
    inv_m = 1.0 / float(n * h * w)    # BN divides by the interior pixel count
    md = jnp.dtype(matmul_dtype)
    # f32 debug path keeps HIGHEST to match the reference; bf16 path uses the
    # native single-pass MXU (no precision override).
    prec = lax.Precision.HIGHEST if md == jnp.dtype(jnp.float32) else None

    def dot(a, b):
        return jnp.dot(a.astype(md), b.astype(md),
                       preferred_element_type=jnp.float32, precision=prec)

    def bn_scale_shift(s, ss, g, b):
        # single-pass stats (f32 sums); clamp tiny negative variances from
        # E[x^2]-E[x]^2 rounding before rsqrt.
        mean = s * inv_m
        var = jnp.maximum(ss * inv_m - mean * mean, 0.0)
        scale = g * lax.rsqrt(var + EPS)          # rsqrt -> EUP slot
        shift = b - mean * scale
        return scale, shift

    # ---- conv1 (1x1) + BN1 + ReLU -> masked slab in VMEM scratch -------------
    x = x_ref[...]                                # (Rg, Cinp), matmul dtype
    y1 = dot(x, w1_ref[...])                      # (Rg, C1p) f32
    # halo/guard rows of x are exactly zero -> y1 is exactly zero there, so the
    # unmasked sums equal the interior sums.
    s1 = jnp.sum(y1, axis=0, keepdims=True)
    ss1 = jnp.sum(y1 * y1, axis=0, keepdims=True)
    scale1, shift1 = bn_scale_shift(s1, ss1, g1_ref[...], b1_ref[...])
    mask_all = mask_ref[...]                      # (Rg, 1): 1 interior, 0 halo/guard
    # one mask multiply restores the conv2 zero padding; single cast to the
    # matmul dtype at the store (windows are re-read in that dtype).
    h1_ref[...] = (jnp.maximum(y1 * scale1 + shift1, 0.0) * mask_all).astype(md)

    # ---- conv2: grouped 3x3, stride 1, pad 1 ---------------------------------
    # Each tap is a static row-offset slice of the flat slab; the 9 tap results
    # are accumulated in registers (chained adds) and never round-trip through a
    # VMEM accumulator scratch.
    y2 = None
    for k in range(9):
        ky, kx = divmod(k, 3)
        off = g_rows + (ky - 1) * wp + (kx - 1)   # static, in [g_rows-wp-1, g_rows+wp+1]
        window = h1_ref[off:off + r1, :]          # (R1, C1p) matmul dtype
        contrib = dot(window, w2_ref[k])          # block-diagonal (C1p, C1p) weight
        y2 = contrib if y2 is None else y2 + contrib

    mask_i = mask_ref[g_rows:g_rows + r1, :]      # (R1, 1)
    y2m = y2 * mask_i                             # halo rows hold garbage: mask stats
    s2 = jnp.sum(y2m, axis=0, keepdims=True)
    ss2 = jnp.sum(y2m * y2, axis=0, keepdims=True)
    scale2, shift2 = bn_scale_shift(s2, ss2, g2_ref[...], b2_ref[...])
    h2 = jnp.maximum(y2 * scale2 + shift2, 0.0)   # (R1, C1p) f32

    # ---- conv3 (1x1) + BN3 + identity residual + ReLU ------------------------
    y3 = dot(h2, w3_ref[...])                     # (R1, Coutp) f32
    y3m = y3 * mask_i
    s3 = jnp.sum(y3m, axis=0, keepdims=True)
    ss3 = jnp.sum(y3m * y3, axis=0, keepdims=True)
    scale3, shift3 = bn_scale_shift(s3, ss3, g3_ref[...], b3_ref[...])
    res = x_ref[g_rows:g_rows + r1, :].astype(jnp.float32)   # residual re-load
    out_ref[...] = jnp.maximum(y3 * scale3 + shift3 + res, 0.0)


def _blockdiag_weights(w2, groups):
    # w2 is in PyTorch layout (out=C1, in_per_group, 3, 3); build a
    # (9, C1, C1) block-diagonal [in, out] weight per kernel tap.
    c1, cg, kh, kw = w2.shape
    og = c1 // groups
    wbd = jnp.zeros((kh * kw, c1, c1), jnp.float32)
    for k in range(kh * kw):
        ky, kx = divmod(k, kw)
        for g in range(groups):
            blk = w2[g * og:(g + 1) * og, :, ky, kx].T          # (in, out)
            wbd = wbd.at[k, g * cg:(g + 1) * cg, g * og:(g + 1) * og].set(blk)
    return wbd


def my_bottleneck(x_nchw, params, cardinality, matmul_dtype=jnp.bfloat16):
    n, cin, h, w = x_nchw.shape
    p = params
    w1, w2, w3 = p["w1"], p["w2"], p["w3"]
    c1 = w1.shape[1]
    cout = w3.shape[1]
    assert cin == cout, "identity residual requires inplanes == planes * 4"

    md = jnp.dtype(matmul_dtype)
    packing = 4 // md.itemsize            # 1 for f32, 2 for bf16
    sub = 8 * packing                     # sublane alignment of the flat layout

    # lane-dense channel padding (multiples of 128)
    cinp, c1p, coutp = _round_up(cin, 128), _round_up(c1, 128), _round_up(cout, 128)

    Hp = h + 2
    Wp = _round_up(w + 2, sub)            # sublane-aligned padded row width
    G = _round_up(Wp + 1, sub)            # sublane-aligned guard rows
    R1 = n * Hp * Wp
    Rg = R1 + 2 * G

    # ---- input: NCHW -> NHWC; one pad does the spatial halo + W alignment +
    # channel lane pad; flatten; add guard rows for the conv2 window slices.
    x_nhwc = jnp.transpose(x_nchw, (0, 2, 3, 1))
    x_flat = jnp.pad(x_nhwc, ((0, 0), (1, 1), (1, Wp - w - 1),
                              (0, cinp - cin))).reshape(R1, cinp)
    x_g = jnp.pad(x_flat, ((G, G), (0, 0))).astype(md)          # (Rg, cinp)

    # interior mask (1 at real pixels, 0 at halo/alignment/guard rows)
    mask = jnp.pad(jnp.ones((n, h, w, 1), jnp.float32),
                   ((0, 0), (1, 1), (1, Wp - w - 1), (0, 0))).reshape(R1, 1)
    mask_g = jnp.pad(mask, ((G, G), (0, 0)))                    # (Rg, 1)

    # ---- weights / BN params, zero-padded to lane-dense shapes
    def pad_mat(a, s0, s1):
        return jnp.zeros((s0, s1), md).at[:a.shape[0], :a.shape[1]].set(a.astype(md))

    def pad_vec(v, s):
        return jnp.zeros((1, s), jnp.float32).at[0, :v.shape[0]].set(v)

    w1p = pad_mat(w1, cinp, c1p)
    w3p = pad_mat(w3, c1p, coutp)
    w2bd = _blockdiag_weights(w2, cardinality)                  # (9, c1, c1)
    w2p = jnp.zeros((9, c1p, c1p), md).at[:, :c1, :c1].set(w2bd.astype(md))
    g1p, b1p = pad_vec(p["g1"], c1p), pad_vec(p["b1"], c1p)
    g2p, b2p = pad_vec(p["g2"], c1p), pad_vec(p["b2"], c1p)
    g3p, b3p = pad_vec(p["g3"], coutp), pad_vec(p["b3"], coutp)

    def full(shape):
        return pl.BlockSpec(shape, lambda i, _s=shape: (0,) * len(_s))

    isz = md.itemsize
    flops = 2 * (Rg * cinp * c1p + 9 * R1 * c1p * c1p + R1 * c1p * coutp)
    bytes_accessed = (isz * (Rg * cinp + cinp * c1p + 9 * c1p * c1p + c1p * coutp)
                      + 4 * (Rg + 4 * c1p + 2 * coutp + R1 * coutp))
    cost = pl.CostEstimate(flops=flops, transcendentals=2 * c1p + coutp,
                           bytes_accessed=bytes_accessed)

    kernel = functools.partial(_bottleneck_kernel, n=n, h=h, w=w, wp=Wp, g_rows=G,
                               matmul_dtype=matmul_dtype)
    out2d = pl.pallas_call(
        kernel,
        out_shape=jax.ShapeDtypeStruct((R1, coutp), jnp.float32),
        grid_spec=pltpu.PrefetchScalarGridSpec(
            num_scalar_prefetch=0,
            grid=(1,),
            in_specs=[
                full((Rg, cinp)), full((Rg, 1)),
                full((cinp, c1p)), full((1, c1p)), full((1, c1p)),
                full((9, c1p, c1p)), full((1, c1p)), full((1, c1p)),
                full((c1p, coutp)), full((1, coutp)), full((1, coutp)),
            ],
            out_specs=full((R1, coutp)),
            scratch_shapes=[pltpu.VMEM((Rg, c1p), md)],         # h1 slab only
        ),
        compiler_params=pltpu.CompilerParams(
            dimension_semantics=("arbitrary",)),
        cost_estimate=cost,
    )(x_g, mask_g,
      w1p, g1p, b1p,
      w2p, g2p, b2p,
      w3p, g3p, b3p)

    # strip halo/alignment rows and channel pad, back to NCHW
    out = out2d.reshape(n, Hp, Wp, coutp)[:, 1:h + 1, 1:w + 1, :cout]
    return jnp.transpose(out, (0, 3, 1, 2))


def reference_bottleneck(x_nchw, params, cardinality):
    """Pure-JAX reference with the same semantics (for validation)."""
    x = jnp.transpose(x_nchw, (0, 2, 3, 1)).astype(jnp.float32)

    def bn(y, g, b):
        mean = jnp.mean(y, axis=(0, 1, 2), keepdims=True)
        var = jnp.mean((y - mean) ** 2, axis=(0, 1, 2), keepdims=True)
        return (y - mean) / jnp.sqrt(var + EPS) * g + b

    p = params
    y = jnp.einsum('nhwc,cd->nhwd', x, p["w1"], precision=lax.Precision.HIGHEST)
    y = jax.nn.relu(bn(y, p["g1"], p["b1"]))
    w2_hwio = jnp.transpose(p["w2"], (2, 3, 1, 0))               # (3,3,in/g,out)
    y = lax.conv_general_dilated(
        y, w2_hwio, window_strides=(1, 1), padding=((1, 1), (1, 1)),
        dimension_numbers=('NHWC', 'HWIO', 'NHWC'),
        feature_group_count=cardinality, precision=lax.Precision.HIGHEST)
    y = jax.nn.relu(bn(y, p["g2"], p["b2"]))
    y = jnp.einsum('nhwc,cd->nhwd', y, p["w3"], precision=lax.Precision.HIGHEST)
    y = jax.nn.relu(bn(y, p["g3"], p["b3"]) + x)
    return jnp.transpose(y, (0, 3, 1, 2))


def make_params(key, inplanes, planes, cardinality):
    c1 = planes * 2
    cout = planes * 4
    cg = c1 // cardinality
    ks = jax.random.split(key, 9)

    def rnd(k, shape, scale=0.1):
        return scale * jax.random.normal(k, shape, jnp.float32)

    return {
        "w1": rnd(ks[0], (inplanes, c1)),          # conv1 weight ([in, out])
        "g1": 1.0 + rnd(ks[1], (c1,)),
        "b1": rnd(ks[2], (c1,)),
        "w2": rnd(ks[3], (c1, cg, 3, 3)),          # grouped conv (PyTorch layout)
        "g2": 1.0 + rnd(ks[4], (c1,)),
        "b2": rnd(ks[5], (c1,)),
        "w3": rnd(ks[6], (c1, cout)),              # conv3 weight ([in, out])
        "g3": 1.0 + rnd(ks[7], (cout,)),
        "b3": rnd(ks[8], (cout,)),
    }


if __name__ == "__main__":
    # inplanes == planes * 4 so the identity residual path applies
    inplanes, planes, cardinality = 64, 16, 8
    N, H, W = 2, 8, 8

    key = jax.random.PRNGKey(0)
    kx, kp = jax.random.split(key)
    params = make_params(kp, inplanes, planes, cardinality)
    x = jax.random.normal(kx, (N, inplanes, H, W), jnp.float32)

    ref = reference_bottleneck(x, params, cardinality)

    # default fast path: bf16 MXU operands, f32 BN/output
    out = jax.block_until_ready(my_bottleneck(x, params, cardinality))
    assert out.shape == (N, planes * 4, H, W), out.shape
    err_bf16 = float(jnp.max(jnp.abs(out - ref)))
    # bf16 operands through three matmuls + three BNs: loose sanity tolerance
    assert err_bf16 < 0.25, f"bf16 path max abs error {err_bf16}"

    # f32 + HIGHEST debug path: tight agreement with the f32 reference
    out_f32 = jax.block_until_ready(
        my_bottleneck(x, params, cardinality, matmul_dtype=jnp.float32))
    err_f32 = float(jnp.max(jnp.abs(out_f32 - ref)))
    assert err_f32 < 2e-3, f"f32 path max abs error {err_f32}"

    print("KERNEL_OK")
</pallas_src>

<mosaic_0001>
module attributes {stable_mosaic.version = 11 : i64} {
  func.func @_bottleneck_kernel(%arg0: i32, %arg1: memref<384x128xbf16, #tpu.memory_space<vmem>>, %arg2: memref<384x1xf32, #tpu.memory_space<vmem>>, %arg3: memref<128x128xbf16, #tpu.memory_space<vmem>>, %arg4: memref<1x128xf32, #tpu.memory_space<vmem>>, %arg5: memref<1x128xf32, #tpu.memory_space<vmem>>, %arg6: memref<9x128x128xbf16, #tpu.memory_space<vmem>>, %arg7: memref<1x128xf32, #tpu.memory_space<vmem>>, %arg8: memref<1x128xf32, #tpu.memory_space<vmem>>, %arg9: memref<128x128xbf16, #tpu.memory_space<vmem>>, %arg10: memref<1x128xf32, #tpu.memory_space<vmem>>, %arg11: memref<1x128xf32, #tpu.memory_space<vmem>>, %arg12: memref<320x128xf32, #tpu.memory_space<vmem>>, %arg13: memref<384x128xbf16, #tpu.memory_space<vmem>>) attributes {dimension_semantics = [#tpu.dimension_semantics<arbitrary>], iteration_bounds = array<i64: 1>, scalar_prefetch = 0 : i64, scratch_operands = 1 : i64, tpu.core_type = #tpu.core_type<tc>, window_params = [{pipeline_mode = #tpu.pipeline_mode<synchronous>, transform_indices = @transform_0, window_bounds = array<i64: 384, 128>}, {pipeline_mode = #tpu.pipeline_mode<synchronous>, transform_indices = @transform_1, window_bounds = array<i64: 384, 1>}, {pipeline_mode = #tpu.pipeline_mode<synchronous>, transform_indices = @transform_2, window_bounds = array<i64: 128, 128>}, {pipeline_mode = #tpu.pipeline_mode<synchronous>, transform_indices = @transform_3, window_bounds = array<i64: 1, 128>}, {pipeline_mode = #tpu.pipeline_mode<synchronous>, transform_indices = @transform_4, window_bounds = array<i64: 1, 128>}, {pipeline_mode = #tpu.pipeline_mode<synchronous>, transform_indices = @transform_5, window_bounds = array<i64: 9, 128, 128>}, {pipeline_mode = #tpu.pipeline_mode<synchronous>, transform_indices = @transform_6, window_bounds = array<i64: 1, 128>}, {pipeline_mode = #tpu.pipeline_mode<synchronous>, transform_indices = @transform_7, window_bounds = array<i64: 1, 128>}, {pipeline_mode = #tpu.pipeline_mode<synchronous>, transform_indices = @transform_8, window_bounds = array<i64: 128, 128>}, {pipeline_mode = #tpu.pipeline_mode<synchronous>, transform_indices = @transform_9, window_bounds = array<i64: 1, 128>}, {pipeline_mode = #tpu.pipeline_mode<synchronous>, transform_indices = @transform_10, window_bounds = array<i64: 1, 128>}, {pipeline_mode = #tpu.pipeline_mode<synchronous>, transform_indices = @transform_11, window_bounds = array<i64: 320, 128>}]} {
    %c0 = arith.constant 0 : index
    %c0_0 = arith.constant 0 : index
    %0 = vector.load %arg1[%c0, %c0_0] : memref<384x128xbf16, #tpu.memory_space<vmem>>, vector<384x128xbf16>
    %c0_1 = arith.constant 0 : index
    %c0_2 = arith.constant 0 : index
    %1 = vector.load %arg3[%c0_1, %c0_2] : memref<128x128xbf16, #tpu.memory_space<vmem>>, vector<128x128xbf16>
    %cst = arith.constant dense<0.000000e+00> : vector<384x128xf32>
    %2 = tpu.matmul %0, %1, %cst {dimension_numbers = #tpu.dot_dimension_numbers<[1], [0], [0], [1], [0, 0, 1, 1], [], []>} : vector<384x128xbf16>, vector<128x128xbf16>, vector<384x128xf32> -> vector<384x128xf32>
    %cst_3 = arith.constant dense<0.000000e+00> : vector<128xf32>
    %3 = vector.multi_reduction <add>, %2, %cst_3 [0] : vector<384x128xf32> to vector<128xf32>
    %4 = vector.shape_cast %3 : vector<128xf32> to vector<1x128xf32>
    %5 = arith.mulf %2, %2 : vector<384x128xf32>
    %cst_4 = arith.constant dense<0.000000e+00> : vector<128xf32>
    %6 = vector.multi_reduction <add>, %5, %cst_4 [0] : vector<384x128xf32> to vector<128xf32>
    %7 = vector.shape_cast %6 : vector<128xf32> to vector<1x128xf32>
    %c0_5 = arith.constant 0 : index
    %c0_6 = arith.constant 0 : index
    %8 = vector.load %arg4[%c0_5, %c0_6] : memref<1x128xf32, #tpu.memory_space<vmem>>, vector<1x128xf32>
    %c0_7 = arith.constant 0 : index
    %c0_8 = arith.constant 0 : index
    %9 = vector.load %arg5[%c0_7, %c0_8] : memref<1x128xf32, #tpu.memory_space<vmem>>, vector<1x128xf32>
    %cst_9 = arith.constant 7.812500e-03 : f32
    %10 = vector.broadcast %cst_9 : f32 to vector<1x128xf32>
    %11 = arith.mulf %4, %10 : vector<1x128xf32>
    %cst_10 = arith.constant 7.812500e-03 : f32
    %12 = vector.broadcast %cst_10 : f32 to vector<1x128xf32>
    %13 = arith.mulf %7, %12 : vector<1x128xf32>
    %14 = arith.mulf %11, %11 : vector<1x128xf32>
    %15 = arith.subf %13, %14 : vector<1x128xf32>
    %cst_11 = arith.constant 0.000000e+00 : f32
    %16 = vector.broadcast %cst_11 : f32 to vector<1x128xf32>
    %17 = arith.maximumf %15, %16 : vector<1x128xf32>
    %cst_12 = arith.constant 9.99999974E-6 : f32
    %18 = vector.broadcast %cst_12 : f32 to vector<1x128xf32>
    %19 = arith.addf %17, %18 : vector<1x128xf32>
    %20 = math.rsqrt %19 : vector<1x128xf32>
    %21 = arith.mulf %8, %20 : vector<1x128xf32>
    %22 = arith.mulf %11, %21 : vector<1x128xf32>
    %23 = arith.subf %9, %22 : vector<1x128xf32>
    %c0_13 = arith.constant 0 : index
    %c0_14 = arith.constant 0 : index
    %24 = vector.load %arg2[%c0_13, %c0_14] : memref<384x1xf32, #tpu.memory_space<vmem>>, vector<384x1xf32>
    %25 = vector.broadcast %21 : vector<1x128xf32> to vector<384x128xf32>
    %26 = arith.mulf %2, %25 : vector<384x128xf32>
    %27 = vector.broadcast %23 : vector<1x128xf32> to vector<384x128xf32>
    %28 = arith.addf %26, %27 : vector<384x128xf32>
    %cst_15 = arith.constant 0.000000e+00 : f32
    %29 = vector.broadcast %cst_15 : f32 to vector<384x128xf32>
    %30 = arith.maximumf %28, %29 : vector<384x128xf32>
    %31 = vector.broadcast %24 : vector<384x1xf32> to vector<384x128xf32>
    %32 = arith.mulf %30, %31 : vector<384x128xf32>
    %33 = arith.truncf %32 : vector<384x128xf32> to vector<384x128xbf16>
    %c0_16 = arith.constant 0 : index
    %c0_17 = arith.constant 0 : index
    %34 = vector.load %arg13[%c0_16, %c0_17] : memref<384x128xbf16, #tpu.memory_space<vmem>>, vector<384x128xbf16>
    tpu.vector_store %arg13[%c0_16, %c0_17], %33 {strides = array<i32>} : memref<384x128xbf16, #tpu.memory_space<vmem>>, vector<384x128xbf16>,
    %c15 = arith.constant 15 : index
    %c0_18 = arith.constant 0 : index
    %35 = vector.load %arg13[%c15, %c0_18] : memref<384x128xbf16, #tpu.memory_space<vmem>>, vector<320x128xbf16>
    %c0_19 = arith.constant 0 : index
    %c0_20 = arith.constant 0 : index
    %c0_21 = arith.constant 0 : index
    %36 = vector.load %arg6[%c0_19, %c0_20, %c0_21] : memref<9x128x128xbf16, #tpu.memory_space<vmem>>, vector<1x128x128xbf16>
    %37 = vector.shape_cast %36 : vector<1x128x128xbf16> to vector<128x128xbf16>
    %cst_22 = arith.constant dense<0.000000e+00> : vector<320x128xf32>
    %38 = tpu.matmul %35, %37, %cst_22 {dimension_numbers = #tpu.dot_dimension_numbers<[1], [0], [0], [1], [0, 0, 1, 1], [], []>} : vector<320x128xbf16>, vector<128x128xbf16>, vector<320x128xf32> -> vector<320x128xf32>
    %c16 = arith.constant 16 : index
    %c0_23 = arith.constant 0 : index
    %39 = vector.load %arg13[%c16, %c0_23] : memref<384x128xbf16, #tpu.memory_space<vmem>>, vector<320x128xbf16>
    %c1 = arith.constant 1 : index
    %c0_24 = arith.constant 0 : index
    %c0_25 = arith.constant 0 : index
    %40 = vector.load %arg6[%c1, %c0_24, %c0_25] : memref<9x128x128xbf16, #tpu.memory_space<vmem>>, vector<1x128x128xbf16>
    %41 = vector.shape_cast %40 : vector<1x128x128xbf16> to vector<128x128xbf16>
    %cst_26 = arith.constant dense<0.000000e+00> : vector<320x128xf32>
    %42 = tpu.matmul %39, %41, %cst_26 {dimension_numbers = #tpu.dot_dimension_numbers<[1], [0], [0], [1], [0, 0, 1, 1], [], []>} : vector<320x128xbf16>, vector<128x128xbf16>, vector<320x128xf32> -> vector<320x128xf32>
    %43 = arith.addf %38, %42 : vector<320x128xf32>
    %c17 = arith.constant 17 : index
    %c0_27 = arith.constant 0 : index
    %44 = vector.load %arg13[%c17, %c0_27] : memref<384x128xbf16, #tpu.memory_space<vmem>>, vector<320x128xbf16>
    %c2 = arith.constant 2 : index
    %c0_28 = arith.constant 0 : index
    %c0_29 = arith.constant 0 : index
    %45 = vector.load %arg6[%c2, %c0_28, %c0_29] : memref<9x128x128xbf16, #tpu.memory_space<vmem>>, vector<1x128x128xbf16>
    %46 = vector.shape_cast %45 : vector<1x128x128xbf16> to vector<128x128xbf16>
    %cst_30 = arith.constant dense<0.000000e+00> : vector<320x128xf32>
    %47 = tpu.matmul %44, %46, %cst_30 {dimension_numbers = #tpu.dot_dimension_numbers<[1], [0], [0], [1], [0, 0, 1, 1], [], []>} : vector<320x128xbf16>, vector<128x128xbf16>, vector<320x128xf32> -> vector<320x128xf32>
    %48 = arith.addf %43, %47 : vector<320x128xf32>
    %c31 = arith.constant 31 : index
    %c0_31 = arith.constant 0 : index
    %49 = vector.load %arg13[%c31, %c0_31] : memref<384x128xbf16, #tpu.memory_space<vmem>>, vector<320x128xbf16>
    %c3 = arith.constant 3 : index
    %c0_32 = arith.constant 0 : index
    %c0_33 = arith.constant 0 : index
    %50 = vector.load %arg6[%c3, %c0_32, %c0_33] : memref<9x128x128xbf16, #tpu.memory_space<vmem>>, vector<1x128x128xbf16>
    %51 = vector.shape_cast %50 : vector<1x128x128xbf16> to vector<128x128xbf16>
    %cst_34 = arith.constant dense<0.000000e+00> : vector<320x128xf32>
    %52 = tpu.matmul %49, %51, %cst_34 {dimension_numbers = #tpu.dot_dimension_numbers<[1], [0], [0], [1], [0, 0, 1, 1], [], []>} : vector<320x128xbf16>, vector<128x128xbf16>, vector<320x128xf32> -> vector<320x128xf32>
    %53 = arith.addf %48, %52 : vector<320x128xf32>
    %c32 = arith.constant 32 : index
    %c0_35 = arith.constant 0 : index
    %54 = vector.load %arg13[%c32, %c0_35] : memref<384x128xbf16, #tpu.memory_space<vmem>>, vector<320x128xbf16>
    %c4 = arith.constant 4 : index
    %c0_36 = arith.constant 0 : index
    %c0_37 = arith.constant 0 : index
    %55 = vector.load %arg6[%c4, %c0_36, %c0_37] : memref<9x128x128xbf16, #tpu.memory_space<vmem>>, vector<1x128x128xbf16>
    %56 = vector.shape_cast %55 : vector<1x128x128xbf16> to vector<128x128xbf16>
    %cst_38 = arith.constant dense<0.000000e+00> : vector<320x128xf32>
    %57 = tpu.matmul %54, %56, %cst_38 {dimension_numbers = #tpu.dot_dimension_numbers<[1], [0], [0], [1], [0, 0, 1, 1], [], []>} : vector<320x128xbf16>, vector<128x128xbf16>, vector<320x128xf32> -> vector<320x128xf32>
    %58 = arith.addf %53, %57 : vector<320x128xf32>
    %c33 = arith.constant 33 : index
    %c0_39 = arith.constant 0 : index
    %59 = vector.load %arg13[%c33, %c0_39] : memref<384x128xbf16, #tpu.memory_space<vmem>>, vector<320x128xbf16>
    %c5 = arith.constant 5 : index
    %c0_40 = arith.constant 0 : index
    %c0_41 = arith.constant 0 : index
    %60 = vector.load %arg6[%c5, %c0_40, %c0_41] : memref<9x128x128xbf16, #tpu.memory_space<vmem>>, vector<1x128x128xbf16>
    %61 = vector.shape_cast %60 : vector<1x128x128xbf16> to vector<128x128xbf16>
    %cst_42 = arith.constant dense<0.000000e+00> : vector<320x128xf32>
    %62 = tpu.matmul %59, %61, %cst_42 {dimension_numbers = #tpu.dot_dimension_numbers<[1], [0], [0], [1], [0, 0, 1, 1], [], []>} : vector<320x128xbf16>, vector<128x128xbf16>, vector<320x128xf32> -> vector<320x128xf32>
    %63 = arith.addf %58, %62 : vector<320x128xf32>
    %c47 = arith.constant 47 : index
    %c0_43 = arith.constant 0 : index
    %64 = vector.load %arg13[%c47, %c0_43] : memref<384x128xbf16, #tpu.memory_space<vmem>>, vector<320x128xbf16>
    %c6 = arith.constant 6 : index
    %c0_44 = arith.constant 0 : index
    %c0_45 = arith.constant 0 : index
    %65 = vector.load %arg6[%c6, %c0_44, %c0_45] : memref<9x128x128xbf16, #tpu.memory_space<vmem>>, vector<1x128x128xbf16>
    %66 = vector.shape_cast %65 : vector<1x128x128xbf16> to vector<128x128xbf16>
    %cst_46 = arith.constant dense<0.000000e+00> : vector<320x128xf32>
    %67 = tpu.matmul %64, %66, %cst_46 {dimension_numbers = #tpu.dot_dimension_numbers<[1], [0], [0], [1], [0, 0, 1, 1], [], []>} : vector<320x128xbf16>, vector<128x128xbf16>, vector<320x128xf32> -> vector<320x128xf32>
    %68 = arith.addf %63, %67 : vector<320x128xf32>
    %c48 = arith.constant 48 : index
    %c0_47 = arith.constant 0 : index
    %69 = vector.load %arg13[%c48, %c0_47] : memref<384x128xbf16, #tpu.memory_space<vmem>>, vector<320x128xbf16>
    %c7 = arith.constant 7 : index
    %c0_48 = arith.constant 0 : index
    %c0_49 = arith.constant 0 : index
    %70 = vector.load %arg6[%c7, %c0_48, %c0_49] : memref<9x128x128xbf16, #tpu.memory_space<vmem>>, vector<1x128x128xbf16>
    %71 = vector.shape_cast %70 : vector<1x128x128xbf16> to vector<128x128xbf16>
    %cst_50 = arith.constant dense<0.000000e+00> : vector<320x128xf32>
    %72 = tpu.matmul %69, %71, %cst_50 {dimension_numbers = #tpu.dot_dimension_numbers<[1], [0], [0], [1], [0, 0, 1, 1], [], []>} : vector<320x128xbf16>, vector<128x128xbf16>, vector<320x128xf32> -> vector<320x128xf32>
    %73 = arith.addf %68, %72 : vector<320x128xf32>
    %c49 = arith.constant 49 : index
    %c0_51 = arith.constant 0 : index
    %74 = vector.load %arg13[%c49, %c0_51] : memref<384x128xbf16, #tpu.memory_space<vmem>>, vector<320x128xbf16>
    %c8 = arith.constant 8 : index
    %c0_52 = arith.constant 0 : index
    %c0_53 = arith.constant 0 : index
    %75 = vector.load %arg6[%c8, %c0_52, %c0_53] : memref<9x128x128xbf16, #tpu.memory_space<vmem>>, vector<1x128x128xbf16>
    %76 = vector.shape_cast %75 : vector<1x128x128xbf16> to vector<128x128xbf16>
    %cst_54 = arith.constant dense<0.000000e+00> : vector<320x128xf32>
    %77 = tpu.matmul %74, %76, %cst_54 {dimension_numbers = #tpu.dot_dimension_numbers<[1], [0], [0], [1], [0, 0, 1, 1], [], []>} : vector<320x128xbf16>, vector<128x128xbf16>, vector<320x128xf32> -> vector<320x128xf32>
    %78 = arith.addf %73, %77 : vector<320x128xf32>
    %c32_55 = arith.constant 32 : index
    %c0_56 = arith.constant 0 : index
    %79 = vector.load %arg2[%c32_55, %c0_56] : memref<384x1xf32, #tpu.memory_space<vmem>>, vector<320x1xf32>
    %80 = vector.broadcast %79 : vector<320x1xf32> to vector<320x128xf32>
    %81 = arith.mulf %78, %80 : vector<320x128xf32>
    %cst_57 = arith.constant dense<0.000000e+00> : vector<128xf32>
    %82 = vector.multi_reduction <add>, %81, %cst_57 [0] : vector<320x128xf32> to vector<128xf32>
    %83 = vector.shape_cast %82 : vector<128xf32> to vector<1x128xf32>
    %84 = arith.mulf %81, %78 : vector<320x128xf32>
    %cst_58 = arith.constant dense<0.000000e+00> : vector<128xf32>
    %85 = vector.multi_reduction <add>, %84, %cst_58 [0] : vector<320x128xf32> to vector<128xf32>
    %86 = vector.shape_cast %85 : vector<128xf32> to vector<1x128xf32>
    %c0_59 = arith.constant 0 : index
    %c0_60 = arith.constant 0 : index
    %87 = vector.load %arg7[%c0_59, %c0_60] : memref<1x128xf32, #tpu.memory_space<vmem>>, vector<1x128xf32>
    %c0_61 = arith.constant 0 : index
    %c0_62 = arith.constant 0 : index
    %88 = vector.load %arg8[%c0_61, %c0_62] : memref<1x128xf32, #tpu.memory_space<vmem>>, vector<1x128xf32>
    %cst_63 = arith.constant 7.812500e-03 : f32
    %89 = vector.broadcast %cst_63 : f32 to vector<1x128xf32>
    %90 = arith.mulf %83, %89 : vector<1x128xf32>
    %cst_64 = arith.constant 7.812500e-03 : f32
    %91 = vector.broadcast %cst_64 : f32 to vector<1x128xf32>
    %92 = arith.mulf %86, %91 : vector<1x128xf32>
    %93 = arith.mulf %90, %90 : vector<1x128xf32>
    %94 = arith.subf %92, %93 : vector<1x128xf32>
    %cst_65 = arith.constant 0.000000e+00 : f32
    %95 = vector.broadcast %cst_65 : f32 to vector<1x128xf32>
    %96 = arith.maximumf %94, %95 : vector<1x128xf32>
    %cst_66 = arith.constant 9.99999974E-6 : f32
    %97 = vector.broadcast %cst_66 : f32 to vector<1x128xf32>
    %98 = arith.addf %96, %97 : vector<1x128xf32>
    %99 = math.rsqrt %98 : vector<1x128xf32>
    %100 = arith.mulf %87, %99 : vector<1x128xf32>
    %101 = arith.mulf %90, %100 : vector<1x128xf32>
    %102 = arith.subf %88, %101 : vector<1x128xf32>
    %103 = vector.broadcast %100 : vector<1x128xf32> to vector<320x128xf32>
    %104 = arith.mulf %78, %103 : vector<320x128xf32>
    %105 = vector.broadcast %102 : vector<1x128xf32> to vector<320x128xf32>
    %106 = arith.addf %104, %105 : vector<320x128xf32>
    %cst_67 = arith.constant 0.000000e+00 : f32
    %107 = vector.broadcast %cst_67 : f32 to vector<320x128xf32>
    %108 = arith.maximumf %106, %107 : vector<320x128xf32>
    %c0_68 = arith.constant 0 : index
    %c0_69 = arith.constant 0 : index
    %109 = vector.load %arg9[%c0_68, %c0_69] : memref<128x128xbf16, #tpu.memory_space<vmem>>, vector<128x128xbf16>
    %110 = arith.truncf %108 : vector<320x128xf32> to vector<320x128xbf16>
    %cst_70 = arith.constant dense<0.000000e+00> : vector<320x128xf32>
    %111 = tpu.matmul %110, %109, %cst_70 {dimension_numbers = #tpu.dot_dimension_numbers<[1], [0], [0], [1], [0, 0, 1, 1], [], []>} : vector<320x128xbf16>, vector<128x128xbf16>, vector<320x128xf32> -> vector<320x128xf32>
    %112 = vector.broadcast %79 : vector<320x1xf32> to vector<320x128xf32>
    %113 = arith.mulf %111, %112 : vector<320x128xf32>
    %cst_71 = arith.constant dense<0.000000e+00> : vector<128xf32>
    %114 = vector.multi_reduction <add>, %113, %cst_71 [0] : vector<320x128xf32> to vector<128xf32>
    %115 = vector.shape_cast %114 : vector<128xf32> to vector<1x128xf32>
    %116 = arith.mulf %113, %111 : vector<320x128xf32>
    %cst_72 = arith.constant dense<0.000000e+00> : vector<128xf32>
    %117 = vector.multi_reduction <add>, %116, %cst_72 [0] : vector<320x128xf32> to vector<128xf32>
    %118 = vector.shape_cast %117 : vector<128xf32> to vector<1x128xf32>
    %c0_73 = arith.constant 0 : index
    %c0_74 = arith.constant 0 : index
    %119 = vector.load %arg10[%c0_73, %c0_74] : memref<1x128xf32, #tpu.memory_space<vmem>>, vector<1x128xf32>
    %c0_75 = arith.constant 0 : index
    %c0_76 = arith.constant 0 : index
    %120 = vector.load %arg11[%c0_75, %c0_76] : memref<1x128xf32, #tpu.memory_space<vmem>>, vector<1x128xf32>
    %cst_77 = arith.constant 7.812500e-03 : f32
    %121 = vector.broadcast %cst_77 : f32 to vector<1x128xf32>
    %122 = arith.mulf %115, %121 : vector<1x128xf32>
    %cst_78 = arith.constant 7.812500e-03 : f32
    %123 = vector.broadcast %cst_78 : f32 to vector<1x128xf32>
    %124 = arith.mulf %118, %123 : vector<1x128xf32>
    %125 = arith.mulf %122, %122 : vector<1x128xf32>
    %126 = arith.subf %124, %125 : vector<1x128xf32>
    %cst_79 = arith.constant 0.000000e+00 : f32
    %127 = vector.broadcast %cst_79 : f32 to vector<1x128xf32>
    %128 = arith.maximumf %126, %127 : vector<1x128xf32>
    %cst_80 = arith.constant 9.99999974E-6 : f32
    %129 = vector.broadcast %cst_80 : f32 to vector<1x128xf32>
    %130 = arith.addf %128, %129 : vector<1x128xf32>
    %131 = math.rsqrt %130 : vector<1x128xf32>
    %132 = arith.mulf %119, %131 : vector<1x128xf32>
    %133 = arith.mulf %122, %132 : vector<1x128xf32>
    %134 = arith.subf %120, %133 : vector<1x128xf32>
    %c32_81 = arith.constant 32 : index
    %c0_82 = arith.constant 0 : index
    %135 = vector.load %arg1[%c32_81, %c0_82] : memref<384x128xbf16, #tpu.memory_space<vmem>>, vector<320x128xbf16>
    %136 = arith.extf %135 : vector<320x128xbf16> to vector<320x128xf32>
    %137 = vector.broadcast %132 : vector<1x128xf32> to vector<320x128xf32>
    %138 = arith.mulf %111, %137 : vector<320x128xf32>
    %139 = vector.broadcast %134 : vector<1x128xf32> to vector<320x128xf32>
    %140 = arith.addf %138, %139 : vector<320x128xf32>
    %141 = arith.addf %140, %136 : vector<320x128xf32>
    %cst_83 = arith.constant 0.000000e+00 : f32
    %142 = vector.broadcast %cst_83 : f32 to vector<320x128xf32>
    %143 = arith.maximumf %141, %142 : vector<320x128xf32>
    %c0_84 = arith.constant 0 : index
    %c0_85 = arith.constant 0 : index
    %144 = vector.load %arg12[%c0_84, %c0_85] : memref<320x128xf32, #tpu.memory_space<vmem>>, vector<320x128xf32>
    tpu.vector_store %arg12[%c0_84, %c0_85], %143 {strides = array<i32>} : memref<320x128xf32, #tpu.memory_space<vmem>>, vector<320x128xf32>,
    return
  }
  func.func @transform_0(%arg0: i32) -> (i32, i32) {
    %c0_i32 = arith.constant 0 : i32
    %c0_i32_0 = arith.constant 0 : i32
    %c0_i32_1 = arith.constant 0 : i32
    return %c0_i32, %c0_i32_0 : i32, i32
  }
  func.func @transform_1(%arg0: i32) -> (i32, i32) {
    %c0_i32 = arith.constant 0 : i32
    %c0_i32_0 = arith.constant 0 : i32
    %c0_i32_1 = arith.constant 0 : i32
    return %c0_i32, %c0_i32_0 : i32, i32
  }
  func.func @transform_2(%arg0: i32) -> (i32, i32) {
    %c0_i32 = arith.constant 0 : i32
    %c0_i32_0 = arith.constant 0 : i32
    %c0_i32_1 = arith.constant 0 : i32
    return %c0_i32, %c0_i32_0 : i32, i32
  }
  func.func @transform_3(%arg0: i32) -> (i32, i32) {
    %c0_i32 = arith.constant 0 : i32
    %c0_i32_0 = arith.constant 0 : i32
    %c0_i32_1 = arith.constant 0 : i32
    return %c0_i32, %c0_i32_0 : i32, i32
  }
  func.func @transform_4(%arg0: i32) -> (i32, i32) {
    %c0_i32 = arith.constant 0 : i32
    %c0_i32_0 = arith.constant 0 : i32
    %c0_i32_1 = arith.constant 0 : i32
    return %c0_i32, %c0_i32_0 : i32, i32
  }
  func.func @transform_5(%arg0: i32) -> (i32, i32, i32) {
    %c0_i32 = arith.constant 0 : i32
    %c0_i32_0 = arith.constant 0 : i32
    %c0_i32_1 = arith.constant 0 : i32
    %c0_i32_2 = arith.constant 0 : i32
    return %c0_i32, %c0_i32_0, %c0_i32_1 : i32, i32, i32
  }
  func.func @transform_6(%arg0: i32) -> (i32, i32) {
    %c0_i32 = arith.constant 0 : i32
    %c0_i32_0 = arith.constant 0 : i32
    %c0_i32_1 = arith.constant 0 : i32
    return %c0_i32, %c0_i32_0 : i32, i32
  }
  func.func @transform_7(%arg0: i32) -> (i32, i32) {
    %c0_i32 = arith.constant 0 : i32
    %c0_i32_0 = arith.constant 0 : i32
    %c0_i32_1 = arith.constant 0 : i32
    return %c0_i32, %c0_i32_0 : i32, i32
  }
  func.func @transform_8(%arg0: i32) -> (i32, i32) {
    %c0_i32 = arith.constant 0 : i32
    %c0_i32_0 = arith.constant 0 : i32
    %c0_i32_1 = arith.constant 0 : i32
    return %c0_i32, %c0_i32_0 : i32, i32
  }
  func.func @transform_9(%arg0: i32) -> (i32, i32) {
    %c0_i32 = arith.constant 0 : i32
    %c0_i32_0 = arith.constant 0 : i32
    %c0_i32_1 = arith.constant 0 : i32
    return %c0_i32, %c0_i32_0 : i32, i32
  }
  func.func @transform_10(%arg0: i32) -> (i32, i32) {
    %c0_i32 = arith.constant 0 : i32
    %c0_i32_0 = arith.constant 0 : i32
    %c0_i32_1 = arith.constant 0 : i32
    return %c0_i32, %c0_i32_0 : i32, i32
  }
  func.func @transform_11(%arg0: i32) -> (i32, i32) {
    %c0_i32 = arith.constant 0 : i32
    %c0_i32_0 = arith.constant 0 : i32
    %c0_i32_1 = arith.constant 0 : i32
    return %c0_i32, %c0_i32_0 : i32, i32
  }
}

</mosaic_0001>

<bundles_post_ra>
// kernel: tpu_custom_call.1
= control target key start
LH: loop header
LB: loop body
LE: loop exit
PB: predicated region body
PF: predicated region fallthrough
CT: control target
= control target key end

     0   :  { %16 = vsyncpa [#allocation4], 0  ;;  %s11006_s0 = inlined_call_operand.vmem [shape: bf16[384,128], index: 0, kind: input, shape index: {}]   ;;  %s11007_s1 = inlined_call_operand.vmem [shape: f32[384,1], index: 1, kind: input, shape index: {}]   ;;  %s11008_s2 = inlined_call_operand.vmem [shape: bf16[128,128], index: 2, kind: input, shape index: {}]   ;;  %s11009_s3 = inlined_call_operand.vmem [shape: f32[1,128], index: 3, kind: input, shape index: {}]   ;;  %s11010_s4 = inlined_call_operand.vmem [shape: f32[1,128], index: 4, kind: input, shape index: {}]   ;;  %s11011_s5 = inlined_call_operand.hbm [shape: bf16[9,128,128], index: 5, kind: input, shape index: {}]   ;;  %s11012_s6 = inlined_call_operand.vmem [shape: f32[1,128], index: 6, kind: input, shape index: {}]   ;;  %s11013_s7 = inlined_call_operand.vmem [shape: f32[1,128], index: 7, kind: input, shape index: {}]   ;;  %s11014_s8 = inlined_call_operand.vmem [shape: bf16[128,128], index: 8, kind: input, shape index: {}]   ;;  %s11015_s9 = inlined_call_operand.vmem [shape: f32[1,128], index: 9, kind: input, shape index: {}]   ;;  %s11016_s10 = inlined_call_operand.vmem [shape: f32[1,128], index: 10, kind: input, shape index: {}]   ;;  %s11017_s11 = inlined_call_operand.hbm [shape: f32[320,128], index: 11, kind: output, shape index: {}]  }
   0x1   :  { %17 = vsyncpa [#allocation5], 0  ;;  %s7835_s17 = smov [#allocation3]   ;;  %s7787_s21 = scalar_lea.hbm %s11011_s5, 9216 }
   0x2   :  { %s33_s18 = sshll.u32 %s7835_s17, 4  ;;  %p7788_p0 = scmp.ne.s32.totalorder %s11011_s5, %s7787_s21  ;;  %s34_s18 = int_to_ptr.vmem [resolvable:$true] %s33_s18 }
   0x3   :  { %p7791_p1 = scmp.lt.u32.totalorder %s7787_s21, %s11011_s5 }
   0x5   :  { %p7793_p2 = pnand %p7791_p1, %p7788_p0 }
   0x7   :  { %7796 = shalt.err (!%p7793_p2)
}
   0x8   :  { %s7797_s26 = scalar_lea.vmem %s34_s18, 9216  ;;  %p7802_p4 = scmp.lt.s32.totalorder %s34_s18, %s34_s18 }
   0x9   :  { %p7798_p3 = scmp.ne.s32.totalorder %s34_s18, %s7797_s26  ;;  %p7803_p5 = scmp.lt.s32.totalorder %s7797_s26, %s7797_s26 }
   0xb   :  { %p7804_p6 = por %p7803_p5, %p7802_p4 }
   0xd   :  { %p7805_p7 = pnand %p7804_p6, %p7798_p3 }
   0xf   :  { %7808 = shalt.err (!%p7805_p7)
}
  0x10   :  { %s7836_s27 = smov 64   ;;  %s7837_s28 = smov 4  }
  0x11   :  { %39 = dma.hbm_to_vmem [thread:$0]  %s11011_s5, 9216, %s34_s18, [#allocation4], %s7836_s27, %s7836_s27, %s7837_s28  }
  0x12   :  { %7831 = dma.done.wait [#allocation4], 9216  }
  0x13   :  { %7832 = vsyncadd [#allocation4], 4294958080  ;;  %v7838_v0 = vmov 0   ;;  %v7661_v1 = vld [vmem:[%s11008_s2] sm:$0xff]   ;;  %v7662_v2 = vld [vmem:[%s11008_s2 + $0x8] sm:$0xff]  }
  0x14   :  { %7660 = vset.pattern.permute.xlu1 %v7838_v0  ;;  %7659 = vset.pattern.permute.xlu0 %v7838_v0  ;;  %v7663_v3 = vld [vmem:[%s11008_s2 + $0x10] sm:$0xff]   ;;  %v7664_v4 = vld [vmem:[%s11008_s2 + $0x18] sm:$0xff]   ;;  %v7669_v5 = vld [vmem:[%s11006_s0] sm:$0xff]   ;;  %vm1536_vm0 = vsmask.f32 256 }
  0x15   :  { %6692 = vmatprep.subr.bf16.mxu0 %v7661_v1  ;;  %6708 = vmatprep.mubr.bf16.mxu0 %v7669_v5  ;;  %v7665_v6 = vld [vmem:[%s11008_s2 + $0x20] sm:$0xff]   ;;  %v7666_v7 = vld [vmem:[%s11008_s2 + $0x28] sm:$0xff]   ;;  %v7667_v8 = vld [vmem:[%s11008_s2 + $0x30] sm:$0xff]   ;;  %vm2000_vm1 = vsmask.f32 7424 }
  0x16   :  { %6693 = vmatpush3.bf16.msra.mxu0 %v7661_v1  ;;  %v7941_v9 = vld [vmem:[%s11007_s1 + $0xb0] sm:$0xff]  ;;  %v7946_v10 = vld [vmem:[%s11007_s1 + $0xa0] sm:$0xff]  ;;  %v7953_v11 = vld [vmem:[%s11007_s1 + $0xb8] sm:$0xff] }
  0x17   :  { %6694 = vmatprep.subr.bf16.mxu0 %v7662_v2  ;;  %1017 = vperm.xlu1 %7660, %v7941_v9   ;;  %v7958_v12 = vld [vmem:[%s11007_s1 + $0xa8] sm:$0xff]  ;;  %v7668_v13 = vld [vmem:[%s11008_s2 + $0x38] sm:$0xff]   ;;  %v7973_v15 = vld [vmem:[%s11007_s1 + $0x90] sm:$0xff] }
  0x18   :  { %1007 = vperm.xlu0 %7659, %v7946_v10   ;;  %v7968_v14 = vld [vmem:[%s11007_s1 + $0x98] sm:$0xff]  ;;  %v7670_v16 = vld [vmem:[%s11006_s0 + $0x8] sm:$0xff]   ;;  %v7988_v18 = vld [vmem:[%s11007_s1 + $0xc0] sm:$0xff] }
  0x19   :  { %v7983_v17 = vld [vmem:[%s11007_s1 + $0xc8] sm:$0xff]  ;;  %v7671_v19 = vld [vmem:[%s11006_s0 + $0x10] sm:$0xff]   ;;  %v7998_v20 = vld [vmem:[%s11007_s1 + $0xd8] sm:$0xff] }
  0x1a   :  { %6695 = vmatpush3.bf16.msra.mxu0 %v7662_v2  ;;  %v8003_v21 = vld [vmem:[%s11007_s1 + $0xd0] sm:$0xff]  ;;  %v7672_v22 = vld [vmem:[%s11006_s0 + $0x18] sm:$0xff]   ;;  %v8013_v23 = vld [vmem:[%s11007_s1 + $0xe8] sm:$0xff] }
  0x1b   :  { %6696 = vmatprep.subr.bf16.mxu0 %v7663_v3  ;;  %1022 = vperm.xlu1 %7660, %v7953_v11   ;;  %v8018_v24 = vld [vmem:[%s11007_s1 + $0xe0] sm:$0xff]  ;;  %v8028_v26 = vld [vmem:[%s11007_s1 + $0xf8] sm:$0xff]  ;;  %v8033_v27 = vld [vmem:[%s11007_s1 + $0xf0] sm:$0xff] }
  0x1c   :  { %1012 = vperm.xlu0 %7659, %v7958_v12   ;;  %v7673_v25 = vld [vmem:[%s11006_s0 + $0x20] sm:$0xff]   ;;  %v7674_v28 = vld [vmem:[%s11006_s0 + $0x28] sm:$0xff]   ;;  %v7675_v31 = vld [vmem:[%s11006_s0 + $0x30] sm:$0xff]  }
  0x1d   :  { %v8043_v29 = vld [vmem:[%s11007_s1 + $0x108] sm:$0xff]  ;;  %v8048_v30 = vld [vmem:[%s11007_s1 + $0x100] sm:$0xff]  ;;  %v8056_v32 = vld [vmem:[%s11007_s1 + $0x118] sm:$0xff] }
  0x1e   :  { %6697 = vmatpush3.bf16.msra.mxu0 %v7663_v3  ;;  %v8061_v33 = vld [vmem:[%s11007_s1 + $0x110] sm:$0xff]  ;;  %v7676_v34 = vld [vmem:[%s11006_s0 + $0x38] sm:$0xff]   ;;  %v8071_v35 = vld [vmem:[%s11007_s1 + $0x128] sm:$0xff] }
  0x1f   :  { %6698 = vmatprep.subr.bf16.mxu0 %v7664_v4  ;;  %1002 = vperm.xlu1 %7660, %v7968_v14   ;;  %v8076_v36 = vld [vmem:[%s11007_s1 + $0x120] sm:$0xff]  ;;  %v8086_v38 = vld [vmem:[%s11007_s1 + $0x138] sm:$0xff]  ;;  %v8091_v39 = vld [vmem:[%s11007_s1 + $0x130] sm:$0xff] }
  0x20   :  { %997 = vperm.xlu0 %7659, %v7973_v15   ;;  %v7677_v37 = vld [vmem:[%s11006_s0 + $0x40] sm:$0xff]   ;;  %v7678_v40 = vld [vmem:[%s11006_s0 + $0x48] sm:$0xff]   ;;  %v7679_v43 = vld [vmem:[%s11006_s0 + $0x50] sm:$0xff]  }
  0x21   :  { %v8101_v41 = vld [vmem:[%s11007_s1 + $0x148] sm:$0xff]  ;;  %v8106_v42 = vld [vmem:[%s11007_s1 + $0x140] sm:$0xff]  ;;  %v8116_v44 = vld [vmem:[%s11007_s1 + $0x158] sm:$0xff] }
  0x22   :  { %6699 = vmatpush3.bf16.msra.mxu0 %v7664_v4  ;;  %v8121_v45 = vld [vmem:[%s11007_s1 + $0x150] sm:$0xff]  ;;  %v7680_v46 = vld [vmem:[%s11006_s0 + $0x58] sm:$0xff]   ;;  %v8131_v47 = vld [vmem:[%s11007_s1 + $0x28] sm:$0xff] }
  0x23   :  { %6700 = vmatprep.subr.bf16.mxu0 %v7665_v6  ;;  %1032 = vperm.xlu1 %7660, %v7983_v17   ;;  %v8136_v48 = vld [vmem:[%s11007_s1 + $0x20] sm:$0xff]  ;;  %v8146_v50 = vld [vmem:[%s11007_s1 + $0x38] sm:$0xff]  ;;  %v8151_v51 = vld [vmem:[%s11007_s1 + $0x30] sm:$0xff] }
  0x24   :  { %1027 = vperm.xlu0 %7659, %v7988_v18   ;;  %v7681_v49 = vld [vmem:[%s11006_s0 + $0x60] sm:$0xff]   ;;  %v7682_v52 = vld [vmem:[%s11006_s0 + $0x68] sm:$0xff]   ;;  %v7683_v55 = vld [vmem:[%s11006_s0 + $0x70] sm:$0xff]  }
  0x25   :  { %v710_v53 = vld [vmem:[%s11007_s1 + $0x48] sm:$0xff]  ;;  %v709_v54 = vld [vmem:[%s11007_s1 + $0x40] sm:$0xff]  ;;  %v712_v56 = vld [vmem:[%s11007_s1 + $0x58] sm:$0xff] }
  0x26   :  { %6701 = vmatpush3.bf16.msra.mxu0 %v7665_v6  ;;  %v711_v57 = vld [vmem:[%s11007_s1 + $0x50] sm:$0xff]  ;;  %v7684_v58 = vld [vmem:[%s11006_s0 + $0x78] sm:$0xff]   ;;  %v714_v59 = vld [vmem:[%s11007_s1 + $0x68] sm:$0xff] }
  0x27   :  { %6702 = vmatprep.subr.bf16.mxu0 %v7666_v7  ;;  %1042 = vperm.xlu1 %7660, %v7998_v20   ;;  %v713_v60 = vld [vmem:[%s11007_s1 + $0x60] sm:$0xff]  ;;  %v716_v62 = vld [vmem:[%s11007_s1 + $0x78] sm:$0xff]  ;;  %v715_v63 = vld [vmem:[%s11007_s1 + $0x70] sm:$0xff] }
  0x28   :  { %1037 = vperm.xlu0 %7659, %v8003_v21   ;;  %v7685_v61 = vld [vmem:[%s11006_s0 + $0x80] sm:$0xff]   ;;  %v7686_v0 = vld [vmem:[%s11006_s0 + $0x88] sm:$0xff]   ;;  %v7687_v3 = vld [vmem:[%s11006_s0 + $0x90] sm:$0xff]  }
  0x29   :  { %v718_v1 = vld [vmem:[%s11007_s1 + $0x88] sm:$0xff]  ;;  %v717_v2 = vld [vmem:[%s11007_s1 + $0x80] sm:$0xff]  ;;  %v704_v4 = vld [vmem:[%s11007_s1 + $0x18] sm:$0xff] }
  0x2a   :  { %6703 = vmatpush3.bf16.msra.mxu0 %v7666_v7  ;;  %v703_v5 = vld [vmem:[%s11007_s1 + $0x10] sm:$0xff]  ;;  %v7688_v6 = vld [vmem:[%s11006_s0 + $0x98] sm:$0xff]   ;;  %v746_v7 = vld [vmem:[%s11007_s1 + $0x168] sm:$0xff] }
  0x2b   :  { %6704 = vmatprep.subr.bf16.mxu0 %v7667_v8  ;;  %1052 = vperm.xlu1 %7660, %v8013_v23  }
  0x2c   :  { %1047 = vperm.xlu0 %7659, %v8018_v24  }
  0x2e   :  { %6705 = vmatpush3.bf16.msra.mxu0 %v7667_v8  ;;  %v745_v8 = vld [vmem:[%s11007_s1 + $0x160] sm:$0xff] }
  0x2f   :  { %6706 = vmatprep.subr.bf16.mxu0 %v7668_v13  ;;  %1062 = vperm.xlu1 %7660, %v8028_v26  }
  0x30   :  { %1057 = vperm.xlu0 %7659, %v8033_v27  }
  0x32   :  { %6707 = vmatpush3.bf16.msra.mxu0 %v7668_v13  ;;  %v7689_v13 = vld [vmem:[%s11006_s0 + $0xa0] sm:$0xff]  }
  0x33   :  { %1072 = vperm.xlu1 %7660, %v8043_v29  }
  0x34   :  { %1067 = vperm.xlu0 %7659, %v8048_v30  }
  0x35   :  { %6709 = vmatmul.mubr.bf16.vlgmr.msra.gmra.mrb[0].mxu0 %v7670_v16  ;;  %v702_v16 = vld [vmem:[%s11007_s1 + $0x8] sm:$0xff] }
  0x36   :  { %6712 = vmatprep.mubr.bf16.mxu0 %v7671_v19  ;;  %v701_v19 = vld [vmem:[%s11007_s1] sm:$0xff] }
  0x37   :  { %1082 = vperm.xlu1 %7660, %v8056_v32  }
  0x38   :  { %1077 = vperm.xlu0 %7659, %v8061_v33  }
  0x3b   :  { %1092 = vperm.xlu1 %7660, %v8071_v35  }
  0x3c   :  { %1087 = vperm.xlu0 %7659, %v8076_v36  }
  0x3d   :  { %6713 = vmatmul.mubr.bf16.gmra.mrb[4].mxu0 %v7672_v22  ;;  %v7690_v22 = vld [vmem:[%s11006_s0 + $0xa8] sm:$0xff]  }
  0x3e   :  { %6716 = vmatprep.mubr.bf16.mxu0 %v7673_v25  ;;  %v748_v25 = vld [vmem:[%s11007_s1 + $0x178] sm:$0xff] }
  0x3f   :  { %1102 = vperm.xlu1 %7660, %v8086_v38  }
  0x40   :  { %1097 = vperm.xlu0 %7659, %v8091_v39  }
  0x43   :  { %1112 = vperm.xlu1 %7660, %v8101_v41  }
  0x44   :  { %1107 = vperm.xlu0 %7659, %v8106_v42  }
  0x45   :  { %6717 = vmatmul.mubr.bf16.gmra.mrb[8].mxu0 %v7674_v28  ;;  %v747_v28 = vld [vmem:[%s11007_s1 + $0x170] sm:$0xff] }
  0x46   :  { %6720 = vmatprep.mubr.bf16.mxu0 %v7675_v31  ;;  %v7691_v31 = vld [vmem:[%s11006_s0 + $0xb0] sm:$0xff]  }
  0x47   :  { %1122 = vperm.xlu1 %7660, %v8116_v44  }
  0x48   :  { %1117 = vperm.xlu0 %7659, %v8121_v45  }
  0x4b   :  { %932 = vperm.xlu1 %7660, %v8131_v47  }
  0x4c   :  { %927 = vperm.xlu0 %7659, %v8136_v48  }
  0x4d   :  { %6721 = vmatmul.mubr.bf16.gmra.mrb[12].mxu0 %v7676_v34  ;;  %v7692_v34 = vld [vmem:[%s11006_s0 + $0xb8] sm:$0xff]  }
  0x4e   :  { %6724 = vmatprep.mubr.bf16.mxu0 %v7677_v37 }
  0x4f   :  { %942 = vperm.xlu1 %7660, %v8146_v50  }
  0x50   :  { %937 = vperm.xlu0 %7659, %v8151_v51  }
  0x53   :  { %952 = vperm.xlu1 %7660, %v710_v53  }
  0x54   :  { %947 = vperm.xlu0 %7659, %v709_v54  }
  0x55   :  { %6725 = vmatmul.mubr.bf16.gmra.mrb[16].mxu0 %v7678_v40 }
  0x56   :  { %6728 = vmatprep.mubr.bf16.mxu0 %v7679_v43 }
  0x57   :  { %962 = vperm.xlu1 %7660, %v712_v56  }
  0x58   :  { %957 = vperm.xlu0 %7659, %v711_v57  }
  0x5b   :  { %972 = vperm.xlu1 %7660, %v714_v59  }
  0x5c   :  { %967 = vperm.xlu0 %7659, %v713_v60  }
  0x5d   :  { %6729 = vmatmul.mubr.bf16.gmra.mrb[20].mxu0 %v7680_v46 }
  0x5e   :  { %6732 = vmatprep.mubr.bf16.mxu0 %v7681_v49 }
  0x5f   :  { %982 = vperm.xlu1 %7660, %v716_v62  }
  0x60   :  { %977 = vperm.xlu0 %7659, %v715_v63  }
  0x63   :  { %992 = vperm.xlu1 %7660, %v718_v1  }
  0x64   :  { %987 = vperm.xlu0 %7659, %v717_v2  }
  0x65   :  { %6733 = vmatmul.mubr.bf16.gmra.mrb[24].mxu0 %v7682_v52 }
  0x66   :  { %6736 = vmatprep.mubr.bf16.mxu0 %v7683_v55 }
  0x67   :  { %922 = vperm.xlu1 %7660, %v704_v4  }
  0x68   :  { %917 = vperm.xlu0 %7659, %v703_v5  }
  0x6b   :  { %1132 = vperm.xlu1 %7660, %v746_v7  }
  0x6c   :  { %1127 = vperm.xlu0 %7659, %v745_v8  }
  0x6d   :  { %6737 = vmatmul.mubr.bf16.gmra.mrb[28].mxu0 %v7684_v58 }
  0x6e   :  { %6740 = vmatprep.mubr.bf16.mxu0 %v7685_v61 }
  0x6f   :  { %912 = vperm.xlu1 %7660, %v702_v16  }
  0x70   :  { %907 = vperm.xlu0 %7659, %v701_v19  }
  0x73   :  { %1142 = vperm.xlu1 %7660, %v748_v25  }
  0x74   :  { %1137 = vperm.xlu0 %7659, %v747_v28  }
  0x75   :  { %6741 = vmatmul.mubr.bf16.gmra.mrb[32].mxu0 %v7686_v0 }
  0x76   :  { %6744 = vmatprep.mubr.bf16.mxu0 %v7687_v3 }
  0x77   :  { %4893 = vperm.xlu1 %7660, %v8131_v47  }
  0x78   :  { %4888 = vperm.xlu0 %7659, %v8136_v48  }
  0x7b   :  { %4903 = vperm.xlu1 %7660, %v8146_v50  }
  0x7c   :  { %4898 = vperm.xlu0 %7659, %v8151_v51  }
  0x7d   :  { %6745 = vmatmul.mubr.bf16.gmra.mrb[36].mxu0 %v7688_v6 }
  0x7e   :  { %6748 = vmatprep.mubr.bf16.mxu0 %v7689_v13 }
  0x7f   :  { %4913 = vperm.xlu1 %7660, %v710_v53  }
  0x80   :  { %4908 = vperm.xlu0 %7659, %v709_v54  }
  0x83   :  { %4923 = vperm.xlu1 %7660, %v712_v56  }
  0x84   :  { %4918 = vperm.xlu0 %7659, %v711_v57  }
  0x85   :  { %6749 = vmatmul.mubr.bf16.gmra.mrb[40].mxu0 %v7690_v22 }
  0x86   :  { %6752 = vmatprep.mubr.bf16.mxu0 %v7691_v31 }
  0x87   :  { %4933 = vperm.xlu1 %7660, %v714_v59  }
  0x88   :  { %4928 = vperm.xlu0 %7659, %v713_v60  }
  0x8b   :  { %4943 = vperm.xlu1 %7660, %v716_v62  }
  0x8c   :  { %4938 = vperm.xlu0 %7659, %v715_v63  }
  0x8d   :  { %6753 = vmatmul.mubr.bf16.gmra.mrb[44].mxu0 %v7692_v34 }
  0x8f   :  { %4953 = vperm.xlu1 %7660, %v718_v1  }
  0x90   :  { %4948 = vperm.xlu0 %7659, %v717_v2  }
  0x93   :  { %4963 = vperm.xlu1 %7660, %v7968_v14  }
  0x94   :  { %4958 = vperm.xlu0 %7659, %v7973_v15  }
  0x96   :  { %v8311_v43 = vpop.permute.xlu1 %1017 }
  0x97   :  { %4973 = vperm.xlu1 %7660, %v7958_v12   ;;  %11141 = vst [vmem:[#allocation9_spill] sm:$0xff] %v8311_v43 }
  0x98   :  { %4968 = vperm.xlu0 %7659, %v7946_v10  }
  0x9a   :  { %v8332_v58 = vpop.permute.xlu1 %1022 }
  0x9b   :  { %4983 = vperm.xlu1 %7660, %v7953_v11   ;;  %11143 = vst [vmem:[#allocation11_spill] sm:$0xff] %v8332_v58 }
  0x9c   :  { %4978 = vperm.xlu0 %7659, %v7941_v9  }
  0x9e   :  { %v8351_v8 = vpop.permute.xlu1 %1002 }
  0x9f   :  { %4993 = vperm.xlu1 %7660, %v7983_v17   ;;  %11145 = vst [vmem:[#allocation13_spill] sm:$0xff] %v8351_v8 }
  0xa0   :  { %4988 = vperm.xlu0 %7659, %v7988_v18  }
  0xa3   :  { %5003 = vperm.xlu1 %7660, %v7998_v20  }
  0xa4   :  { %4998 = vperm.xlu0 %7659, %v8003_v21  }
  0xa7   :  { %5013 = vperm.xlu1 %7660, %v8013_v23  }
  0xa8   :  { %5008 = vperm.xlu0 %7659, %v8018_v24  }
  0xab   :  { %5023 = vperm.xlu1 %7660, %v8028_v26  }
  0xac   :  { %5018 = vperm.xlu0 %7659, %v8033_v27  }
  0xaf   :  { %5033 = vperm.xlu1 %7660, %v8043_v29  }
  0xb0   :  { %5028 = vperm.xlu0 %7659, %v8048_v30  }
  0xb3   :  { %5043 = vperm.xlu1 %7660, %v8056_v32  }
  0xb4   :  { %5038 = vperm.xlu0 %7659, %v8061_v33  }
  0xb7   :  { %5053 = vperm.xlu1 %7660, %v8071_v35  }
  0xb8   :  { %5048 = vperm.xlu0 %7659, %v8076_v36  }
  0xbb   :  { %5063 = vperm.xlu1 %7660, %v8086_v38  }
  0xbc   :  { %5058 = vperm.xlu0 %7659, %v8091_v39  }
  0xbf   :  { %5073 = vperm.xlu1 %7660, %v8101_v41  }
  0xc0   :  { %5068 = vperm.xlu0 %7659, %v8106_v42  }
  0xc3   :  { %5083 = vperm.xlu1 %7660, %v8116_v44   ;;  %v8313_v44 = vpop.permute.xlu0 %1007 }
  0xc4   :  { %5078 = vperm.xlu0 %7659, %v8121_v45   ;;  %11142 = vst [vmem:[#allocation10_spill] sm:$0xff] %v8313_v44 }
  0xc7   :  { %v8334_v59 = vpop.permute.xlu0 %1012 }
  0xc8   :  { %11144 = vst [vmem:[#allocation12_spill] sm:$0xff] %v8334_v59 }
  0xcb   :  { %v8355_v16 = vpop.permute.xlu0 %997 }
  0xcc   :  { %11146 = vst [vmem:[#allocation14_spill] sm:$0xff] %v8355_v16 }
 0x108   :  { %v8274_v9 = vpop.f32.mrb[0].mxu0 }
 0x109   :  { %v8276_v10 = vpop.f32.mrb[1].mxu0  ;;  %v590_v18 = vmul.f32 %v8274_v9, %v8274_v9 }
 0x10a   :  { %v8278_v11 = vpop.f32.mrb[2].mxu0  ;;  %v588_v14 = vmul.f32 %v8276_v10, %v8276_v10 }
 0x10b   :  { %v8280_v12 = vpop.f32.mrb[3].mxu0  ;;  %v591_v23 = vmul.f32 %v8278_v11, %v8278_v11 }
 0x10c   :  { %v535_v15 = vadd.f32 %v8280_v12, %v8276_v10  ;;  %v589_v17 = vmul.f32 %v8280_v12, %v8280_v12 }
 0x10e   :  { %v536_v20 = vadd.f32 %v8274_v9, %v535_v15  ;;  %v636_v21 = vadd.f32 %v589_v17, %v588_v14  ;;  %v7693_v14 = vld [vmem:[#allocation3 + $0x40] sm:$0xff]  }
 0x10f   :  { %6756 = vmatprep.subr.bf16.mxu0 %v7693_v14 }
 0x110   :  { %v637_v24 = vadd.f32 %v636_v21, %v590_v18  ;;  %v8293_v26 = vpop.f32.mrb[4].mxu0  ;;  %v537_v27 = vadd.f32 %v8278_v11, %v536_v20  ;;  %v8368_v21 = vpop.permute.xlu1 %1032  ;;  %6757 = vmatpush3.bf16.msra.mxu0 %v7693_v14 }
 0x111   :  { %v8296_v29 = vpop.f32.mrb[5].mxu0  ;;  %v594_v40 = vmul.f32 %v8293_v26, %v8293_v26  ;;  %11147 = vst [vmem:[#allocation15_spill] sm:$0xff] %v8368_v21 }
 0x112   :  { %v538_v30 = vadd.f32 %v537_v27, %v8296_v29  ;;  %v592_v32 = vmul.f32 %v8296_v29, %v8296_v29  ;;  %v638_v33 = vadd.f32 %v637_v24, %v591_v23  ;;  %v8301_v35 = vpop.f32.mrb[6].mxu0  ;;  %v8372_v24 = vpop.permute.xlu0 %1027 }
 0x113   :  { %v8303_v36 = vpop.f32.mrb[7].mxu0  ;;  %v595_v45 = vmul.f32 %v8301_v35, %v8301_v35  ;;  %11148 = vst [vmem:[#allocation16_spill] sm:$0xff] %v8372_v24 }
 0x114   :  { %v639_v37 = vadd.f32 %v638_v33, %v592_v32  ;;  %v539_v38 = vadd.f32 %v538_v30, %v8303_v36  ;;  %v593_v39 = vmul.f32 %v8303_v36, %v8303_v36 }
 0x116   :  { %v540_v41 = vadd.f32 %v8293_v26, %v539_v38  ;;  %v640_v42 = vadd.f32 %v639_v37, %v593_v39  ;;  %v7694_v37 = vld [vmem:[#allocation3 + $0x48] sm:$0xff]  }
 0x117   :  { %6758 = vmatprep.subr.bf16.mxu0 %v7694_v37 }
 0x118   :  { %v641_v46 = vadd.f32 %v640_v42, %v594_v40  ;;  %v8317_v47 = vpop.f32.mrb[8].mxu0  ;;  %v541_v48 = vadd.f32 %v8301_v35, %v540_v41  ;;  %6759 = vmatpush3.bf16.msra.mxu0 %v7694_v37  ;;  %v7695_v42 = vld [vmem:[#allocation3 + $0xc0] sm:$0xff]  }
 0x119   :  { %v8320_v49 = vpop.f32.mrb[9].mxu0  ;;  %v598_v60 = vmul.f32 %v8317_v47, %v8317_v47  ;;  %7316 = vmatprep.subr.bf16.mxu1 %v7695_v42 }
 0x11a   :  { %v542_v50 = vadd.f32 %v541_v48, %v8320_v49  ;;  %v596_v51 = vmul.f32 %v8320_v49, %v8320_v49  ;;  %v642_v52 = vadd.f32 %v641_v46, %v595_v45  ;;  %v8325_v53 = vpop.f32.mrb[10].mxu0  ;;  %7324 = vmatpush3.bf16.msra.mxu1 %v7695_v42 }
 0x11b   :  { %v8327_v54 = vpop.f32.mrb[11].mxu0  ;;  %v599_v63 = vmul.f32 %v8325_v53, %v8325_v53 }
 0x11c   :  { %v643_v55 = vadd.f32 %v642_v52, %v596_v51  ;;  %v543_v56 = vadd.f32 %v542_v50, %v8327_v54  ;;  %v597_v57 = vmul.f32 %v8327_v54, %v8327_v54  ;;  %v7696_v50 = vld [vmem:[#allocation3 + $0x50] sm:$0xff]   ;;  %v8387_v51 = vpop.permute.xlu1 %1042  ;;  %v8389_v52 = vpop.permute.xlu0 %1037 }
 0x11d   :  { %11149 = vst [vmem:[#allocation17_spill] sm:$0xff] %v8387_v51  ;;  %11150 = vst [vmem:[#allocation18_spill] sm:$0xff] %v8389_v52  ;;  %6760 = vmatprep.subr.bf16.mxu0 %v7696_v50 }
 0x11e   :  { %v544_v61 = vadd.f32 %v8317_v47, %v543_v56  ;;  %v644_v62 = vadd.f32 %v643_v55, %v597_v57  ;;  %6761 = vmatpush3.bf16.msra.mxu0 %v7696_v50 }
 0x120   :  { %v645_v0 = vadd.f32 %v644_v62, %v598_v60  ;;  %v8341_v1 = vpop.f32.mrb[12].mxu0  ;;  %v545_v2 = vadd.f32 %v8325_v53, %v544_v61  ;;  %v7697_v62 = vld [vmem:[#allocation3 + $0xc8] sm:$0xff]  }
 0x121   :  { %v8344_v3 = vpop.f32.mrb[13].mxu0  ;;  %v602_v28 = vmul.f32 %v8341_v1, %v8341_v1  ;;  %7317 = vmatprep.subr.bf16.mxu1 %v7697_v62 }
 0x122   :  { %v546_v4 = vadd.f32 %v545_v2, %v8344_v3  ;;  %v600_v5 = vmul.f32 %v8344_v3, %v8344_v3  ;;  %v646_v6 = vadd.f32 %v645_v0, %v599_v63  ;;  %v8349_v7 = vpop.f32.mrb[14].mxu0  ;;  %7325 = vmatpush3.bf16.msra.mxu1 %v7697_v62 }
 0x123   :  { %v8353_v13 = vpop.f32.mrb[15].mxu0  ;;  %v603_v15 = vmul.f32 %v8349_v7, %v8349_v7 }
 0x124   :  { %v647_v19 = vadd.f32 %v646_v6, %v600_v5  ;;  %v547_v22 = vadd.f32 %v546_v4, %v8353_v13  ;;  %v601_v25 = vmul.f32 %v8353_v13, %v8353_v13  ;;  %v7698_v5 = vld [vmem:[#allocation3 + $0x58] sm:$0xff]  }
 0x125   :  { %6762 = vmatprep.subr.bf16.mxu0 %v7698_v5 }
 0x126   :  { %v548_v31 = vadd.f32 %v8341_v1, %v547_v22  ;;  %v648_v34 = vadd.f32 %v647_v19, %v601_v25  ;;  %6763 = vmatpush3.bf16.msra.mxu0 %v7698_v5 }
 0x128   :  { %v649_v17 = vadd.f32 %v648_v34, %v602_v28  ;;  %v8365_v18 = vpop.f32.mrb[16].mxu0  ;;  %v549_v20 = vadd.f32 %v8349_v7, %v548_v31  ;;  %v8408_v28 = vpop.permute.xlu1 %1052  ;;  %v7699_v31 = vld [vmem:[#allocation3 + $0xd0] sm:$0xff]  }
 0x129   :  { %v8370_v23 = vpop.f32.mrb[17].mxu0  ;;  %v606_v45 = vmul.f32 %v8365_v18, %v8365_v18  ;;  %11151 = vst [vmem:[#allocation19_spill] sm:$0xff] %v8408_v28  ;;  %v8410_v34 = vpop.permute.xlu0 %1047  ;;  %7318 = vmatprep.subr.bf16.mxu1 %v7699_v31 }
 0x12a   :  { %v550_v27 = vadd.f32 %v549_v20, %v8370_v23  ;;  %v604_v30 = vmul.f32 %v8370_v23, %v8370_v23  ;;  %v650_v32 = vadd.f32 %v649_v17, %v603_v15  ;;  %v8377_v33 = vpop.f32.mrb[18].mxu0  ;;  %11152 = vst [vmem:[#allocation20_spill] sm:$0xff] %v8410_v34  ;;  %v7700_v20 = vld [vmem:[#allocation3 + $0x60] sm:$0xff]   ;;  %7326 = vmatpush3.bf16.msra.mxu1 %v7699_v31 }
 0x12b   :  { %v8379_v38 = vpop.f32.mrb[19].mxu0  ;;  %v607_v55 = vmul.f32 %v8377_v33, %v8377_v33  ;;  %6764 = vmatprep.subr.bf16.mxu0 %v7700_v20 }
 0x12c   :  { %v651_v39 = vadd.f32 %v650_v32, %v604_v30  ;;  %v551_v40 = vadd.f32 %v550_v27, %v8379_v38  ;;  %v605_v41 = vmul.f32 %v8379_v38, %v8379_v38  ;;  %6765 = vmatpush3.bf16.msra.mxu0 %v7700_v20  ;;  %v8427_v50 = vpop.permute.xlu1 %1062 }
 0x12d   :  { %11153 = vst [vmem:[#allocation21_spill] sm:$0xff] %v8427_v50 }
 0x12e   :  { %v552_v46 = vadd.f32 %v8365_v18, %v551_v40  ;;  %v652_v48 = vadd.f32 %v651_v39, %v605_v41  ;;  %v7701_v40 = vld [vmem:[#allocation3 + $0xd8] sm:$0xff]  }
 0x12f   :  { %7319 = vmatprep.subr.bf16.mxu1 %v7701_v40 }
 0x130   :  { %v653_v56 = vadd.f32 %v652_v48, %v606_v45  ;;  %v8393_v57 = vpop.f32.mrb[20].mxu0  ;;  %v553_v60 = vadd.f32 %v8377_v33, %v552_v46  ;;  %v7702_v48 = vld [vmem:[#allocation3 + $0x68] sm:$0xff]   ;;  %7327 = vmatpush3.bf16.msra.mxu1 %v7701_v40 }
 0x131   :  { %v8396_v61 = vpop.f32.mrb[21].mxu0  ;;  %v610_v14 = vmul.f32 %v8393_v57, %v8393_v57  ;;  %6766 = vmatprep.subr.bf16.mxu0 %v7702_v48 }
 0x132   :  { %v554_v63 = vadd.f32 %v553_v60, %v8396_v61  ;;  %v608_v0 = vmul.f32 %v8396_v61, %v8396_v61  ;;  %v654_v2 = vadd.f32 %v653_v56, %v607_v55  ;;  %v8401_v4 = vpop.f32.mrb[22].mxu0  ;;  %v8431_v56 = vpop.permute.xlu0 %1057  ;;  %6767 = vmatpush3.bf16.msra.mxu0 %v7702_v48 }
 0x133   :  { %v8403_v6 = vpop.f32.mrb[23].mxu0  ;;  %v611_v27 = vmul.f32 %v8401_v4, %v8401_v4  ;;  %11154 = vst [vmem:[#allocation22_spill] sm:$0xff] %v8431_v56 }
 0x134   :  { %v655_v19 = vadd.f32 %v654_v2, %v608_v0  ;;  %v555_v22 = vadd.f32 %v554_v63, %v8403_v6  ;;  %v609_v25 = vmul.f32 %v8403_v6, %v8403_v6  ;;  %v7703_v0 = vld [vmem:[#allocation3 + $0xe0] sm:$0xff]  }
 0x135   :  { %7320 = vmatprep.subr.bf16.mxu1 %v7703_v0 }
 0x136   :  { %v556_v15 = vadd.f32 %v8393_v57, %v555_v22  ;;  %v656_v17 = vadd.f32 %v655_v19, %v609_v25  ;;  %v7704_v22 = vld [vmem:[#allocation3 + $0x70] sm:$0xff]   ;;  %7328 = vmatpush3.bf16.msra.mxu1 %v7703_v0 }
 0x137   :  { %6768 = vmatprep.subr.bf16.mxu0 %v7704_v22  ;;  %v7707_v0 = vld [vmem:[#allocation3 + $0xf0] sm:$0xff]  }
 0x138   :  { %v657_v30 = vadd.f32 %v656_v17, %v610_v14  ;;  %v8417_v32 = vpop.f32.mrb[24].mxu0  ;;  %v557_v37 = vadd.f32 %v8401_v4, %v556_v15  ;;  %v8444_v17 = vpop.permute.xlu1 %1072  ;;  %6769 = vmatpush3.bf16.msra.mxu0 %v7704_v22 }
 0x139   :  { %v8420_v39 = vpop.f32.mrb[25].mxu0  ;;  %v614_v2 = vmul.f32 %v8417_v32, %v8417_v32  ;;  %11155 = vst [vmem:[#allocation23_spill] sm:$0xff] %v8444_v17  ;;  %v8491_v17 = vld [vmem:[#allocation3 + $0x100] sm:$0xff]  }
 0x13a   :  { %v558_v41 = vadd.f32 %v557_v37, %v8420_v39  ;;  %v612_v42 = vmul.f32 %v8420_v39, %v8420_v39  ;;  %v658_v45 = vadd.f32 %v657_v30, %v611_v27  ;;  %v8425_v46 = vpop.f32.mrb[26].mxu0  ;;  %v7705_v27 = vld [vmem:[#allocation3 + $0xe8] sm:$0xff]   ;;  %v8448_v30 = vpop.permute.xlu0 %1067  ;;  %11161 = vst [vmem:[#allocation29_spill] sm:$0xff] %v8491_v17 }
 0x13b   :  { %v8429_v55 = vpop.f32.mrb[27].mxu0  ;;  %v615_v25 = vmul.f32 %v8425_v46, %v8425_v46  ;;  %11156 = vst [vmem:[#allocation24_spill] sm:$0xff] %v8448_v30  ;;  %7321 = vmatprep.subr.bf16.mxu1 %v7705_v27 }
 0x13c   :  { %v659_v60 = vadd.f32 %v658_v45, %v612_v42  ;;  %v559_v62 = vadd.f32 %v558_v41, %v8429_v55  ;;  %v613_v63 = vmul.f32 %v8429_v55, %v8429_v55  ;;  %v7706_v45 = vld [vmem:[#allocation3 + $0x78] sm:$0xff]   ;;  %7329 = vmatpush3.bf16.msra.mxu1 %v7705_v27  ;;  %v8463_v22 = vpop.permute.xlu1 %1082 }
 0x13d   :  { %6770 = vmatprep.subr.bf16.mxu0 %v7706_v45  ;;  %11157 = vst [vmem:[#allocation25_spill] sm:$0xff] %v8463_v22  ;;  %7322 = vmatprep.subr.bf16.mxu1 %v7707_v0 }
 0x13e   :  { %v560_v5 = vadd.f32 %v8417_v32, %v559_v62  ;;  %v660_v19 = vadd.f32 %v659_v60, %v613_v63  ;;  %6771 = vmatpush3.bf16.msra.mxu0 %v7706_v45 }
 0x140   :  { %v661_v31 = vadd.f32 %v660_v19, %v614_v2  ;;  %v8441_v14 = vpop.f32.mrb[28].mxu0  ;;  %v561_v15 = vadd.f32 %v8425_v46, %v560_v5  ;;  %7330 = vmatpush3.bf16.msra.mxu1 %v7707_v0 }
 0x141   :  { %v8446_v20 = vpop.f32.mrb[29].mxu0  ;;  %v618_v2 = vmul.f32 %v8441_v14, %v8441_v14 }
 0x142   :  { %v562_v37 = vadd.f32 %v561_v15, %v8446_v20  ;;  %v616_v40 = vmul.f32 %v8446_v20, %v8446_v20  ;;  %v662_v41 = vadd.f32 %v661_v31, %v615_v25  ;;  %v8453_v42 = vpop.f32.mrb[30].mxu0  ;;  %v8465_v25 = vpop.permute.xlu0 %1077 }
 0x143   :  { %v8455_v48 = vpop.f32.mrb[31].mxu0  ;;  %11158 = vst [vmem:[#allocation26_spill] sm:$0xff] %v8465_v25  ;;  %v619_v31 = vmul.f32 %v8453_v42, %v8453_v42 }
 0x144   :  { %v663_v60 = vadd.f32 %v662_v41, %v616_v40  ;;  %v563_v62 = vadd.f32 %v562_v37, %v8455_v48  ;;  %v617_v63 = vmul.f32 %v8455_v48, %v8455_v48  ;;  %v7708_v41 = vld [vmem:[#allocation3 + $0xf8] sm:$0xff]  }
 0x145   :  { %7323 = vmatprep.subr.bf16.mxu1 %v7708_v41 }
 0x146   :  { %v564_v5 = vadd.f32 %v8441_v14, %v563_v62  ;;  %v664_v19 = vadd.f32 %v663_v60, %v617_v63  ;;  %7331 = vmatpush3.bf16.msra.mxu1 %v7708_v41  ;;  %v8486_v25 = vpop.permute.xlu0 %1087 }
 0x147   :  { %11160 = vst [vmem:[#allocation28_spill] sm:$0xff] %v8486_v25  ;;  %6980 = vmatprep.subr.bf16.mxu1 %v8491_v17 }
 0x148   :  { %v665_v15 = vadd.f32 %v664_v19, %v618_v2  ;;  %v8469_v37 = vpop.f32.mrb[32].mxu0  ;;  %v565_v27 = vadd.f32 %v8453_v42, %v564_v5  ;;  %v8484_v5 = vpop.permute.xlu1 %1092 }
 0x149   :  { %v8472_v40 = vpop.f32.mrb[33].mxu0  ;;  %11159 = vst [vmem:[#allocation27_spill] sm:$0xff] %v8484_v5 }
 0x14a   :  { %v566_v45 = vadd.f32 %v565_v27, %v8472_v40  ;;  %v620_v60 = vmul.f32 %v8472_v40, %v8472_v40  ;;  %v666_v62 = vadd.f32 %v665_v15, %v619_v31  ;;  %v8477_v63 = vpop.f32.mrb[34].mxu0  ;;  %v622_v27 = vmul.f32 %v8469_v37, %v8469_v37 }
 0x14b   :  { %v8479_v22 = vpop.f32.mrb[35].mxu0 }
 0x14c   :  { %v667_v2 = vadd.f32 %v666_v62, %v620_v60  ;;  %v567_v19 = vadd.f32 %v566_v45, %v8479_v22  ;;  %v621_v0 = vmul.f32 %v8479_v22, %v8479_v22  ;;  %v623_v60 = vmul.f32 %v8477_v63, %v8477_v63  ;;  %v8506_v30 = vpop.permute.xlu1 %1102 }
 0x14d   :  { %11162 = vst [vmem:[#allocation30_spill] sm:$0xff] %v8506_v30 }
 0x14e   :  { %v568_v31 = vadd.f32 %v8469_v37, %v567_v19  ;;  %v668_v15 = vadd.f32 %v667_v2, %v621_v0 }
 0x150   :  { %v669_v45 = vadd.f32 %v668_v15, %v622_v27  ;;  %v8495_v62 = vpop.f32.mrb[36].mxu0  ;;  %v569_v41 = vadd.f32 %v8477_v63, %v568_v31  ;;  %v8510_v27 = vpop.permute.xlu0 %1097 }
 0x151   :  { %v8499_v5 = vpop.f32.mrb[37].mxu0  ;;  %11163 = vst [vmem:[#allocation31_spill] sm:$0xff] %v8510_v27 }
 0x152   :  { %v570_v25 = vadd.f32 %v569_v41, %v8499_v5  ;;  %v624_v19 = vmul.f32 %v8499_v5, %v8499_v5  ;;  %v670_v2 = vadd.f32 %v669_v45, %v623_v60  ;;  %v8504_v0 = vpop.f32.mrb[38].mxu0  ;;  %v626_v41 = vmul.f32 %v8495_v62, %v8495_v62 }
 0x153   :  { %v8508_v50 = vpop.f32.mrb[39].mxu0  ;;  %v627_v45 = vmul.f32 %v8504_v0, %v8504_v0 }
 0x154   :  { %v671_v15 = vadd.f32 %v670_v2, %v624_v19  ;;  %v571_v31 = vadd.f32 %v570_v25, %v8508_v50  ;;  %v625_v17 = vmul.f32 %v8508_v50, %v8508_v50  ;;  %v8523_v19 = vpop.permute.xlu1 %1112  ;;  %v8527_v2 = vpop.permute.xlu0 %1107 }
 0x155   :  { %11165 = vst [vmem:[#allocation33_spill] sm:$0xff] %v8523_v19  ;;  %11166 = vst [vmem:[#allocation34_spill] sm:$0xff] %v8527_v2 }
 0x156   :  { %v572_v56 = vadd.f32 %v8495_v62, %v571_v31  ;;  %v672_v60 = vadd.f32 %v671_v15, %v625_v17 }
 0x158   :  { %v673_v30 = vadd.f32 %v672_v60, %v626_v41  ;;  %v8520_v28 = vpop.f32.mrb[40].mxu0  ;;  %v573_v27 = vadd.f32 %v8504_v0, %v572_v56  ;;  %v8542_v52 = vpop.permute.xlu1 %1122 }
 0x159   :  { %11164 = vst [vmem:[#allocation32_spill] sm:$0xff] %v8520_v28  ;;  %v8525_v25 = vpop.f32.mrb[41].mxu0  ;;  %v630_v19 = vmul.f32 %v8520_v28, %v8520_v28  ;;  %11169 = vst [vmem:[#allocation37_spill] sm:$0xff] %v8542_v52  ;;  %v8544_v21 = vpop.permute.xlu0 %1117 }
 0x15a   :  { %v574_v34 = vadd.f32 %v573_v27, %v8525_v25  ;;  %v628_v31 = vmul.f32 %v8525_v25, %v8525_v25  ;;  %v674_v17 = vadd.f32 %v673_v30, %v627_v45  ;;  %v8532_v15 = vpop.f32.mrb[42].mxu0  ;;  %11170 = vst [vmem:[#allocation38_spill] sm:$0xff] %v8544_v21 }
 0x15b   :  { %11167 = vst [vmem:[#allocation35_spill] sm:$0xff] %v8532_v15  ;;  %v8534_v51 = vpop.f32.mrb[43].mxu0  ;;  %v631_v30 = vmul.f32 %v8532_v15, %v8532_v15 }
 0x15c   :  { %11168 = vst [vmem:[#allocation36_spill] sm:$0xff] %v8534_v51  ;;  %v675_v41 = vadd.f32 %v674_v17, %v628_v31  ;;  %v575_v60 = vadd.f32 %v574_v34, %v8534_v51  ;;  %v629_v56 = vmul.f32 %v8534_v51, %v8534_v51  ;;  %v8553_v44 = vpop.permute.xlu1 %932 }
 0x15d   :  { %11172 = vst [vmem:[#allocation40_spill] sm:$0xff] %v8553_v44  ;;  %v8555_v21 = vpop.permute.xlu0 %927 }
 0x15e   :  { %v576_v2 = vadd.f32 %v8520_v28, %v575_v60  ;;  %v676_v27 = vadd.f32 %v675_v41, %v629_v56  ;;  %11173 = vst [vmem:[#allocation41_spill] sm:$0xff] %v8555_v21 }
 0x160   :  { %v677_v45 = vadd.f32 %v676_v27, %v630_v19  ;;  %v8548_v31 = vpop.f32.mrb[44].mxu0  ;;  %v577_v34 = vadd.f32 %v8532_v15, %v576_v2 }
 0x161   :  { %11171 = vst [vmem:[#allocation39_spill] sm:$0xff] %v8548_v31  ;;  %v520_v17 = vpop.f32.mrb[45].mxu0  ;;  %v634_v19 = vmul.f32 %v8548_v31, %v8548_v31 }
 0x162   :  { %v578_v24 = vadd.f32 %v577_v34, %v520_v17  ;;  %v632_v58 = vmul.f32 %v520_v17, %v520_v17  ;;  %v678_v43 = vadd.f32 %v677_v45, %v631_v30  ;;  %v8551_v59 = vpop.f32.mrb[46].mxu0 }
 0x163   :  { %v523_v60 = vpop.f32.mrb[47].mxu0  ;;  %v635_v34 = vmul.f32 %v8551_v59, %v8551_v59 }
 0x164   :  { %v679_v41 = vadd.f32 %v678_v43, %v632_v58  ;;  %v579_v56 = vadd.f32 %v578_v24, %v523_v60  ;;  %v633_v52 = vmul.f32 %v523_v60, %v523_v60  ;;  %v8563_v58 = vpop.permute.xlu1 %942  ;;  %v8565_v24 = vpop.permute.xlu0 %937 }
 0x165   :  { %11174 = vst [vmem:[#allocation42_spill] sm:$0xff] %v8563_v58 }
 0x166   :  { %v580_v27 = vadd.f32 %v8548_v31, %v579_v56  ;;  %v680_v2 = vadd.f32 %v679_v41, %v633_v52 }
 0x168   :  { %v581_v30 = vadd.f32 %v8551_v59, %v580_v27  ;;  %v681_v45 = vadd.f32 %v680_v2, %v634_v19  ;;  %v8567_v56 = vpop.permute.xlu1 %952  ;;  %v8569_v52 = vpop.permute.xlu0 %947 }
 0x169   :  { %11175 = vst [vmem:[#allocation43_spill] sm:$0xff] %v8567_v56  ;;  %11176 = vst [vmem:[#allocation44_spill] sm:$0xff] %v8569_v52 }
 0x16a   :  { %v582_v8 = vrot.slane %v581_v30, 4  ;;  %v682_v43 = vadd.f32 %v681_v45, %v635_v34  ;;  %v8571_v45 = vld [vmem:[#allocation3] sm:$0xff]  }
 0x16b   :  { %11177 = vst [vmem:[#allocation45_spill] sm:$0xff] %v8571_v45  ;;  %6812 = vmatprep.subr.bf16.mxu0 %v8571_v45 }
 0x16c   :  { %v583_v16 = vadd.f32 %v582_v8, %v581_v30  ;;  %v683_v44 = vrot.slane %v682_v43, 4  ;;  %v8573_v58 = vpop.permute.xlu1 %962  ;;  %v8575_v8 = vpop.permute.xlu0 %957 }
 0x16d   :  { %11178 = vst [vmem:[#allocation46_spill] sm:$0xff] %v8573_v58  ;;  %11179 = vst [vmem:[#allocation47_spill] sm:$0xff] %v8575_v8 }
 0x16e   :  { %v584_v21 = vrot.slane %v583_v16, 2  ;;  %v684_v15 = vadd.f32 %v683_v44, %v682_v43 }
 0x170   :  { %v585_v28 = vadd.f32 %v584_v21, %v583_v16  ;;  %v685_v51 = vrot.slane %v684_v15, 2  ;;  %v8578_v43 = vpop.permute.xlu1 %972  ;;  %v8580_v56 = vpop.permute.xlu0 %967 }
 0x171   :  { %11180 = vst [vmem:[#allocation48_spill] sm:$0xff] %v8578_v43  ;;  %11181 = vst [vmem:[#allocation49_spill] sm:$0xff] %v8580_v56 }
 0x172   :  { %v586_v41 = vrot.slane %v585_v28, 1  ;;  %v686_v31 = vadd.f32 %v685_v51, %v684_v15 }
 0x174   :  { %v587_v27 = vadd.f32 %v586_v41, %v585_v28  ;;  %v687_v19 = vrot.slane %v686_v31, 1  ;;  %v750_v28 = vlaneseq  ;;  %v8582_v15 = vpop.permute.xlu1 %982 }
 0x175   :  { %11182 = vst [vmem:[#allocation50_spill] sm:$0xff] %v8582_v15 }
 0x176   :  { %v688_v2 = vadd.f32 %v687_v19, %v686_v31  ;;  %v691_v34 = vmul.f32 0.0078125, %v587_v27  ;;  %v8584_v31 = vpop.permute.xlu0 %977  ;;  %v751_v41 = vshrl.u32 %v750_v28, 7  ;;  %v689_v27 = vld [vmem:[%s11009_s3] sm:$0x1] }
 0x177   :  { %11183 = vst [vmem:[#allocation51_spill] sm:$0xff] %v8584_v31 }
 0x178   :  { %v692_v30 = vmul.f32 0.0078125, %v688_v2  ;;  %v693_v44 = vmul.f32 %v691_v34, %v691_v34  ;;  %v8589_v19 = vsub.s32 0, %v751_v41 }
 0x17a   :  { %v694_v16 = vsub.f32 %v692_v30, %v693_v44  ;;  %11184 = vst [vmem:[#allocation52_spill] sm:$0xff] %v8589_v19  ;;  %v8591_v30 = vpop.permute.xlu1 %992  ;;  %v8593_v44 = vpop.permute.xlu0 %987 }
 0x17b   :  { %11185 = vst [vmem:[#allocation53_spill] sm:$0xff] %v8591_v30  ;;  %11186 = vst [vmem:[#allocation54_spill] sm:$0xff] %v8593_v44 }
 0x17c   :  { %v695_v21 = vmax.f32 %v694_v16, 0.0 }
 0x17e   :  { %v696_v51 = vadd.f32 1e-05, %v695_v21  ;;  %v690_v21 = vld [vmem:[%s11010_s4] sm:$0x1]  ;;  %v8600_v41 = vpop.permute.xlu1 %922  ;;  %v8602_v56 = vpop.permute.xlu0 %917 }
 0x180   :  { %7773 = vrsqrt.f32 %v696_v51 }
 0x18a   :  { %v7774_v2 = vpop.eup %7773 }
 0x18b   :  { %v698_v16 = vmul.f32 %v7774_v2, %v689_v27 }
 0x18d   :  { %v699_v51 = vmul.f32 %v698_v16, %v691_v34  ;;  %v753_v45 = vrot.slane %v698_v16, %v8589_v19 }
 0x18f   :  { %v700_v28 = vsub.f32 %v690_v21, %v699_v51  ;;  %v799_v15 = vmul.f32 %v753_v45, %v520_v17  ;;  %v800_v31 = vmul.f32 %v753_v45, %v523_v60  ;;  %v755_v43 = vmul.f32 %v753_v45, %v8276_v10 }
 0x190   :  { %v756_v30 = vmul.f32 %v753_v45, %v8280_v12  ;;  %v757_v27 = vmul.f32 %v8274_v9, %v753_v45  ;;  %v758_v2 = vmul.f32 %v8278_v11, %v753_v45  ;;  %v759_v44 = vmul.f32 %v753_v45, %v8296_v29 }
 0x191   :  { %v8609_v34 = vrot.slane %v700_v28, %v8589_v19  ;;  %v760_v17 = vmul.f32 %v753_v45, %v8303_v36  ;;  %v761_v60 = vmul.f32 %v8293_v26, %v753_v45  ;;  %v762_v10 = vmul.f32 %v8301_v35, %v753_v45  ;;  %v1133_v19 = vpop.permute.xlu1 %1132 }
 0x192   :  { %v763_v16 = vmul.f32 %v753_v45, %v8320_v49  ;;  %v764_v21 = vmul.f32 %v753_v45, %v8327_v54  ;;  %v765_v12 = vmul.f32 %v8317_v47, %v753_v45  ;;  %v766_v9 = vmul.f32 %v8325_v53, %v753_v45 }
 0x193   :  { %v853_v11 = vadd.f32 %v8609_v34, %v799_v15  ;;  %v854_v29 = vadd.f32 %v8609_v34, %v800_v31  ;;  %v767_v51 = vmul.f32 %v753_v45, %v8344_v3  ;;  %v768_v36 = vmul.f32 %v753_v45, %v8353_v13  ;;  %v1128_v31 = vpop.permute.xlu0 %1127 }
 0x194   :  { %v769_v26 = vmul.f32 %v8341_v1, %v753_v45  ;;  %v770_v35 = vmul.f32 %v8349_v7, %v753_v45  ;;  %v771_v49 = vmul.f32 %v753_v45, %v8370_v23  ;;  %v772_v54 = vmul.f32 %v753_v45, %v8379_v38 }
 0x195   :  { %v901_v28 = vmax.f32 %v853_v11, 0.0  ;;  %v902_v47 = vmax.f32 %v854_v29, 0.0  ;;  %v773_v53 = vmul.f32 %v8365_v18, %v753_v45  ;;  %v774_v15 = vmul.f32 %v8377_v33, %v753_v45 }
 0x196   :  { %v775_v3 = vmul.f32 %v753_v45, %v8396_v61  ;;  %v776_v13 = vmul.f32 %v753_v45, %v8403_v6  ;;  %v777_v1 = vmul.f32 %v8393_v57, %v753_v45  ;;  %v778_v7 = vmul.f32 %v8401_v4, %v753_v45 }
 0x197   :  { %v1189_v58 = vmul.f32 %v1128_v31, %v901_v28  ;;  %v1190_v23 = vmul.f32 %v1133_v19, %v902_v47  ;;  %v779_v38 = vmul.f32 %v753_v45, %v8420_v39  ;;  %v780_v11 = vmul.f32 %v753_v45, %v8429_v55 }
 0x198   :  { %v781_v18 = vmul.f32 %v8417_v32, %v753_v45  ;;  %v782_v33 = vmul.f32 %v8425_v46, %v753_v45  ;;  %v783_v29 = vmul.f32 %v753_v45, %v8446_v20  ;;  %v784_v61 = vmul.f32 %v753_v45, %v8455_v48 }
 0x199   :  { %v1215_v8 = vpack.c.bf16 %v1190_v23, %v1189_v58  ;;  %v785_v6 = vmul.f32 %v8441_v14, %v753_v45  ;;  %v786_v57 = vmul.f32 %v8453_v42, %v753_v45  ;;  %v787_v4 = vmul.f32 %v753_v45, %v8472_v40  ;;  %v11187_v42 = vld [vmem:[#allocation36_spill] sm:$0xff] }
 0x19a   :  { %v788_v19 = vmul.f32 %v753_v45, %v8479_v22  ;;  %v789_v39 = vmul.f32 %v8469_v37, %v753_v45  ;;  %v790_v55 = vmul.f32 %v8477_v63, %v753_v45  ;;  %v791_v32 = vmul.f32 %v753_v45, %v8499_v5  ;;  %v11188_v40 = vld [vmem:[#allocation32_spill] sm:$0xff]  ;;  %v11189_v22 = vld [vmem:[#allocation35_spill] sm:$0xff] }
 0x19b   :  { %1239 = vst [vmem:[#allocation2 + $0xb0] sm:$0xff] %v1215_v8  ;;  %v792_v46 = vmul.f32 %v753_v45, %v8508_v50  ;;  %v793_v20 = vmul.f32 %v8495_v62, %v753_v45  ;;  %v794_v48 = vmul.f32 %v8504_v0, %v753_v45  ;;  %v795_v14 = vmul.f32 %v753_v45, %v8525_v25  ;;  %v11190_v37 = vld [vmem:[#allocation39_spill] sm:$0xff] }
 0x19c   :  { %v796_v58 = vmul.f32 %v753_v45, %v11187_v42  ;;  %v797_v28 = vmul.f32 %v11188_v40, %v753_v45  ;;  %v798_v47 = vmul.f32 %v11189_v22, %v753_v45  ;;  %v801_v31 = vmul.f32 %v11190_v37, %v753_v45 }
 0x19d   :  { %v802_v63 = vmul.f32 %v8551_v59, %v753_v45  ;;  %v8655_v5 = vadd.f32 %v8609_v34, %v755_v43  ;;  %v8658_v50 = vadd.f32 %v8609_v34, %v756_v30  ;;  %v8661_v62 = vadd.f32 %v8609_v34, %v757_v27 }
 0x19e   :  { %v8664_v0 = vadd.f32 %v8609_v34, %v758_v2  ;;  %v8667_v25 = vadd.f32 %v8609_v34, %v759_v44  ;;  %v8670_v8 = vadd.f32 %v8609_v34, %v760_v17  ;;  %v8673_v59 = vadd.f32 %v8609_v34, %v761_v60 }
 0x19f   :  { %v8676_v45 = vadd.f32 %v8609_v34, %v762_v10  ;;  %v8679_v43 = vadd.f32 %v8609_v34, %v763_v16  ;;  %v8682_v30 = vadd.f32 %v8609_v34, %v764_v21  ;;  %v8685_v27 = vadd.f32 %v8609_v34, %v765_v12 }
 0x1a0   :  { %v8688_v44 = vadd.f32 %v8609_v34, %v766_v9  ;;  %v8691_v2 = vadd.f32 %v8609_v34, %v767_v51  ;;  %v8694_v17 = vadd.f32 %v8609_v34, %v768_v36  ;;  %v8697_v60 = vadd.f32 %v8609_v34, %v769_v26 }
 0x1a1   :  { %v8700_v10 = vadd.f32 %v8609_v34, %v770_v35  ;;  %v8703_v16 = vadd.f32 %v8609_v34, %v771_v49  ;;  %v8706_v21 = vadd.f32 %v8609_v34, %v772_v54  ;;  %v8709_v12 = vadd.f32 %v8609_v34, %v773_v53 }
 0x1a2   :  { %v8712_v9 = vadd.f32 %v8609_v34, %v774_v15  ;;  %v8715_v51 = vadd.f32 %v8609_v34, %v775_v3  ;;  %v8718_v36 = vadd.f32 %v8609_v34, %v776_v13  ;;  %v8721_v26 = vadd.f32 %v8609_v34, %v777_v1 }
 0x1a3   :  { %v8724_v35 = vadd.f32 %v8609_v34, %v778_v7  ;;  %v8727_v49 = vadd.f32 %v8609_v34, %v779_v38  ;;  %v8730_v54 = vadd.f32 %v8609_v34, %v780_v11  ;;  %v8733_v53 = vadd.f32 %v8609_v34, %v781_v18 }
 0x1a4   :  { %v8736_v15 = vadd.f32 %v8609_v34, %v782_v33  ;;  %v8739_v3 = vadd.f32 %v8609_v34, %v783_v29  ;;  %v8742_v13 = vadd.f32 %v8609_v34, %v784_v61  ;;  %v8745_v1 = vadd.f32 %v8609_v34, %v785_v6 }
 0x1a5   :  { %v8748_v7 = vadd.f32 %v8609_v34, %v786_v57  ;;  %v8751_v23 = vadd.f32 %v8609_v34, %v787_v4  ;;  %v8754_v38 = vadd.f32 %v8609_v34, %v788_v19  ;;  %v8757_v11 = vadd.f32 %v8609_v34, %v789_v39 }
 0x1a6   :  { %v8760_v18 = vadd.f32 %v8609_v34, %v790_v55  ;;  %v8763_v33 = vadd.f32 %v8609_v34, %v791_v32  ;;  %v8766_v29 = vadd.f32 %v8609_v34, %v792_v46  ;;  %v8769_v61 = vadd.f32 %v8609_v34, %v793_v20 }
 0x1a7   :  { %v8772_v6 = vadd.f32 %v8609_v34, %v794_v48  ;;  %v8775_v57 = vadd.f32 %v8609_v34, %v795_v14  ;;  %v8778_v4 = vadd.f32 %v8609_v34, %v796_v58  ;;  %v8781_v19 = vadd.f32 %v8609_v34, %v797_v28 }
 0x1a8   :  { %v8784_v39 = vadd.f32 %v8609_v34, %v798_v47  ;;  %v8787_v55 = vadd.f32 %v8609_v34, %v801_v31  ;;  %v8790_v32 = vadd.f32 %v8609_v34, %v802_v63  ;;  %v857_v46 = vmax.f32 %v8655_v5, 0.0 }
 0x1a9   :  { %v858_v20 = vmax.f32 %v8658_v50, 0.0  ;;  %v859_v48 = vmax.f32 %v8661_v62, 0.0  ;;  %v860_v14 = vmax.f32 %v8664_v0, 0.0  ;;  %v861_v42 = vmax.f32 %v8667_v25, 0.0 }
 0x1aa   :  { %v862_v58 = vmax.f32 %v8670_v8, 0.0  ;;  %v863_v40 = vmax.f32 %v8673_v59, 0.0  ;;  %v864_v28 = vmax.f32 %v8676_v45, 0.0  ;;  %v865_v22 = vmax.f32 %v8679_v43, 0.0 }
 0x1ab   :  { %v866_v34 = vmax.f32 %v8682_v30, 0.0  ;;  %v867_v47 = vmax.f32 %v8685_v27, 0.0  ;;  %v868_v37 = vmax.f32 %v8688_v44, 0.0  ;;  %v869_v31 = vmax.f32 %v8691_v2, 0.0 }
 0x1ac   :  { %v870_v63 = vmax.f32 %v8694_v17, 0.0  ;;  %v871_v5 = vmax.f32 %v8697_v60, 0.0  ;;  %v872_v50 = vmax.f32 %v8700_v10, 0.0  ;;  %v873_v62 = vmax.f32 %v8703_v16, 0.0 }
 0x1ad   :  { %v874_v0 = vmax.f32 %v8706_v21, 0.0  ;;  %v875_v25 = vmax.f32 %v8709_v12, 0.0  ;;  %v876_v8 = vmax.f32 %v8712_v9, 0.0  ;;  %v877_v59 = vmax.f32 %v8715_v51, 0.0 }
 0x1ae   :  { %v878_v45 = vmax.f32 %v8718_v36, 0.0  ;;  %v879_v43 = vmax.f32 %v8721_v26, 0.0  ;;  %v880_v30 = vmax.f32 %v8724_v35, 0.0  ;;  %v881_v27 = vmax.f32 %v8727_v49, 0.0 }
 0x1af   :  { %v882_v44 = vmax.f32 %v8730_v54, 0.0  ;;  %v883_v2 = vmax.f32 %v8733_v53, 0.0  ;;  %v884_v17 = vmax.f32 %v8736_v15, 0.0  ;;  %v885_v60 = vmax.f32 %v8739_v3, 0.0  ;;  %v913_v15 = vpop.permute.xlu1 %912  ;;  %v908_v3 = vpop.permute.xlu0 %907 }
 0x1b0   :  { %v886_v10 = vmax.f32 %v8742_v13, 0.0  ;;  %v887_v16 = vmax.f32 %v8745_v1, 0.0  ;;  %v888_v21 = vmax.f32 %v8748_v7, 0.0  ;;  %v889_v12 = vmax.f32 %v8751_v23, 0.0 }
 0x1b1   :  { %v890_v9 = vmax.f32 %v8754_v38, 0.0  ;;  %v891_v51 = vmax.f32 %v8757_v11, 0.0  ;;  %v892_v36 = vmax.f32 %v8760_v18, 0.0  ;;  %v893_v26 = vmax.f32 %v8763_v33, 0.0 }
 0x1b2   :  { %v894_v35 = vmax.f32 %v8766_v29, 0.0  ;;  %v895_v49 = vmax.f32 %v8769_v61, 0.0  ;;  %v896_v54 = vmax.f32 %v8772_v6, 0.0  ;;  %v897_v53 = vmax.f32 %v8775_v57, 0.0  ;;  %v11191_v61 = vld [vmem:[#allocation41_spill] sm:$0xff]  ;;  %v11192_v57 = vld [vmem:[#allocation40_spill] sm:$0xff] }
 0x1b3   :  { %v898_v13 = vmax.f32 %v8778_v4, 0.0  ;;  %v899_v1 = vmax.f32 %v8781_v19, 0.0  ;;  %v900_v7 = vmax.f32 %v8784_v39, 0.0  ;;  %v903_v23 = vmax.f32 %v8787_v55, 0.0  ;;  %v11193_v19 = vld [vmem:[#allocation42_spill] sm:$0xff]  ;;  %v11194_v55 = vld [vmem:[#allocation44_spill] sm:$0xff] }
 0x1b4   :  { %v904_v38 = vmax.f32 %v8790_v32, 0.0  ;;  %v1145_v11 = vmul.f32 %v908_v3, %v857_v46  ;;  %v1146_v18 = vmul.f32 %v913_v15, %v858_v20  ;;  %v1147_v33 = vmul.f32 %v8602_v56, %v859_v48  ;;  %v11195_v3 = vld [vmem:[#allocation43_spill] sm:$0xff]  ;;  %v11197_v48 = vld [vmem:[#allocation46_spill] sm:$0xff] }
 0x1b5   :  { %v1148_v29 = vmul.f32 %v8600_v41, %v860_v14  ;;  %v1149_v6 = vmul.f32 %v11191_v61, %v861_v42  ;;  %v1150_v52 = vmul.f32 %v11192_v57, %v862_v58  ;;  %v1151_v4 = vmul.f32 %v8565_v24, %v863_v40  ;;  %v11196_v15 = vld [vmem:[#allocation47_spill] sm:$0xff]  ;;  %v11198_v14 = vld [vmem:[#allocation49_spill] sm:$0xff]  ;;  %v11199_v42 = vld [vmem:[#allocation48_spill] sm:$0xff] }
 0x1b6   :  { %v1152_v39 = vmul.f32 %v11193_v19, %v864_v28  ;;  %v1153_v32 = vmul.f32 %v11194_v55, %v865_v22  ;;  %v1154_v46 = vmul.f32 %v11195_v3, %v866_v34  ;;  %v1155_v20 = vmul.f32 %v11196_v15, %v867_v47  ;;  %v11200_v57 = vld [vmem:[#allocation51_spill] sm:$0xff]  ;;  %v11201_v24 = vld [vmem:[#allocation50_spill] sm:$0xff]  ;;  %v11203_v22 = vld [vmem:[#allocation53_spill] sm:$0xff] }
 0x1b7   :  { %v1156_v56 = vmul.f32 %v11197_v48, %v868_v37  ;;  %v1157_v41 = vmul.f32 %v11198_v14, %v869_v31  ;;  %v1158_v61 = vmul.f32 %v11199_v42, %v870_v63  ;;  %v1159_v58 = vmul.f32 %v11200_v57, %v871_v5  ;;  %v11202_v19 = vld [vmem:[#allocation54_spill] sm:$0xff]  ;;  %v11205_v15 = vld [vmem:[#allocation13_spill] sm:$0xff]  ;;  %v11207_v14 = vld [vmem:[#allocation12_spill] sm:$0xff] }
 0x1b8   :  { %v1160_v40 = vmul.f32 %v11201_v24, %v872_v50  ;;  %v1161_v28 = vmul.f32 %v11202_v19, %v873_v62  ;;  %v1162_v55 = vmul.f32 %v11203_v22, %v874_v0  ;;  %v11204_v3 = vld [vmem:[#allocation14_spill] sm:$0xff]  ;;  %v1164_v47 = vmul.f32 %v11205_v15, %v876_v8  ;;  %v11208_v42 = vld [vmem:[#allocation9_spill] sm:$0xff]  ;;  %v11209_v5 = vld [vmem:[#allocation11_spill] sm:$0xff] }
 0x1b9   :  { %v1163_v34 = vmul.f32 %v11204_v3, %v875_v25  ;;  %v11206_v37 = vld [vmem:[#allocation10_spill] sm:$0xff]  ;;  %v1166_v31 = vmul.f32 %v11207_v14, %v878_v45  ;;  %v1167_v63 = vmul.f32 %v11208_v42, %v879_v43  ;;  %v1168_v57 = vmul.f32 %v11209_v5, %v880_v30  ;;  %v11210_v24 = vld [vmem:[#allocation16_spill] sm:$0xff]  ;;  %v11211_v19 = vld [vmem:[#allocation15_spill] sm:$0xff] }
 0x1ba   :  { %v1165_v48 = vmul.f32 %v11206_v37, %v877_v59  ;;  %v1169_v50 = vmul.f32 %v11210_v24, %v881_v27  ;;  %v1170_v62 = vmul.f32 %v11211_v19, %v882_v44  ;;  %v11212_v0 = vld [vmem:[#allocation18_spill] sm:$0xff]  ;;  %v11213_v3 = vld [vmem:[#allocation17_spill] sm:$0xff]  ;;  %v11214_v8 = vld [vmem:[#allocation20_spill] sm:$0xff] }
 0x1bb   :  { %v1171_v22 = vmul.f32 %v11212_v0, %v883_v2  ;;  %v1172_v25 = vmul.f32 %v11213_v3, %v884_v17  ;;  %v1173_v15 = vmul.f32 %v11214_v8, %v885_v60  ;;  %v11215_v37 = vld [vmem:[#allocation19_spill] sm:$0xff]  ;;  %v11216_v14 = vld [vmem:[#allocation22_spill] sm:$0xff]  ;;  %v11217_v42 = vld [vmem:[#allocation21_spill] sm:$0xff] }
 0x1bc   :  { %v1174_v59 = vmul.f32 %v11215_v37, %v886_v10  ;;  %v1175_v45 = vmul.f32 %v11216_v14, %v887_v16  ;;  %v1176_v43 = vmul.f32 %v11217_v42, %v888_v21  ;;  %v11218_v5 = vld [vmem:[#allocation24_spill] sm:$0xff]  ;;  %v11219_v24 = vld [vmem:[#allocation23_spill] sm:$0xff]  ;;  %v11220_v19 = vld [vmem:[#allocation26_spill] sm:$0xff]  ;;  %v1143_v14 = vpop.permute.xlu1 %1142  ;;  %v1138_v16 = vpop.permute.xlu0 %1137 }
 0x1bd   :  { %v1177_v30 = vmul.f32 %v11218_v5, %v889_v12  ;;  %v1178_v27 = vmul.f32 %v11219_v24, %v890_v9  ;;  %v1179_v44 = vmul.f32 %v11220_v19, %v891_v51  ;;  %v11221_v0 = vld [vmem:[#allocation25_spill] sm:$0xff]  ;;  %v11222_v3 = vld [vmem:[#allocation28_spill] sm:$0xff]  ;;  %v11223_v8 = vld [vmem:[#allocation27_spill] sm:$0xff] }
 0x1be   :  { %v1180_v2 = vmul.f32 %v11221_v0, %v892_v36  ;;  %v1181_v17 = vmul.f32 %v11222_v3, %v893_v26  ;;  %v1182_v60 = vmul.f32 %v11223_v8, %v894_v35  ;;  %v11224_v10 = vld [vmem:[#allocation31_spill] sm:$0xff]  ;;  %v11225_v21 = vld [vmem:[#allocation30_spill] sm:$0xff]  ;;  %v11227_v9 = vld [vmem:[#allocation33_spill] sm:$0xff]  ;;  %v1191_v3 = vmul.f32 %v1138_v16, %v903_v23 }
 0x1bf   :  { %v1183_v37 = vmul.f32 %v11224_v10, %v895_v49  ;;  %v1184_v42 = vmul.f32 %v11225_v21, %v896_v54  ;;  %v11226_v5 = vld [vmem:[#allocation34_spill] sm:$0xff]  ;;  %v1186_v24 = vmul.f32 %v11227_v9, %v898_v13  ;;  %v11229_v0 = vld [vmem:[#allocation37_spill] sm:$0xff]  ;;  %v1192_v26 = vmul.f32 %v1143_v14, %v904_v38 }
 0x1c0   :  { %v1185_v12 = vmul.f32 %v11226_v5, %v897_v53  ;;  %v11228_v19 = vld [vmem:[#allocation38_spill] sm:$0xff]  ;;  %v1188_v36 = vmul.f32 %v11229_v0, %v900_v7  ;;  %v1193_v8 = vpack.c.bf16 %v1146_v18, %v1145_v11  ;;  %v8880_v35 = vpack.c.bf16 %v1148_v29, %v1147_v33  ;;  %v7711_v5 = vld [vmem:[#allocation3 + $0x110] sm:$0xff]  }
 0x1c1   :  { %v1187_v51 = vmul.f32 %v11228_v19, %v899_v1  ;;  %v8882_v10 = vpack.c.bf16 %v1150_v52, %v1149_v6  ;;  %v8884_v49 = vpack.c.bf16 %v1152_v39, %v1151_v4  ;;  %v8886_v21 = vpack.c.bf16 %v1154_v46, %v1153_v32  ;;  %v7718_v11 = vld [vmem:[#allocation3 + $0x8] sm:$0xff]  }
 0x1c2   :  { %v8888_v54 = vpack.c.bf16 %v1156_v56, %v1155_v20  ;;  %v8890_v53 = vpack.c.bf16 %v1158_v61, %v1157_v41  ;;  %v8892_v13 = vpack.c.bf16 %v1160_v40, %v1159_v58  ;;  %v8894_v1 = vpack.c.bf16 %v1162_v55, %v1161_v28  ;;  %1217 = vst [vmem:[#allocation2] sm:$0xff] %v1193_v8  ;;  %v11231_v41 = vld [vmem:[#allocation45_spill] sm:$0xff]  ;;  %v7720_v61 = vld [vmem:[#allocation3 + $0x10] sm:$0xff]  }
 0x1c3   :  { %v8896_v7 = vpack.c.bf16 %v1164_v47, %v1163_v34  ;;  %v8898_v23 = vpack.c.bf16 %v1166_v31, %v1165_v48  ;;  %v8900_v38 = vpack.c.bf16 %v1168_v57, %v1167_v63  ;;  %v8902_v52 = vpack.c.bf16 %v1170_v62, %v1169_v50  ;;  %1218 = vst [vmem:[#allocation2 + $0x8] sm:$0xff] %v8880_v35  ;;  %v7721_v31 = vld [vmem:[#allocation3 + $0x18] sm:$0xff]  }
 0x1c4   :  { %1219 = vst [vmem:[#allocation2 + $0x10] sm:$0xff] %v8882_v10  ;;  %1220 = vst [vmem:[#allocation2 + $0x18] sm:$0xff] %v8884_v49  ;;  %6772 = vmatprep.mubr.bf16.mxu0 %v8880_v35  ;;  %v8909_v18 = vpack.c.bf16 %v1172_v25, %v1171_v22  ;;  %v8911_v33 = vpack.c.bf16 %v1174_v59, %v1173_v15  ;;  %v8913_v29 = vpack.c.bf16 %v1176_v43, %v1175_v45  ;;  %v7710_v59 = vld [vmem:[#allocation3 + $0x108] sm:$0xff]  }
 0x1c5   :  { %1221 = vst [vmem:[#allocation2 + $0x20] sm:$0xff] %v8886_v21  ;;  %v8915_v6 = vpack.c.bf16 %v1178_v27, %v1177_v30  ;;  %1222 = vst [vmem:[#allocation2 + $0x28] sm:$0xff] %v8888_v54  ;;  %6773 = vmatmul.mubr.bf16.vlgmr.msra.gmra.mrb[48].mxu0 %v8882_v10  ;;  %v8922_v4 = vpack.c.bf16 %v1180_v2, %v1179_v44  ;;  %v8924_v39 = vpack.c.bf16 %v1182_v60, %v1181_v17  ;;  %v7722_v30 = vld [vmem:[#allocation3 + $0x20] sm:$0xff]  }
 0x1c6   :  { %1223 = vst [vmem:[#allocation2 + $0x30] sm:$0xff] %v8890_v53  ;;  %1224 = vst [vmem:[#allocation2 + $0x38] sm:$0xff] %v8892_v13  ;;  %v8926_v32 = vpack.c.bf16 %v1184_v42, %v1183_v37  ;;  %v8928_v46 = vpack.c.bf16 %v1186_v24, %v1185_v12  ;;  %6776 = vmatprep.mubr.bf16.mxu0 %v8884_v49  ;;  %v8935_v20 = vpack.c.bf16 %v1188_v36, %v1187_v51  ;;  %v11232_v17 = vld [vmem:[#allocation29_spill] sm:$0xff]  ;;  %v7724_v24 = vld [vmem:[#allocation3 + $0x28] sm:$0xff]  }
 0x1c7   :  { %1225 = vst [vmem:[#allocation2 + $0x40] sm:$0xff] %v8894_v1  ;;  %1226 = vst [vmem:[#allocation2 + $0x48] sm:$0xff] %v8896_v7  ;;  %v1216_v56 = vpack.c.bf16 %v1192_v26, %v1191_v3  ;;  %6813 = vmatpush3.bf16.msra.mxu0 %v11231_v41  ;;  %v11046_v58 = vshrl.u32 %v8896_v7, 16  ;;  %v11042_v40 = vshrl.u32 %v8898_v23, 16  ;;  %v11038_v28 = vshrl.u32 %v8900_v38, 16  ;;  %v7712_v3 = vld [vmem:[#allocation3 + $0x118] sm:$0xff]  }
 0x1c8   :  { %1227 = vst [vmem:[#allocation2 + $0x50] sm:$0xff] %v8898_v23  ;;  %1228 = vst [vmem:[#allocation2 + $0x58] sm:$0xff] %v8900_v38  ;;  %6814 = vmatprep.subr.bf16.mxu0 %v7718_v11  ;;  %v11044_v55 = vshll.u32 %v8898_v23, 16  ;;  %v11041_v47 = vshll.u32 %v8900_v38, 16  ;;  %v11033_v50 = vshrl.u32 %v8902_v52, 16  ;;  %v11039_v25 = vshll.u32 %v8902_v52, 16 }
 0x1c9   :  { %1229 = vst [vmem:[#allocation2 + $0x60] sm:$0xff] %v8902_v52  ;;  %11230 = vst [vmem:[#allocation36_spill] sm:$0xff] %v8935_v20  ;;  %v2513_v34 = vrot.slane %v11042_v40, 7  ;;  %v2516_v48 = vrot.slane %v11038_v28, 7  ;;  %v8958_v63 = vrot.slane %v11046_v58, 7  ;;  %v11030_v45 = vshrl.u32 %v8909_v18, 16 }
 0x1ca   :  { %1230 = vst [vmem:[#allocation2 + $0x68] sm:$0xff] %v8909_v18  ;;  %1231 = vst [vmem:[#allocation2 + $0x70] sm:$0xff] %v8911_v33  ;;  %v2519_v15 = vrot.slane %v11033_v50, 7  ;;  %v11029_v2 = vshrl.u32 %v8911_v33, 16  ;;  %v11034_v60 = vshll.u32 %v8909_v18, 16  ;;  %v1550_v37 = vshrl.u32 %v8882_v10, 16 }
 0x1cb   :  { %1232 = vst [vmem:[#allocation2 + $0x78] sm:$0xff] %v8913_v29  ;;  %1233 = vst [vmem:[#allocation2 + $0x80] sm:$0xff] %v8915_v6  ;;  %6815 = vmatpush3.bf16.msra.mxu0 %v7718_v11  ;;  %v2514_v57 = vor.u32 %v2513_v34, %v11044_v55  ;;  %v2517_v62 = vor.u32 %v2516_v48, %v11041_v47  ;;  %v2522_v44 = vrot.slane %v11030_v45, 7  ;;  %v11031_v16 = vshll.u32 %v8911_v33, 16  ;;  %v7725_v11 = vld [vmem:[#allocation3 + $0x30] sm:$0xff]   ;;  %v7714_v50 = vld [vmem:[#allocation3 + $0x128] sm:$0xff]  }
 0x1cc   :  { %1234 = vst [vmem:[#allocation2 + $0x88] sm:$0xff] %v8922_v4  ;;  %1235 = vst [vmem:[#allocation2 + $0x90] sm:$0xff] %v8924_v39  ;;  %6816 = vmatprep.subr.bf16.mxu0 %v7720_v61  ;;  %v2520_v27 = vor.u32 %v2519_v15, %v11039_v25  ;;  %v2525_v42 = vrot.slane %v11029_v2, 7  ;;  %v11027_v9 = vshrl.u32 %v8913_v29, 16  ;;  %v1542_v19 = vshrl.u32 %v8880_v35, 16  ;;  %v7715_v25 = vld [vmem:[#allocation3 + $0x130] sm:$0xff]  }
 0x1cd   :  { %1236 = vst [vmem:[#allocation2 + $0x98] sm:$0xff] %v8926_v32  ;;  %1237 = vst [vmem:[#allocation2 + $0xa0] sm:$0xff] %v8928_v46  ;;  %6777 = vmatmul.mubr.bf16.gmra.mrb[52].mxu0 %v8886_v21  ;;  %v8969_v22 = vsel %vm1536_vm0, %v8958_v63, %v2514_v57  ;;  %v8977_v43 = vsel %vm1536_vm0, %v2513_v34, %v2517_v62  ;;  %v2523_v12 = vor.u32 %v2522_v44, %v11034_v60 }
 0x1ce   :  { %1238 = vst [vmem:[#allocation2 + $0xa8] sm:$0xff] %v8935_v20  ;;  %1240 = vst [vmem:[#allocation2 + $0xb8] sm:$0xff] %v1216_v56  ;;  %6780 = vmatprep.mubr.bf16.mxu0 %v8888_v54  ;;  %6956 = vmatprep.mubr.bf16.mxu1 %v8969_v22  ;;  %v8989_v14 = vsel %vm1536_vm0, %v2516_v48, %v2520_v27  ;;  %v2526_v51 = vor.u32 %v2525_v42, %v11031_v16  ;;  %v11026_v0 = vshrl.u32 %v8915_v6, 16 }
 0x1cf   :  { %6817 = vmatpush3.bf16.msra.mxu0 %v7720_v61  ;;  %6957 = vmatmul.mubr.bf16.vlgmr.msra.gmra.mrb[0].mxu1 %v8977_v43  ;;  %v9006_v36 = vrot.slane %v1550_v37, 7  ;;  %v9009_v26 = vsel %vm1536_vm0, %v2519_v15, %v2523_v12  ;;  %v2528_v8 = vrot.slane %v11027_v9, 7  ;;  %v9013_v56 = vrot.slane %v1542_v19, 7 }
 0x1d0   :  { %6818 = vmatprep.subr.bf16.mxu0 %v7721_v31  ;;  %6981 = vmatpush3.bf16.msra.mxu1 %v11232_v17  ;;  %v1553_v41 = vshll.u32 %v8882_v10, 16  ;;  %v9018_v61 = vsel %vm1536_vm0, %v2522_v44, %v2526_v51  ;;  %v9022_v34 = vrot.slane %v11026_v0, 7  ;;  %v1566_v48 = vshrl.u32 %v8886_v21, 16 }
 0x1d1   :  { %6982 = vmatprep.subr.bf16.mxu1 %v7710_v59  ;;  %6960 = vmatprep.mubr.bf16.mxu1 %v8989_v14  ;;  %v11035_v57 = vshrl.u32 %v8922_v4, 16  ;;  %v11032_v15 = vshll.u32 %v8915_v6, 16  ;;  %v11050_v27 = vshll.u32 %v8886_v21, 16  ;;  %v11037_v17 = vshrl.u32 %v8926_v32, 16 }
 0x1d2   :  { %v9029_v62 = vor.u32 %v1553_v41, %v9006_v36  ;;  %v11057_v12 = vshrl.u32 %v8888_v54, 16  ;;  %v11049_v19 = vshll.u32 %v8888_v54, 16  ;;  %v11055_v0 = vshrl.u32 %v8890_v53, 16 }
 0x1d3   :  { %6819 = vmatpush3.bf16.msra.mxu0 %v7721_v31  ;;  %v11028_v31 = vshll.u32 %v8913_v29, 16  ;;  %v2532_v51 = vor.u32 %v9022_v34, %v11032_v15  ;;  %v2534_v9 = vrot.slane %v11035_v57, 7  ;;  %v11048_v2 = vshll.u32 %v8890_v53, 16  ;;  %v9065_v57 = vld [vmem:[#allocation3 + $0x80] sm:$0xff]  }
 0x1d4   :  { %6820 = vmatprep.subr.bf16.mxu0 %v7722_v30  ;;  %6983 = vmatpush3.bf16.msra.mxu1 %v7710_v59  ;;  %11233 = vst [vmem:[#allocation32_spill] sm:$0xff] %v9029_v62  ;;  %v7713_v59 = vld [vmem:[#allocation3 + $0x120] sm:$0xff]   ;;  %v11052_v45 = vshll.u32 %v8892_v13, 16  ;;  %v11043_v16 = vshll.u32 %v8922_v4, 16  ;;  %v11056_v58 = vshrl.u32 %v8894_v1, 16 }
 0x1d5   :  { %6781 = vmatmul.mubr.bf16.gmra.mrb[56].mxu0 %v8890_v53  ;;  %6984 = vmatprep.subr.bf16.mxu1 %v7711_v5  ;;  %v2529_v44 = vor.u32 %v2528_v8, %v11028_v31  ;;  %v9048_v31 = vrot.slane %v1553_v41, 1  ;;  %v2043_v40 = vrot.slane %v11048_v2, 1 }
 0x1d6   :  { %6784 = vmatprep.mubr.bf16.mxu0 %v8892_v13  ;;  %v1675_v28 = vor.u32 %v2534_v9, %v11043_v16 }
 0x1d7   :  { %6821 = vmatpush3.bf16.msra.mxu0 %v7722_v30  ;;  %6961 = vmatmul.mubr.bf16.gmra.mrb[4].mxu1 %v9009_v26  ;;  %v11036_v30 = vshrl.u32 %v8924_v39, 16  ;;  %11234 = vst [vmem:[#allocation35_spill] sm:$0xff] %v9048_v31  ;;  %v9056_v60 = vsel %vm1536_vm0, %v2525_v42, %v2529_v44  ;;  %v9063_v41 = vor.u32 %v9048_v31, %v1550_v37  ;;  %v11053_v44 = vshll.u32 %v8894_v1, 16  ;;  %v9271_v31 = vld [vmem:[#allocation2 + $0x58] sm:$0xff] }
 0x1d8   :  { %6822 = vmatprep.subr.bf16.mxu0 %v7724_v24  ;;  %6964 = vmatprep.mubr.bf16.mxu1 %v9018_v61  ;;  %v11047_v37 = vshll.u32 %v8926_v32, 16 }
 0x1d9   :  { %6985 = vmatpush3.bf16.msra.mxu1 %v7711_v5  ;;  %v7727_v5 = vld [vmem:[#allocation3 + $0x38] sm:$0xff]   ;;  %v2537_v15 = vrot.slane %v11036_v30, 7  ;;  %v9069_v30 = vsel %vm1536_vm0, %v2528_v8, %v2532_v51  ;;  %v11054_v8 = vshrl.u32 %v8892_v13, 16  ;;  %v11051_v51 = vshll.u32 %v8928_v46, 16 }
 0x1da   :  { %6986 = vmatprep.subr.bf16.mxu1 %v7712_v3  ;;  %11235 = vst [vmem:[#allocation39_spill] sm:$0xff] %v9069_v30  ;;  %v2059_v2 = vrot.slane %v11053_v44, 1 }
 0x1db   :  { %6823 = vmatpush3.bf16.msra.mxu0 %v7724_v24  ;;  %v11040_v24 = vshrl.u32 %v8928_v46, 16 }
 0x1dc   :  { %6824 = vmatprep.subr.bf16.mxu0 %v7725_v11 }
 0x1dd   :  { %6785 = vmatmul.mubr.bf16.gmra.mrb[60].mxu0 %v8894_v1  ;;  %6987 = vmatpush3.bf16.msra.mxu1 %v7712_v3  ;;  %v2540_v3 = vrot.slane %v11037_v17, 7  ;;  %v2543_v42 = vrot.slane %v11040_v24, 7  ;;  %v2027_v17 = vrot.slane %v11050_v27, 1  ;;  %v2035_v24 = vrot.slane %v11049_v19, 1  ;;  %v7717_v19 = vld [vmem:[#allocation3 + $0x138] sm:$0xff]  }
 0x1de   :  { %6788 = vmatprep.mubr.bf16.mxu0 %v8896_v7  ;;  %6988 = vmatprep.subr.bf16.mxu1 %v7713_v59 }
 0x1df   :  { %6825 = vmatpush3.bf16.msra.mxu0 %v7725_v11  ;;  %6965 = vmatmul.mubr.bf16.gmra.mrb[8].mxu1 %v9056_v60  ;;  %v11045_v11 = vshll.u32 %v8924_v39, 16  ;;  %v2031_v47 = vor.u32 %v2027_v17, %v1566_v48  ;;  %v1691_v16 = vor.u32 %v2540_v3, %v11047_v37  ;;  %v2039_v55 = vor.u32 %v2035_v24, %v11057_v12 }
 0x1e0   :  { %6826 = vmatprep.subr.bf16.mxu0 %v7727_v5  ;;  %6968 = vmatprep.mubr.bf16.mxu1 %v9069_v30  ;;  %v2047_v37 = vor.u32 %v2043_v40, %v11055_v0  ;;  %v2547_v0 = vshrl.u32 %v8935_v20, 16 }
 0x1e1   :  { %6989 = vmatpush3.bf16.msra.mxu1 %v7713_v59  ;;  %v1683_v59 = vor.u32 %v2537_v15, %v11045_v11  ;;  %v2051_v11 = vrot.slane %v11052_v45, 1  ;;  %v9116_v45 = vsel %vm1536_vm0, %v9022_v34, %v1675_v28  ;;  %v1561_v28 = vshll.u32 %v8884_v49, 16 }
 0x1e2   :  { %6990 = vmatprep.subr.bf16.mxu1 %v7714_v50  ;;  %11236 = vst [vmem:[#allocation41_spill] sm:$0xff] %v9116_v45  ;;  %v9132_v34 = vsel %vm1536_vm0, %v2537_v15, %v1691_v16 }
 0x1e3   :  { %6827 = vmatpush3.bf16.msra.mxu0 %v7727_v5  ;;  %v1699_v5 = vor.u32 %v2543_v42, %v11051_v51  ;;  %v2055_v27 = vor.u32 %v2051_v11, %v11054_v8  ;;  %v9112_v51 = vsel %vm1536_vm0, %v9013_v56, %v9029_v62  ;;  %v9124_v44 = vsel %vm1536_vm0, %v2534_v9, %v1683_v59  ;;  %v7719_v8 = vld [vmem:[#allocation3 + $0x140] sm:$0xff]  }
 0x1e4   :  { %6868 = vmatprep.subr.bf16.mxu0 %v9065_v57  ;;  %11238 = vst [vmem:[#allocation42_spill] sm:$0xff] %v9124_v44  ;;  %11239 = vst [vmem:[#allocation44_spill] sm:$0xff] %v9132_v34  ;;  %v2549_v9 = vrot.slane %v2547_v0, 7  ;;  %v2550_v59 = vshll.u32 %v8935_v20, 16  ;;  %v2019_v12 = vrot.slane %v1561_v28, 1  ;;  %v11243_v62 = vshrl.u32 %v8888_v54, 16 }
 0x1e5   :  { %6789 = vmatmul.mubr.bf16.gmra.mrb[64].mxu0 %v8898_v23  ;;  %6991 = vmatpush3.bf16.msra.mxu1 %v7714_v50  ;;  %v9120_v50 = vor.u32 %v2059_v2, %v11056_v58  ;;  %v7734_v20 = vld [vmem:[#allocation3 + $0x88] sm:$0xff]  }
 0x1e6   :  { %6792 = vmatprep.mubr.bf16.mxu0 %v8900_v38  ;;  %6992 = vmatprep.subr.bf16.mxu1 %v7715_v25  ;;  %v2552_v58 = vor.u32 %v2550_v59, %v2549_v9  ;;  %v9145_v16 = vsel %vm2000_vm1, %v9063_v41, %v2019_v12  ;;  %v1568_v9 = vrot.slane %v1566_v48, 7  ;;  %v11244_v41 = vshrl.u32 %v8890_v53, 16 }
 0x1e7   :  { %11237 = vst [vmem:[#allocation40_spill] sm:$0xff] %v9120_v50  ;;  %6969 = vmatmul.mubr.bf16.gmra.mrb[12].mxu1 %v9116_v45  ;;  %11241 = vst [vmem:[#allocation47_spill] sm:$0xff] %v9145_v16  ;;  %v1576_v50 = vrot.slane %v11243_v62, 7  ;;  %v9165_v48 = vsel %vm2000_vm1, %v2039_v55, %v2043_v40  ;;  %v9173_v62 = vsel %vm2000_vm1, %v2047_v37, %v2051_v11  ;;  %v11250_v40 = vshll.u32 %v8886_v21, 16  ;;  %v7723_v11 = vld [vmem:[#allocation3 + $0x148] sm:$0xff]   ;;  %v9187_v37 = vld [vmem:[#allocation2 + $0x20] sm:$0xff] }
 0x1e8   :  { %6972 = vmatprep.mubr.bf16.mxu1 %v9124_v44  ;;  %v2553_v0 = vsel %vm1536_vm0, %v2543_v42, %v2552_v58  ;;  %v9158_v16 = vrot.slane %v11244_v41, 7  ;;  %v11059_v58 = vshll.u32 %v8896_v7, 16  ;;  %11246 = vst [vmem:[#allocation48_spill] sm:$0xff] %v9165_v48  ;;  %11248 = vst [vmem:[#allocation51_spill] sm:$0xff] %v9173_v62  ;;  %v9228_v62 = vld [vmem:[#allocation2 + $0x30] sm:$0xff]  ;;  %v9313_v45 = vld [vmem:[#allocation2 + $0x80] sm:$0xff] }
 0x1e9   :  { %6993 = vmatpush3.bf16.msra.mxu1 %v7715_v25  ;;  %v9136_v25 = vsel %vm1536_vm0, %v2540_v3, %v1699_v5  ;;  %v1241_v3 = vld [vmem:[#allocation2] sm:$0x80]  ;;  %v1571_v55 = vor.u32 %v11250_v40, %v1568_v9  ;;  %v9200_v40 = vld [vmem:[#allocation2 + $0x18] sm:$0xff] }
 0x1ea   :  { %6994 = vmatprep.subr.bf16.mxu1 %v7717_v19  ;;  %11240 = vst [vmem:[#allocation43_spill] sm:$0xff] %v9136_v25  ;;  %v1538_v42 = vshrl.u32 %v1241_v3, 16  ;;  %v11252_v3 = vshll.u32 %v8890_v53, 16  ;;  %11255 = vst [vmem:[#allocation53_spill] sm:$0xff] %v9200_v40 }
 0x1ec   :  { %v1587_v41 = vor.u32 %v11252_v3, %v9158_v16 }
 0x1ed   :  { %6793 = vmatmul.mubr.bf16.gmra.mrb[68].mxu0 %v8902_v52  ;;  %6995 = vmatpush3.bf16.msra.mxu1 %v7717_v19  ;;  %v1558_v19 = vshrl.u32 %v8884_v49, 16 }
 0x1ee   :  { %6796 = vmatprep.mubr.bf16.mxu0 %v8909_v18  ;;  %7036 = vmatprep.subr.bf16.mxu1 %v7719_v8 }
 0x1ef   :  { %6973 = vmatmul.mubr.bf16.gmra.mrb[16].mxu1 %v9132_v34  ;;  %v2023_v15 = vor.u32 %v2019_v12, %v1558_v19  ;;  %v1560_v5 = vrot.slane %v1558_v19, 7  ;;  %v9162_v12 = vsel %vm2000_vm1, %v2031_v47, %v2035_v24  ;;  %v1545_v19 = vshll.u32 %v8880_v35, 16 }
 0x1f0   :  { %6976 = vmatprep.mubr.bf16.mxu1 %v9136_v25  ;;  %11245 = vst [vmem:[#allocation49_spill] sm:$0xff] %v9162_v12  ;;  %v9178_v47 = vsel %vm2000_vm1, %v2055_v27, %v2059_v2  ;;  %v11251_v24 = vshll.u32 %v8888_v54, 16  ;;  %v9191_v35 = vrot.slane %v11059_v58, 1  ;;  %v11254_v27 = vshll.u32 %v8892_v13, 16  ;;  %v9207_v58 = vld [vmem:[#allocation2 + $0x28] sm:$0xff] }
 0x1f1   :  { %v9152_v59 = vsel %vm2000_vm1, %v2023_v15, %v2027_v17  ;;  %11249 = vst [vmem:[#allocation50_spill] sm:$0xff] %v9178_v47  ;;  %v1547_v2 = vor.u32 %v1545_v19, %v9013_v56  ;;  %11257 = vst [vmem:[#allocation14_spill] sm:$0xff] %v9207_v58  ;;  %v7726_v47 = vld [vmem:[#allocation3 + $0x150] sm:$0xff]   ;;  %v9226_v56 = vsel %vm1536_vm0, %v1576_v50, %v1587_v41  ;;  %v11266_v41 = vshll.u32 %v8900_v38, 16  ;;  %v9281_v12 = vld [vmem:[#allocation2 + $0x68] sm:$0xff] }
 0x1f2   :  { %11242 = vst [vmem:[#allocation46_spill] sm:$0xff] %v9152_v59  ;;  %v1579_v15 = vor.u32 %v11251_v24, %v1576_v50  ;;  %11253 = vst [vmem:[#allocation54_spill] sm:$0xff] %v9191_v35  ;;  %v11256_v24 = vshrl.u32 %v8894_v1, 16  ;;  %v11268_v50 = vshll.u32 %v8902_v52, 16  ;;  %v11272_v25 = vshrl.u32 %v8902_v52, 16 }
 0x1f3   :  { %v11278_v34 = vshll.u32 %v8913_v29, 16 }
 0x1f4   :  { %v9204_v3 = vrot.slane %v11256_v24, 7 }
 0x1f5   :  { %6797 = vmatmul.mubr.bf16.gmra.mrb[72].mxu0 %v8911_v33  ;;  %v2115_v44 = vrot.slane %v11278_v34, 1  ;;  %v11281_v34 = vshrl.u32 %v9200_v40, 16 }
 0x1f6   :  { %6800 = vmatprep.mubr.bf16.mxu0 %v8913_v29 }
 0x1f7   :  { %6977 = vmatmul.mubr.bf16.gmra.mrb[20].mxu1 %v2553_v0  ;;  %v1563_v0 = vor.u32 %v1561_v28, %v1560_v5  ;;  %v1540_v28 = vrot.slane %v1538_v42, 7  ;;  %v11258_v42 = vshrl.u32 %v8896_v7, 16 }
 0x1f8   :  { %6996 = vmatprep.mubr.bf16.mxu1 %v8882_v10  ;;  %v11247_v10 = vshrl.u32 %v8892_v13, 16 }
 0x1f9   :  { %v2071_v19 = vor.u32 %v11258_v42, %v9191_v35  ;;  %v9217_v24 = vsel %vm1536_vm0, %v9006_v36, %v1563_v0  ;;  %v1548_v42 = vsel %vm1536_vm0, %v1540_v28, %v1547_v2  ;;  %v11264_v36 = vshrl.u32 %v8898_v23, 16 }
 0x1fa   :  { %v9169_v17 = vrot.slane %v11247_v10, 7  ;;  %11260 = vst [vmem:[#allocation13_spill] sm:$0xff] %v9217_v24  ;;  %v2083_v28 = vrot.slane %v11266_v41, 1  ;;  %v11267_v2 = vshrl.u32 %v9187_v37, 16  ;;  %v9273_v41 = vld [vmem:[#allocation2 + $0x60] sm:$0xff] }
 0x1fc   :  { %v9197_v10 = vor.u32 %v11254_v27, %v9169_v17  ;;  %v11259_v27 = vshll.u32 %v8898_v23, 16 }
 0x1fd   :  { %6801 = vmatmul.mubr.bf16.gmra.mrb[76].mxu0 %v8915_v6 }
 0x1fe   :  { %6804 = vmatprep.mubr.bf16.mxu0 %v8922_v4 }
 0x1ff   :  { %6997 = vmatmul.mubr.bf16.vlgmr.msra.gmra.mrb[24].mxu1 %v8884_v49  ;;  %v2075_v49 = vrot.slane %v11259_v27, 1  ;;  %v9254_v27 = vld [vmem:[#allocation2 + $0x48] sm:$0xff] }
 0x200   :  { %7037 = vmatpush3.bf16.msra.mxu1 %v7719_v8  ;;  %7000 = vmatprep.mubr.bf16.mxu1 %v8886_v21  ;;  %v9220_v8 = vsel %vm1536_vm0, %v1560_v5, %v1571_v55  ;;  %v9223_v21 = vsel %vm1536_vm0, %v1568_v9, %v1579_v15  ;;  %v9241_v55 = vld [vmem:[#allocation2 + $0x38] sm:$0xff]  ;;  %v9243_v15 = vld [vmem:[#allocation2 + $0x40] sm:$0xff]  ;;  %v2091_v9 = vrot.slane %v11268_v50, 1  ;;  %v11276_v50 = vshrl.u32 %v8909_v18, 16 }
 0x201   :  { %7038 = vmatprep.subr.bf16.mxu1 %v7723_v11  ;;  %11261 = vst [vmem:[#allocation10_spill] sm:$0xff] %v9220_v8  ;;  %11262 = vst [vmem:[#allocation12_spill] sm:$0xff] %v9223_v21  ;;  %v9233_v35 = vsel %vm2000_vm1, %v2071_v19, %v2075_v49  ;;  %v2079_v0 = vor.u32 %v11264_v36, %v2075_v49  ;;  %v9250_v19 = vrot.slane %v11267_v2, 7  ;;  %v7728_v5 = vld [vmem:[#allocation3 + $0x158] sm:$0xff]   ;;  %v11270_v2 = vshrl.u32 %v8900_v38, 16 }
 0x202   :  { %11263 = vst [vmem:[#allocation9_spill] sm:$0xff] %v9233_v35  ;;  %11265 = vst [vmem:[#allocation11_spill] sm:$0xff] %v9241_v55  ;;  %v9259_v35 = vld [vmem:[#allocation2 + $0x50] sm:$0xff]  ;;  %v11271_v49 = vshll.u32 %v8909_v18, 16 }
 0x203   :  { %v2087_v48 = vor.u32 %v11270_v2, %v2083_v28  ;;  %v11275_v2 = vshll.u32 %v8911_v33, 16 }
 0x204   :  { %7039 = vmatpush3.bf16.msra.mxu1 %v7723_v11  ;;  %v9262_v11 = vsel %vm2000_vm1, %v2079_v0, %v2083_v28  ;;  %v2099_v36 = vrot.slane %v11271_v49, 1  ;;  %v2095_v0 = vor.u32 %v11272_v25, %v2091_v9  ;;  %v7729_v28 = vld [vmem:[#allocation3 + $0x160] sm:$0xff]  }
 0x205   :  { %6805 = vmatmul.mubr.bf16.gmra.mrb[80].mxu0 %v8924_v39  ;;  %7040 = vmatprep.subr.bf16.mxu1 %v7726_v47  ;;  %11269 = vst [vmem:[#allocation16_spill] sm:$0xff] %v9262_v11  ;;  %v9284_v59 = vsel %vm2000_vm1, %v2087_v48, %v2091_v9  ;;  %v9289_v11 = vld [vmem:[#allocation2 + $0x70] sm:$0xff]  ;;  %v2107_v49 = vrot.slane %v11275_v2, 1  ;;  %v11282_v48 = vshrl.u32 %v8913_v29, 16  ;;  %v7730_v9 = vld [vmem:[#allocation3 + $0x168] sm:$0xff]  }
 0x206   :  { %6808 = vmatprep.mubr.bf16.mxu0 %v8926_v32  ;;  %11273 = vst [vmem:[#allocation15_spill] sm:$0xff] %v9284_v59  ;;  %v2103_v25 = vor.u32 %v11276_v50, %v2099_v36  ;;  %v11289_v59 = vshll.u32 %v8924_v39, 16 }
 0x207   :  { %7001 = vmatmul.mubr.bf16.gmra.mrb[28].mxu1 %v8888_v54  ;;  %v9292_v54 = vsel %vm2000_vm1, %v2095_v0, %v2099_v36  ;;  %v3679_v0 = vrot.slane %v11281_v34, 7  ;;  %v11286_v34 = vshll.u32 %v9200_v40, 16  ;;  %v11302_v40 = vshll.u32 %v9228_v62, 16 }
 0x208   :  { %7004 = vmatprep.mubr.bf16.mxu1 %v8890_v53  ;;  %7041 = vmatpush3.bf16.msra.mxu1 %v7726_v47  ;;  %11274 = vst [vmem:[#allocation18_spill] sm:$0xff] %v9292_v54  ;;  %v9299_v47 = vld [vmem:[#allocation2 + $0x78] sm:$0xff]  ;;  %v11277_v54 = vshrl.u32 %v8911_v33, 16  ;;  %v9316_v36 = vsel %vm2000_vm1, %v2103_v25, %v2107_v49  ;;  %v2119_v53 = vor.u32 %v11282_v48, %v2115_v44  ;;  %v2139_v30 = vrot.slane %v11289_v59, 1 }
 0x209   :  { %7042 = vmatprep.subr.bf16.mxu1 %v7728_v5  ;;  %11279 = vst [vmem:[#allocation17_spill] sm:$0xff] %v9316_v36  ;;  %v9337_v36 = vor.u32 %v3679_v0, %v11286_v34  ;;  %v11293_v34 = vshrl.u32 %v8922_v4, 16  ;;  %v11294_v59 = vshll.u32 %v9207_v58, 16 }
 0x20a   :  { %v2111_v2 = vor.u32 %v11277_v54, %v2107_v49  ;;  %v11283_v49 = vshll.u32 %v8915_v6, 16 }
 0x20b   :  { %11287 = vst [vmem:[#allocation19_spill] sm:$0xff] %v9337_v36 }
 0x20c   :  { %7043 = vmatpush3.bf16.msra.mxu1 %v7728_v5  ;;  %v9320_v54 = vsel %vm2000_vm1, %v2111_v2, %v2115_v44  ;;  %v2123_v25 = vrot.slane %v11283_v49, 1  ;;  %v11285_v2 = vshll.u32 %v8922_v4, 16  ;;  %v11288_v44 = vshrl.u32 %v9207_v58, 16 }
 0x20d   :  { %6809 = vmatmul.mubr.bf16.gmra.mrb[84].mxu0 %v8928_v46  ;;  %11280 = vst [vmem:[#allocation20_spill] sm:$0xff] %v9320_v54  ;;  %7044 = vmatprep.subr.bf16.mxu1 %v7729_v28 }
 0x20e   :  { %6828 = vmatprep.mubr.bf16.mxu0 %v1548_v42  ;;  %v11284_v42 = vshll.u32 %v9187_v37, 16  ;;  %v2131_v50 = vrot.slane %v11285_v2, 1  ;;  %v3685_v48 = vrot.slane %v11288_v44, 7  ;;  %v9345_v49 = vsel %vm2000_vm1, %v2119_v53, %v2123_v25 }
 0x20f   :  { %7005 = vmatmul.mubr.bf16.gmra.mrb[32].mxu1 %v8892_v13  ;;  %11290 = vst [vmem:[#allocation22_spill] sm:$0xff] %v9345_v49  ;;  %v11292_v2 = vshrl.u32 %v8915_v6, 16  ;;  %v11295_v53 = vshrl.u32 %v9228_v62, 16 }
 0x210   :  { %v3683_v5 = vor.u32 %v9250_v19, %v11284_v42  ;;  %v2135_v36 = vor.u32 %v11293_v34, %v2131_v50  ;;  %7008 = vmatprep.mubr.bf16.mxu1 %v8894_v1  ;;  %7045 = vmatpush3.bf16.msra.mxu1 %v7729_v28  ;;  %v3686_v13 = vor.u32 %v3685_v48, %v11294_v59  ;;  %v11299_v28 = vshll.u32 %v8926_v32, 16 }
 0x211   :  { %v2127_v54 = vor.u32 %v11292_v2, %v2123_v25  ;;  %v3688_v49 = vrot.slane %v11295_v53, 7  ;;  %7046 = vmatprep.subr.bf16.mxu1 %v7730_v9  ;;  %v7731_v25 = vld [vmem:[#allocation3 + $0x170] sm:$0xff]   ;;  %v11300_v59 = vshrl.u32 %v9241_v55, 16  ;;  %v9372_v53 = vld [vmem:[#allocation2 + $0x88] sm:$0xff] }
 0x212   :  { %v9348_v42 = vsel %vm1536_vm0, %v3679_v0, %v3683_v5  ;;  %v11296_v0 = vshrl.u32 %v8924_v39, 16  ;;  %v9366_v34 = vsel %vm2000_vm1, %v2135_v36, %v2139_v30  ;;  %v2147_v44 = vrot.slane %v11299_v28, 1 }
 0x213   :  { %11291 = vst [vmem:[#allocation21_spill] sm:$0xff] %v9348_v42  ;;  %v1982_v42 = vld [vmem:[#allocation2 + $0xa8] sm:$0x1]  ;;  %v9363_v2 = vsel %vm2000_vm1, %v2127_v54, %v2131_v50  ;;  %11298 = vst [vmem:[#allocation23_spill] sm:$0xff] %v9366_v34  ;;  %v3691_v58 = vrot.slane %v11300_v59, 7  ;;  %v3689_v50 = vor.u32 %v3688_v49, %v11302_v40  ;;  %v11303_v54 = vshll.u32 %v8928_v46, 16 }
 0x214   :  { %v2143_v5 = vor.u32 %v11296_v0, %v2139_v30  ;;  %11297 = vst [vmem:[#allocation24_spill] sm:$0xff] %v9363_v2  ;;  %v9376_v0 = vsel %vm1536_vm0, %v9250_v19, %v3686_v13  ;;  %v11304_v36 = vshrl.u32 %v9243_v15, 16  ;;  %v11306_v59 = vshll.u32 %v9241_v55, 16  ;;  %7047 = vmatpush3.bf16.msra.mxu1 %v7730_v9  ;;  %v9393_v40 = vld [vmem:[#allocation2 + $0x90] sm:$0xff] }
 0x215   :  { %11301 = vst [vmem:[#allocation26_spill] sm:$0xff] %v9376_v0  ;;  %v2155_v30 = vrot.slane %v11303_v54, 1  ;;  %6829 = vmatmul.mubr.bf16.vlgmr.msra.gmra.mrb[48].mxu0 %v9112_v51  ;;  %v11307_v19 = vshrl.u32 %v8926_v32, 16  ;;  %v2161_v0 = vshll.u32 %v1982_v42, 16  ;;  %v9395_v54 = vld [vmem:[#allocation2 + $0xa8] sm:$0xff]  ;;  %v11310_v51 = vshll.u32 %v9243_v15, 16  ;;  %7048 = vmatprep.subr.bf16.mxu1 %v7731_v25 }
 0x216   :  { %v3694_v34 = vrot.slane %v11304_v36, 7  ;;  %v9386_v28 = vsel %vm2000_vm1, %v2143_v5, %v2147_v44  ;;  %v3692_v2 = vor.u32 %v3691_v58, %v11306_v59  ;;  %6832 = vmatprep.mubr.bf16.mxu0 %v9217_v24  ;;  %11308 = vst [vmem:[#allocation28_spill] sm:$0xff] %v9395_v54  ;;  %v9398_v36 = vsel %vm1536_vm0, %v3685_v48, %v3689_v50  ;;  %v7732_v42 = vld [vmem:[#allocation3 + $0x178] sm:$0xff]  }
 0x217   :  { %11305 = vst [vmem:[#allocation25_spill] sm:$0xff] %v9386_v28  ;;  %v2151_v13 = vor.u32 %v11307_v19, %v2147_v44  ;;  %11309 = vst [vmem:[#allocation27_spill] sm:$0xff] %v9398_v36  ;;  %v11311_v28 = vshrl.u32 %v8928_v46, 16  ;;  %v11312_v55 = vshrl.u32 %v9254_v27, 16  ;;  %6869 = vmatpush3.bf16.msra.mxu0 %v9065_v57  ;;  %v2163_v50 = vrot.slane %v2161_v0, 1  ;;  %v9415_v24 = vld [vmem:[#allocation2 + $0x98] sm:$0xff]  ;;  %7009 = vmatmul.mubr.bf16.gmra.mrb[36].mxu1 %v8896_v7 }
 0x218   :  { %v3695_v5 = vor.u32 %v3694_v34, %v11310_v51  ;;  %v9409_v19 = vsel %vm1536_vm0, %v3688_v49, %v3692_v2  ;;  %6870 = vmatprep.subr.bf16.mxu0 %v7734_v20  ;;  %v7736_v51 = vld [vmem:[#allocation3 + $0x90] sm:$0xff]   ;;  %v11316_v57 = vshll.u32 %v9254_v27, 16  ;;  %v11317_v9 = vshrl.u32 %v9259_v35, 16  ;;  %v9426_v0 = vld [vmem:[#allocation2 + $0xa0] sm:$0xff]  ;;  %7012 = vmatprep.mubr.bf16.mxu1 %v8898_v23 }
 0x219   :  { %v2159_v59 = vor.u32 %v11311_v28, %v2155_v30  ;;  %v3697_v44 = vrot.slane %v11312_v55, 7  ;;  %11313 = vst [vmem:[#allocation31_spill] sm:$0xff] %v9409_v19  ;;  %v9412_v48 = vsel %vm2000_vm1, %v2151_v13, %v2155_v30  ;;  %7049 = vmatpush3.bf16.msra.mxu1 %v7731_v25  ;;  %v11321_v2 = vshll.u32 %v9259_v35, 16 }
 0x21a   :  { %11314 = vst [vmem:[#allocation30_spill] sm:$0xff] %v9412_v48  ;;  %v9418_v55 = vsel %vm1536_vm0, %v3691_v58, %v3695_v5  ;;  %v3700_v49 = vrot.slane %v11317_v9, 7  ;;  %v11319_v58 = vshrl.u32 %v9271_v31, 16  ;;  %7050 = vmatprep.subr.bf16.mxu1 %v7732_v42  ;;  %v11323_v25 = vshll.u32 %v9271_v31, 16 }
 0x21b   :  { %11315 = vst [vmem:[#allocation34_spill] sm:$0xff] %v9418_v55  ;;  %v3698_v36 = vor.u32 %v3697_v44, %v11316_v57  ;;  %v9430_v13 = vsel %vm2000_vm1, %v2159_v59, %v2163_v50  ;;  %v11322_v55 = vshrl.u32 %v9273_v41, 16  ;;  %6871 = vmatpush3.bf16.msra.mxu0 %v7734_v20  ;;  %v9443_v59 = vld [vmem:[#allocation3 + $0x180] sm:$0xff]   ;;  %v7737_v57 = vld [vmem:[#allocation3 + $0x98] sm:$0xff]   ;;  %v11326_v20 = vshll.u32 %v9273_v41, 16 }
 0x21c   :  { %11318 = vst [vmem:[#allocation33_spill] sm:$0xff] %v9430_v13  ;;  %v3703_v5 = vrot.slane %v11319_v58, 7  ;;  %v3701_v28 = vor.u32 %v3700_v49, %v11321_v2  ;;  %6872 = vmatprep.subr.bf16.mxu0 %v7736_v51  ;;  %v11327_v50 = vshrl.u32 %v9289_v11, 16  ;;  %v11330_v2 = vshll.u32 %v9281_v12, 16 }
 0x21d   :  { %v9437_v9 = vsel %vm1536_vm0, %v3694_v34, %v3698_v36  ;;  %v3706_v30 = vrot.slane %v11322_v55, 7  ;;  %v11324_v34 = vshrl.u32 %v9281_v12, 16  ;;  %6833 = vmatmul.mubr.bf16.gmra.mrb[52].mxu0 %v9220_v8  ;;  %7051 = vmatpush3.bf16.msra.mxu1 %v7732_v42 }
 0x21e   :  { %11320 = vst [vmem:[#allocation38_spill] sm:$0xff] %v9437_v9  ;;  %v3704_v58 = vor.u32 %v3703_v5, %v11323_v25  ;;  %v9453_v55 = vsel %vm1536_vm0, %v3697_v44, %v3701_v28  ;;  %v3712_v13 = vrot.slane %v11327_v50, 7  ;;  %v11328_v25 = vshll.u32 %v9395_v54, 16  ;;  %6836 = vmatprep.mubr.bf16.mxu0 %v9223_v21  ;;  %7092 = vmatprep.subr.bf16.mxu1 %v9443_v59 }
 0x21f   :  { %v3709_v36 = vrot.slane %v11324_v34, 7  ;;  %11325 = vst [vmem:[#allocation37_spill] sm:$0xff] %v9453_v55  ;;  %v3707_v9 = vor.u32 %v3706_v30, %v11326_v20  ;;  %v11331_v44 = vshrl.u32 %v9299_v47, 16  ;;  %v3347_v50 = vshrl.u32 %v9395_v54, 16  ;;  %6873 = vmatpush3.bf16.msra.mxu0 %v7736_v51  ;;  %7013 = vmatmul.mubr.bf16.gmra.mrb[0].mxu1 %v8900_v38 }
 0x220   :  { %v9462_v23 = vrot.slane %v11328_v25, 1  ;;  %v9465_v34 = vsel %vm1536_vm0, %v3700_v49, %v3704_v58  ;;  %v11333_v25 = vshll.u32 %v9289_v11, 16  ;;  %v11334_v49 = vshrl.u32 %v9313_v45, 16  ;;  %6874 = vmatprep.subr.bf16.mxu0 %v7737_v57  ;;  %7016 = vmatprep.mubr.bf16.mxu1 %v8902_v52 }
 0x221   :  { %11329 = vst [vmem:[#allocation45_spill] sm:$0xff] %v9465_v34  ;;  %v3710_v19 = vor.u32 %v3709_v36, %v11330_v2  ;;  %v3715_v28 = vrot.slane %v11331_v44, 7  ;;  %v9474_v20 = vsel %vm1536_vm0, %v3703_v5, %v3707_v9  ;;  %v11336_v44 = vshll.u32 %v9299_v47, 16 }
 0x222   :  { %11332 = vst [vmem:[#allocation29_spill] sm:$0xff] %v9474_v20  ;;  %v3713_v55 = vor.u32 %v3712_v13, %v11333_v25  ;;  %v3718_v58 = vrot.slane %v11334_v49, 7  ;;  %v11337_v21 = vshrl.u32 %v9372_v53, 16  ;;  %v11338_v5 = vshrl.u32 %v9393_v40, 16  ;;  %v7738_v25 = vld [vmem:[#allocation3 + $0xa0] sm:$0xff]  }
 0x223   :  { %v9482_v2 = vsel %vm1536_vm0, %v3706_v30, %v3710_v19  ;;  %v3716_v42 = vor.u32 %v3715_v28, %v11336_v44  ;;  %v11340_v51 = vshll.u32 %v9313_v45, 16  ;;  %v11341_v30 = vshrl.u32 %v9415_v24, 16  ;;  %v9498_v44 = vld [vmem:[#allocation2 + $0xb0] sm:$0xff]  ;;  %6875 = vmatpush3.bf16.msra.mxu0 %v7737_v57 }
 0x224   :  { %11335 = vst [vmem:[#allocation55_spill] sm:$0xff] %v9482_v2  ;;  %v3721_v34 = vrot.slane %v11337_v21, 7  ;;  %v3724_v9 = vrot.slane %v11338_v5, 7  ;;  %v9492_v49 = vsel %vm1536_vm0, %v3709_v36, %v3713_v55  ;;  %v11343_v5 = vshll.u32 %v9372_v53, 16  ;;  %6876 = vmatprep.subr.bf16.mxu0 %v7738_v25 }
 0x225   :  { %11339 = vst [vmem:[#allocation56_spill] sm:$0xff] %v9492_v49  ;;  %v3719_v19 = vor.u32 %v3718_v58, %v11340_v51  ;;  %v3727_v2 = vrot.slane %v11341_v30, 7  ;;  %v9502_v21 = vsel %vm1536_vm0, %v3712_v13, %v3716_v42  ;;  %v11344_v20 = vshll.u32 %v9393_v40, 16  ;;  %6837 = vmatmul.mubr.bf16.gmra.mrb[56].mxu0 %v9226_v56 }
 0x226   :  { %11342 = vst [vmem:[#allocation57_spill] sm:$0xff] %v9502_v21  ;;  %v3722_v8 = vor.u32 %v3721_v34, %v11343_v5  ;;  %v11345_v55 = vshrl.u32 %v9426_v0, 16  ;;  %v9512_v51 = vor.u32 %v3347_v50, %v9462_v23  ;;  %v11346_v38 = vshll.u32 %v9415_v24, 16  ;;  %v4343_v5 = vld [vmem:[#allocation2 + $0x18] sm:$0xff] }
 0x227   :  { %v3725_v36 = vor.u32 %v3724_v9, %v11344_v20  ;;  %v9515_v30 = vsel %vm1536_vm0, %v3715_v28, %v3719_v19  ;;  %v9519_v42 = vrot.slane %v3347_v50, 7  ;;  %v4363_v21 = vld [vmem:[#allocation2 + $0xb8] sm:$0x1]  ;;  %v11347_v52 = vshll.u32 %v9426_v0, 16  ;;  %v7740_v50 = vld [vmem:[#allocation3 + $0xa8] sm:$0xff]   ;;  %6877 = vmatpush3.bf16.msra.mxu0 %v7738_v25  ;;  %7017 = vmatmul.mubr.bf16.gmra.mrb[4].mxu1 %v8909_v18 }
 0x228   :  { %v3730_v49 = vrot.slane %v11345_v55, 7  ;;  %v3728_v13 = vor.u32 %v3727_v2, %v11346_v38  ;;  %v9522_v20 = vsel %vm1536_vm0, %v3718_v58, %v3722_v8  ;;  %v11077_v28 = vshll.u32 %v9498_v44, 16  ;;  %6878 = vmatprep.subr.bf16.mxu0 %v7740_v50  ;;  %7020 = vmatprep.mubr.bf16.mxu1 %v8911_v33  ;;  %v9586_v33 = vld [vmem:[#allocation3 + $0xc0] sm:$0xff]  }
 0x229   :  { %v9525_v55 = vsel %vm1536_vm0, %v3721_v34, %v3725_v36  ;;  %v9533_v19 = vsel %vm1536_vm0, %v9158_v16, %v9197_v10  ;;  %v11348_v8 = vshll.u32 %v9395_v54, 16  ;;  %v11079_v58 = vshrl.u32 %v9498_v44, 16  ;;  %v7741_v54 = vld [vmem:[#allocation3 + $0xb0] sm:$0xff]  }
 0x22a   :  { %v3731_v48 = vor.u32 %v3730_v49, %v11347_v52  ;;  %v9536_v57 = vsel %vm1536_vm0, %v3724_v9, %v3728_v13  ;;  %v4384_v38 = vshll.u32 %v4343_v5, 16  ;;  %v4535_v16 = vrot.slane %v11077_v28, 1  ;;  %6840 = vmatprep.mubr.bf16.mxu0 %v9533_v19 }
 0x22b   :  { %v3734_v34 = vor.u32 %v9519_v42, %v11348_v8  ;;  %v4541_v10 = vshll.u32 %v4363_v21, 16  ;;  %v4382_v13 = vshrl.u32 %v4343_v5, 16  ;;  %v11350_v28 = vshll.u32 %v8894_v1, 16  ;;  %6879 = vmatpush3.bf16.msra.mxu0 %v7740_v50 }
 0x22c   :  { %v9544_v36 = vsel %vm1536_vm0, %v3727_v2, %v3731_v48  ;;  %v4386_v52 = vrot.slane %v4384_v38, 1  ;;  %v9554_v8 = vsel %vm2000_vm1, %v9512_v51, %v4535_v16  ;;  %v4539_v48 = vor.u32 %v4535_v16, %v11079_v58  ;;  %6880 = vmatprep.subr.bf16.mxu0 %v7741_v54  ;;  %v1962_v16 = vld [vmem:[#allocation2 + $0x8] sm:$0xff] }
 0x22d   :  { %v9550_v9 = vsel %vm1536_vm0, %v3730_v49, %v3734_v34  ;;  %11349 = vst [vmem:[#allocation58_spill] sm:$0xff] %v9554_v8  ;;  %v4543_v2 = vrot.slane %v4541_v10, 1  ;;  %v1603_v21 = vor.u32 %v11350_v28, %v9204_v3  ;;  %v11351_v49 = vshll.u32 %v8896_v7, 16  ;;  %v11357_v28 = vld [vmem:[#allocation39_spill] sm:$0xff] }
 0x22e   :  { %v11352_v25 = vshll.u32 %v9187_v37, 16  ;;  %v4387_v38 = vor.u32 %v4386_v52, %v4382_v13  ;;  %v7739_v52 = vld [vmem:[#allocation3 + $0x188] sm:$0xff]  }
 0x22f   :  { %v1611_v5 = vor.u32 %v8958_v63, %v11351_v49  ;;  %v9568_v8 = vsel %vm2000_vm1, %v4539_v48, %v4543_v2  ;;  %v9576_v7 = vsel %vm1536_vm0, %v9169_v17, %v1603_v21  ;;  %v7743_v63 = vld [vmem:[#allocation3 + $0xb8] sm:$0xff]   ;;  %6881 = vmatpush3.bf16.msra.mxu0 %v7741_v54  ;;  %7021 = vmatmul.mubr.bf16.gmra.mrb[8].mxu1 %v8913_v29  ;;  %v3153_v17 = vld [vmem:[#allocation2 + $0x10] sm:$0xff]  ;;  %v11362_v21 = vshll.u32 %v9228_v62, 16 }
 0x230   :  { %v3209_v34 = vrot.slane %v11352_v25, 1  ;;  %6841 = vmatmul.mubr.bf16.gmra.mrb[60].mxu0 %v9576_v7  ;;  %6882 = vmatprep.subr.bf16.mxu0 %v7743_v63  ;;  %v11355_v54 = vld [vmem:[#allocation36_spill] sm:$0xff]  ;;  %v7742_v25 = vld [vmem:[#allocation3 + $0x190] sm:$0xff]  }
 0x231   :  { %v9581_v18 = vsel %vm1536_vm0, %v9204_v3, %v1611_v5  ;;  %7024 = vmatprep.mubr.bf16.mxu1 %v8915_v6  ;;  %v3194_v3 = vshll.u32 %v3153_v17, 16  ;;  %v3192_v6 = vshrl.u32 %v3153_v17, 16  ;;  %v3225_v49 = vrot.slane %v11362_v21, 1  ;;  %v11364_v17 = vld [vmem:[#allocation42_spill] sm:$0xff] }
 0x232   :  { %v9572_v1 = vsel %vm2000_vm1, %v4387_v38, %v3209_v34  ;;  %6844 = vmatprep.mubr.bf16.mxu0 %v9581_v18  ;;  %v2004_v5 = vshll.u32 %v1962_v16, 16 }
 0x233   :  { %6883 = vmatpush3.bf16.msra.mxu0 %v7743_v63  ;;  %v3196_v29 = vrot.slane %v3194_v3, 1 }
 0x234   :  { %6924 = vmatprep.subr.bf16.mxu0 %v9586_v33 }
 0x237   :  { %7025 = vmatmul.mubr.bf16.gmra.mrb[12].mxu1 %v8922_v4  ;;  %v11353_v4 = vld [vmem:[#allocation53_spill] sm:$0xff] }
 0x238   :  { %6845 = vmatmul.mubr.bf16.gmra.mrb[64].mxu0 %v8969_v22  ;;  %7028 = vmatprep.mubr.bf16.mxu1 %v8924_v39  ;;  %v3197_v22 = vor.u32 %v3196_v29, %v3192_v6  ;;  %v2006_v29 = vrot.slane %v2004_v5, 1  ;;  %v11366_v6 = vld [vmem:[#allocation44_spill] sm:$0xff] }
 0x239   :  { %6848 = vmatprep.mubr.bf16.mxu0 %v8977_v43  ;;  %v11354_v43 = vshll.u32 %v11353_v4, 16 }
 0x23b   :  { %v3201_v39 = vrot.slane %v11354_v43, 1 }
 0x23f   :  { %7029 = vmatmul.mubr.bf16.gmra.mrb[16].mxu1 %v8926_v32 }
 0x240   :  { %6849 = vmatmul.mubr.bf16.gmra.mrb[68].mxu0 %v8989_v14  ;;  %7032 = vmatprep.mubr.bf16.mxu1 %v8928_v46  ;;  %v3202_v14 = vsel %vm2000_vm1, %v3197_v22, %v3201_v39  ;;  %v11358_v46 = vshrl.u32 %v9187_v37, 16  ;;  %v11367_v22 = vld [vmem:[#allocation11_spill] sm:$0xff] }
 0x241   :  { %6852 = vmatprep.mubr.bf16.mxu0 %v9009_v26  ;;  %v11356_v26 = vshrl.u32 %v11353_v4, 16  ;;  %v11368_v43 = vshll.u32 %v11367_v22, 16 }
 0x242   :  { %v3213_v50 = vor.u32 %v11358_v46, %v3209_v34 }
 0x243   :  { %v3205_v32 = vor.u32 %v11356_v26, %v3201_v39  ;;  %v3233_v39 = vrot.slane %v11368_v43, 1  ;;  %v11377_v43 = vld [vmem:[#allocation47_spill] sm:$0xff] }
 0x245   :  { %v3210_v48 = vsel %vm2000_vm1, %v3205_v32, %v3209_v34  ;;  %v11365_v34 = vshrl.u32 %v9228_v62, 16  ;;  %v11369_v32 = vshll.u32 %v9243_v15, 16 }
 0x247   :  { %7033 = vmatmul.mubr.bf16.gmra.mrb[20].mxu1 %v11355_v54  ;;  %v3229_v3 = vor.u32 %v11365_v34, %v3225_v49  ;;  %v7744_v54 = vld [vmem:[#allocation3 + $0x198] sm:$0xff]  }
 0x248   :  { %6853 = vmatmul.mubr.bf16.gmra.mrb[72].mxu0 %v9018_v61  ;;  %7052 = vmatprep.mubr.bf16.mxu1 %v3202_v14  ;;  %v11359_v61 = vld [vmem:[#allocation41_spill] sm:$0xff] }
 0x249   :  { %6856 = vmatprep.mubr.bf16.mxu0 %v9056_v60  ;;  %v11360_v60 = vld [vmem:[#allocation14_spill] sm:$0xff]  ;;  %v9632_v26 = vsel %vm2000_vm1, %v3229_v3, %v3233_v39  ;;  %v7747_v3 = vld [vmem:[#allocation3 + $0x1b0] sm:$0xff]  }
 0x24a   :  { %v11361_v10 = vshll.u32 %v11360_v60, 16  ;;  %v11363_v38 = vshrl.u32 %v11360_v60, 16 }
 0x24c   :  { %v3217_v13 = vrot.slane %v11361_v10, 1  ;;  %v11371_v10 = vld [vmem:[#allocation43_spill] sm:$0xff] }
 0x24e   :  { %v9613_v2 = vsel %vm2000_vm1, %v3213_v50, %v3217_v13  ;;  %v3221_v63 = vor.u32 %v11363_v38, %v3217_v13  ;;  %v7745_v50 = vld [vmem:[#allocation3 + $0x1a0] sm:$0xff]   ;;  %v11372_v13 = vshrl.u32 %v9243_v15, 16 }
 0x24f   :  { %7053 = vmatmul.mubr.bf16.vlgmr.msra.gmra.mrb[24].mxu1 %v3210_v48  ;;  %v11373_v48 = vld [vmem:[#allocation35_spill] sm:$0xff] }
 0x250   :  { %6857 = vmatmul.mubr.bf16.gmra.mrb[76].mxu0 %v11357_v28  ;;  %7093 = vmatpush3.bf16.msra.mxu1 %v9443_v59  ;;  %v2002_v59 = vshrl.u32 %v1962_v16, 16  ;;  %v9628_v14 = vsel %vm2000_vm1, %v3221_v63, %v3225_v49  ;;  %v3241_v28 = vrot.slane %v11369_v32, 1  ;;  %v11374_v49 = vshll.u32 %v9254_v27, 16 }
 0x251   :  { %6860 = vmatprep.mubr.bf16.mxu0 %v11359_v61  ;;  %7056 = vmatprep.mubr.bf16.mxu1 %v9613_v2  ;;  %v11370_v61 = vshrl.u32 %v11367_v22, 16  ;;  %v11380_v32 = vshll.u32 %v9271_v31, 16 }
 0x252   :  { %7094 = vmatprep.subr.bf16.mxu1 %v7739_v52  ;;  %v2007_v46 = vor.u32 %v2006_v29, %v2002_v59  ;;  %v3249_v5 = vrot.slane %v11374_v49, 1  ;;  %v11376_v29 = vshrl.u32 %v9254_v27, 16  ;;  %v11383_v49 = vld [vmem:[#allocation49_spill] sm:$0xff] }
 0x253   :  { %v3237_v16 = vor.u32 %v11370_v61, %v3233_v39  ;;  %v11378_v39 = vshrl.u32 %v9259_v35, 16  ;;  %v7780_v61 = vld [vmem:[#allocation3 + $0xc8] sm:$0xff]  }
 0x254   :  { %7095 = vmatpush3.bf16.msra.mxu1 %v7739_v52  ;;  %v3245_v52 = vor.u32 %v11372_v13, %v3241_v28  ;;  %v2012_v21 = vsel %vm2000_vm1, %v2007_v46, %v11373_v48  ;;  %v7748_v46 = vld [vmem:[#allocation3 + $0x1b8] sm:$0xff]  }
 0x255   :  { %7096 = vmatprep.subr.bf16.mxu1 %v7742_v25  ;;  %v9647_v38 = vsel %vm2000_vm1, %v3237_v16, %v3241_v28  ;;  %v3265_v28 = vrot.slane %v11380_v32, 1 }
 0x256   :  { %v9651_v63 = vsel %vm2000_vm1, %v3245_v52, %v3249_v5  ;;  %v9675_v52 = vld [vmem:[#allocation3 + $0x1c0] sm:$0xff]  }
 0x257   :  { %7057 = vmatmul.mubr.bf16.gmra.mrb[28].mxu1 %v9628_v14 }
 0x258   :  { %6861 = vmatmul.mubr.bf16.gmra.mrb[80].mxu0 %v11364_v17  ;;  %7060 = vmatprep.mubr.bf16.mxu1 %v9632_v26  ;;  %v11375_v17 = vshll.u32 %v9259_v35, 16 }
 0x259   :  { %6864 = vmatprep.mubr.bf16.mxu0 %v11366_v6  ;;  %7097 = vmatpush3.bf16.msra.mxu1 %v7742_v25  ;;  %v7746_v25 = vld [vmem:[#allocation3 + $0x1a8] sm:$0xff]   ;;  %v3253_v6 = vor.u32 %v11376_v29, %v3249_v5  ;;  %v11384_v5 = vshrl.u32 %v9273_v41, 16 }
 0x25a   :  { %7098 = vmatprep.subr.bf16.mxu1 %v7744_v54  ;;  %v3257_v34 = vrot.slane %v11375_v17, 1  ;;  %v11385_v17 = vld [vmem:[#allocation48_spill] sm:$0xff] }
 0x25c   :  { %v3261_v59 = vor.u32 %v11378_v39, %v3257_v34  ;;  %v11387_v39 = vshll.u32 %v9289_v11, 16 }
 0x25d   :  { %7099 = vmatpush3.bf16.msra.mxu1 %v7744_v54  ;;  %v11379_v54 = vld [vmem:[#allocation46_spill] sm:$0xff] }
 0x25e   :  { %7100 = vmatprep.subr.bf16.mxu1 %v7745_v50  ;;  %v9670_v16 = vsel %vm2000_vm1, %v3261_v59, %v3265_v28  ;;  %v3289_v59 = vrot.slane %v11387_v39, 1  ;;  %v11396_v39 = vld [vmem:[#allocation40_spill] sm:$0xff] }
 0x25f   :  { %7061 = vmatmul.mubr.bf16.gmra.mrb[32].mxu1 %v9647_v38 }
 0x260   :  { %6865 = vmatmul.mubr.bf16.gmra.mrb[84].mxu0 %v11371_v10  ;;  %7064 = vmatprep.mubr.bf16.mxu1 %v9651_v63  ;;  %v11381_v10 = vshll.u32 %v9273_v41, 16 }
 0x261   :  { %6884 = vmatprep.mubr.bf16.mxu0 %v2012_v21  ;;  %7101 = vmatpush3.bf16.msra.mxu1 %v7745_v50  ;;  %v9666_v50 = vsel %vm2000_vm1, %v3253_v6, %v3257_v34  ;;  %v7781_v21 = vld [vmem:[#allocation3 + $0xd0] sm:$0xff]   ;;  %v11386_v34 = vshll.u32 %v9281_v12, 16  ;;  %v7782_v6 = vld [vmem:[#allocation3 + $0xd8] sm:$0xff]  }
 0x262   :  { %7102 = vmatprep.subr.bf16.mxu1 %v7746_v25  ;;  %v3273_v13 = vrot.slane %v11381_v10, 1 }
 0x265   :  { %7103 = vmatpush3.bf16.msra.mxu1 %v7746_v25  ;;  %v3277_v25 = vor.u32 %v11384_v5, %v3273_v13 }
 0x266   :  { %7104 = vmatprep.subr.bf16.mxu1 %v7747_v3 }
 0x267   :  { %7065 = vmatmul.mubr.bf16.gmra.mrb[36].mxu1 %v9666_v50 }
 0x268   :  { %6885 = vmatmul.mubr.bf16.vlgmr.msra.gmra.mrb[48].mxu0 %v11377_v43  ;;  %7068 = vmatprep.mubr.bf16.mxu1 %v9670_v16 }
 0x269   :  { %6888 = vmatprep.mubr.bf16.mxu0 %v11379_v54  ;;  %6925 = vmatpush3.bf16.msra.mxu0 %v9586_v33  ;;  %v11382_v33 = vshrl.u32 %v9271_v31, 16  ;;  %v11388_v54 = vshrl.u32 %v9281_v12, 16 }
 0x26a   :  { %6926 = vmatprep.subr.bf16.mxu0 %v7780_v61  ;;  %7105 = vmatpush3.bf16.msra.mxu1 %v7747_v3  ;;  %v3281_v3 = vrot.slane %v11386_v34, 1  ;;  %v11394_v34 = vshrl.u32 %v9299_v47, 16 }
 0x26b   :  { %7106 = vmatprep.subr.bf16.mxu1 %v7748_v46  ;;  %v3269_v48 = vor.u32 %v11382_v33, %v3265_v28  ;;  %v7783_v28 = vld [vmem:[#allocation3 + $0xe0] sm:$0xff]   ;;  %v11392_v33 = vshll.u32 %v9299_v47, 16 }
 0x26c   :  { %v9691_v43 = vsel %vm2000_vm1, %v3277_v25, %v3281_v3  ;;  %v3285_v32 = vor.u32 %v11388_v54, %v3281_v3  ;;  %v11393_v25 = vshll.u32 %v9313_v45, 16  ;;  %v7785_v54 = vld [vmem:[#allocation3 + $0xf0] sm:$0xff]  }
 0x26d   :  { %6927 = vmatpush3.bf16.msra.mxu0 %v7780_v61  ;;  %v9687_v29 = vsel %vm2000_vm1, %v3269_v48, %v3273_v13  ;;  %v11390_v61 = vshrl.u32 %v9289_v11, 16  ;;  %v11391_v13 = vld [vmem:[#allocation50_spill] sm:$0xff]  ;;  %v3297_v48 = vrot.slane %v11392_v33, 1  ;;  %v7786_v33 = vld [vmem:[#allocation3 + $0xf8] sm:$0xff]  }
 0x26e   :  { %6928 = vmatprep.subr.bf16.mxu0 %v7781_v21  ;;  %7107 = vmatpush3.bf16.msra.mxu1 %v7748_v46  ;;  %v11389_v46 = vld [vmem:[#allocation51_spill] sm:$0xff] }
 0x26f   :  { %7148 = vmatprep.subr.bf16.mxu1 %v9675_v52  ;;  %7069 = vmatmul.mubr.bf16.gmra.mrb[0].mxu1 %v9687_v29  ;;  %v3293_v10 = vor.u32 %v11390_v61, %v3289_v59  ;;  %v3301_v3 = vor.u32 %v11394_v34, %v3297_v48  ;;  %v11399_v61 = vshll.u32 %v9372_v53, 16  ;;  %v11401_v34 = vshrl.u32 %v9372_v53, 16 }
 0x270   :  { %6889 = vmatmul.mubr.bf16.gmra.mrb[52].mxu0 %v11383_v49  ;;  %7072 = vmatprep.mubr.bf16.mxu1 %v9691_v43  ;;  %v7784_v49 = vld [vmem:[#allocation3 + $0xe8] sm:$0xff]  }
 0x271   :  { %6892 = vmatprep.mubr.bf16.mxu0 %v11385_v17  ;;  %6929 = vmatpush3.bf16.msra.mxu0 %v7781_v21  ;;  %v9705_v21 = vsel %vm2000_vm1, %v3285_v32, %v3289_v59  ;;  %v9709_v5 = vsel %vm2000_vm1, %v3293_v10, %v3297_v48  ;;  %v3305_v17 = vrot.slane %v11393_v25, 1  ;;  %v11397_v32 = vshrl.u32 %v9313_v45, 16 }
 0x272   :  { %6930 = vmatprep.subr.bf16.mxu0 %v7782_v6  ;;  %v3313_v10 = vrot.slane %v11399_v61, 1  ;;  %v11406_v61 = vshll.u32 %v9426_v0, 16 }
 0x275   :  { %6931 = vmatpush3.bf16.msra.mxu0 %v7782_v6  ;;  %v11395_v6 = vld [vmem:[#allocation54_spill] sm:$0xff] }
 0x276   :  { %6932 = vmatprep.subr.bf16.mxu0 %v7783_v28  ;;  %v2068_v59 = vsel %vm2000_vm1, %v11396_v39, %v11395_v6  ;;  %v3317_v6 = vor.u32 %v11401_v34, %v3313_v10  ;;  %v11402_v39 = vld [vmem:[#allocation16_spill] sm:$0xff]  ;;  %v11408_v34 = vld [vmem:[#allocation18_spill] sm:$0xff] }
 0x277   :  { %7073 = vmatmul.mubr.bf16.gmra.mrb[4].mxu1 %v9705_v21 }
 0x278   :  { %6893 = vmatmul.mubr.bf16.gmra.mrb[56].mxu0 %v11389_v46  ;;  %7076 = vmatprep.mubr.bf16.mxu1 %v9709_v5  ;;  %v11398_v46 = vld [vmem:[#allocation9_spill] sm:$0xff] }
 0x279   :  { %6896 = vmatprep.mubr.bf16.mxu0 %v11391_v13  ;;  %6933 = vmatpush3.bf16.msra.mxu0 %v7783_v28  ;;  %v3309_v28 = vor.u32 %v11397_v32, %v3305_v17  ;;  %v9725_v13 = vsel %vm2000_vm1, %v3301_v3, %v3305_v17  ;;  %v11403_v17 = vshrl.u32 %v9393_v40, 16 }
 0x27a   :  { %6934 = vmatprep.subr.bf16.mxu0 %v7784_v49 }
 0x27b   :  { %v9729_v48 = vsel %vm2000_vm1, %v3309_v28, %v3313_v10  ;;  %v3337_v10 = vrot.slane %v11406_v61, 1 }
 0x27d   :  { %6935 = vmatpush3.bf16.msra.mxu0 %v7784_v49  ;;  %v11400_v49 = vshll.u32 %v9393_v40, 16 }
 0x27e   :  { %6936 = vmatprep.subr.bf16.mxu0 %v7785_v54 }
 0x27f   :  { %7077 = vmatmul.mubr.bf16.gmra.mrb[8].mxu1 %v9725_v13  ;;  %v3321_v25 = vrot.slane %v11400_v49, 1 }
 0x280   :  { %6897 = vmatmul.mubr.bf16.gmra.mrb[60].mxu0 %v2068_v59  ;;  %7080 = vmatprep.mubr.bf16.mxu1 %v9729_v48  ;;  %v11404_v59 = vld [vmem:[#allocation15_spill] sm:$0xff] }
 0x281   :  { %6900 = vmatprep.mubr.bf16.mxu0 %v11398_v46  ;;  %6937 = vmatpush3.bf16.msra.mxu0 %v7785_v54  ;;  %v3325_v3 = vor.u32 %v11403_v17, %v3321_v25  ;;  %v11405_v54 = vshll.u32 %v9415_v24, 16  ;;  %v9743_v28 = vsel %vm2000_vm1, %v3317_v6, %v3321_v25  ;;  %v11410_v25 = vld [vmem:[#allocation17_spill] sm:$0xff]  ;;  %v3173_v6 = vld [vmem:[#allocation2 + $0xb0] sm:$0x1] }
 0x282   :  { %6938 = vmatprep.subr.bf16.mxu0 %v7786_v33 }
 0x283   :  { %v3329_v32 = vrot.slane %v11405_v54, 1 }
 0x285   :  { %6939 = vmatpush3.bf16.msra.mxu0 %v7786_v33  ;;  %v9747_v46 = vsel %vm2000_vm1, %v3325_v3, %v3329_v32  ;;  %v11407_v33 = vshrl.u32 %v9415_v24, 16  ;;  %v3656_v3 = vld [vmem:[#allocation2 + $0x10] sm:$0x80] }
 0x286   :  { %v3676_v61 = vshrl.u32 %v3656_v3, 16  ;;  %v11416_v3 = vld [vmem:[#allocation21_spill] sm:$0xff] }
 0x287   :  { %7081 = vmatmul.mubr.bf16.gmra.mrb[12].mxu1 %v9743_v28  ;;  %v3333_v49 = vor.u32 %v11407_v33, %v3329_v32  ;;  %v3351_v32 = vshll.u32 %v3173_v6, 16  ;;  %v11411_v33 = vld [vmem:[#allocation20_spill] sm:$0xff]  ;;  %v7750_v6 = vld [vmem:[#allocation3 + $0x1c8] sm:$0xff]  }
 0x288   :  { %6901 = vmatmul.mubr.bf16.gmra.mrb[64].mxu0 %v11402_v39  ;;  %7084 = vmatprep.mubr.bf16.mxu1 %v9747_v46  ;;  %v11409_v39 = vshrl.u32 %v9426_v0, 16 }
 0x289   :  { %6904 = vmatprep.mubr.bf16.mxu0 %v11404_v59  ;;  %v9759_v59 = vsel %vm2000_vm1, %v3333_v49, %v3337_v10  ;;  %v11413_v49 = vld [vmem:[#allocation19_spill] sm:$0xff] }
 0x28a   :  { %v3341_v17 = vor.u32 %v11409_v39, %v3337_v10  ;;  %v11412_v39 = vld [vmem:[#allocation22_spill] sm:$0xff] }
 0x28c   :  { %v9764_v54 = vsel %vm2000_vm1, %v3341_v17, %v9462_v23  ;;  %v11414_v23 = vld [vmem:[#allocation24_spill] sm:$0xff]  ;;  %v11415_v17 = vld [vmem:[#allocation23_spill] sm:$0xff] }
 0x28f   :  { %7085 = vmatmul.mubr.bf16.gmra.mrb[16].mxu1 %v9759_v59 }
 0x290   :  { %6905 = vmatmul.mubr.bf16.gmra.mrb[68].mxu0 %v11408_v34  ;;  %7088 = vmatprep.mubr.bf16.mxu1 %v9764_v54  ;;  %v3353_v34 = vrot.slane %v3351_v32, 1  ;;  %v11417_v32 = vld [vmem:[#allocation26_spill] sm:$0xff] }
 0x291   :  { %6908 = vmatprep.mubr.bf16.mxu0 %v11410_v25  ;;  %v3678_v25 = vrot.slane %v3676_v61, 7  ;;  %v2466_v61 = vld [vmem:[#allocation2 + $0x8] sm:$0x80] }
 0x292   :  { %v3354_v10 = vsel %vm2000_vm1, %v9512_v51, %v3353_v34  ;;  %v11418_v51 = vld [vmem:[#allocation25_spill] sm:$0xff]  ;;  %v2486_v34 = vshrl.u32 %v2466_v61, 16  ;;  %v11425_v61 = vld [vmem:[#allocation38_spill] sm:$0xff] }
 0x293   :  { %v3681_v58 = vsel %vm1536_vm0, %v3678_v25, %v11413_v49  ;;  %v11420_v25 = vld [vmem:[#allocation27_spill] sm:$0xff] }
 0x294   :  { %v11421_v49 = vld [vmem:[#allocation31_spill] sm:$0xff] }
 0x297   :  { %7089 = vmatmul.mubr.bf16.gmra.mrb[20].mxu1 %v3354_v10  ;;  %v2488_v10 = vrot.slane %v2486_v34, 7  ;;  %v11426_v34 = vld [vmem:[#allocation13_spill] sm:$0xff] }
 0x298   :  { %6909 = vmatmul.mubr.bf16.gmra.mrb[72].mxu0 %v11411_v33  ;;  %7108 = vmatprep.mubr.bf16.mxu1 %v3681_v58  ;;  %v7751_v33 = vld [vmem:[#allocation3 + $0x1d0] sm:$0xff]   ;;  %v7752_v58 = vld [vmem:[#allocation3 + $0x1d8] sm:$0xff]  }
 0x299   :  { %6912 = vmatprep.mubr.bf16.mxu0 %v11412_v39  ;;  %v11419_v39 = vld [vmem:[#allocation30_spill] sm:$0xff] }
 0x29f   :  { %7109 = vmatmul.mubr.bf16.vlgmr.msra.gmra.mrb[24].mxu1 %v11416_v3 }
 0x2a0   :  { %6913 = vmatmul.mubr.bf16.gmra.mrb[76].mxu0 %v11414_v23  ;;  %7149 = vmatpush3.bf16.msra.mxu1 %v9675_v52  ;;  %v7753_v52 = vld [vmem:[#allocation3 + $0x1e0] sm:$0xff]  }
 0x2a1   :  { %6916 = vmatprep.mubr.bf16.mxu0 %v11415_v17  ;;  %7112 = vmatprep.mubr.bf16.mxu1 %v11417_v32  ;;  %v11422_v23 = vld [vmem:[#allocation33_spill] sm:$0xff]  ;;  %v11423_v17 = vld [vmem:[#allocation32_spill] sm:$0xff]  ;;  %v7754_v32 = vld [vmem:[#allocation3 + $0x1e8] sm:$0xff]  }
 0x2a2   :  { %7150 = vmatprep.subr.bf16.mxu1 %v7750_v6  ;;  %v2491_v3 = vsel %vm1536_vm0, %v2488_v10, %v11423_v17  ;;  %v11429_v10 = vld [vmem:[#allocation45_spill] sm:$0xff]  ;;  %v11433_v17 = vld [vmem:[#allocation56_spill] sm:$0xff] }
 0x2a4   :  { %7151 = vmatpush3.bf16.msra.mxu1 %v7750_v6  ;;  %v11424_v6 = vld [vmem:[#allocation34_spill] sm:$0xff] }
 0x2a5   :  { %7152 = vmatprep.subr.bf16.mxu1 %v7751_v33 }
 0x2a7   :  { %7113 = vmatmul.mubr.bf16.gmra.mrb[28].mxu1 %v11420_v25  ;;  %v11428_v25 = vld [vmem:[#allocation37_spill] sm:$0xff] }
 0x2a8   :  { %6917 = vmatmul.mubr.bf16.gmra.mrb[80].mxu0 %v11418_v51  ;;  %7116 = vmatprep.mubr.bf16.mxu1 %v11421_v49  ;;  %v7755_v51 = vld [vmem:[#allocation3 + $0x1f0] sm:$0xff]   ;;  %v11430_v49 = vld [vmem:[#allocation12_spill] sm:$0xff] }
 0x2a9   :  { %6920 = vmatprep.mubr.bf16.mxu0 %v11419_v39  ;;  %7153 = vmatpush3.bf16.msra.mxu1 %v7751_v33  ;;  %v11427_v33 = vld [vmem:[#allocation10_spill] sm:$0xff]  ;;  %v7756_v39 = vld [vmem:[#allocation3 + $0x1f8] sm:$0xff]  }
 0x2aa   :  { %7154 = vmatprep.subr.bf16.mxu1 %v7752_v58 }
 0x2ad   :  { %7155 = vmatpush3.bf16.msra.mxu1 %v7752_v58  ;;  %v7757_v58 = vld [vmem:[#allocation3 + $0x200] sm:$0xff]  }
 0x2ae   :  { %7156 = vmatprep.subr.bf16.mxu1 %v7753_v52 }
 0x2af   :  { %7117 = vmatmul.mubr.bf16.gmra.mrb[32].mxu1 %v11424_v6 }
 0x2b0   :  { %6921 = vmatmul.mubr.bf16.gmra.mrb[84].mxu0 %v11422_v23  ;;  %7120 = vmatprep.mubr.bf16.mxu1 %v11425_v61  ;;  %v11432_v23 = vld [vmem:[#allocation55_spill] sm:$0xff] }
 0x2b1   :  { %6940 = vmatprep.mubr.bf16.mxu0 %v2491_v3  ;;  %7157 = vmatpush3.bf16.msra.mxu1 %v7753_v52  ;;  %v11431_v52 = vld [vmem:[#allocation29_spill] sm:$0xff] }
 0x2b2   :  { %7158 = vmatprep.subr.bf16.mxu1 %v7754_v32  ;;  %v11434_v3 = vld [vmem:[#allocation57_spill] sm:$0xff] }
 0x2b5   :  { %7159 = vmatpush3.bf16.msra.mxu1 %v7754_v32 }
 0x2b6   :  { %7160 = vmatprep.subr.bf16.mxu1 %v7755_v51 }
 0x2b7   :  { %7121 = vmatmul.mubr.bf16.gmra.mrb[36].mxu1 %v11428_v25 }
 0x2b8   :  { %6941 = vmatmul.mubr.bf16.vlgmr.msra.gmra.mrb[48].mxu0 %v11426_v34  ;;  %7124 = vmatprep.mubr.bf16.mxu1 %v11429_v10 }
 0x2b9   :  { %6944 = vmatprep.mubr.bf16.mxu0 %v11427_v33  ;;  %7161 = vmatpush3.bf16.msra.mxu1 %v7755_v51  ;;  %v9916_v33 = vpop.permute.xlu0 %4888 }
 0x2ba   :  { %7162 = vmatprep.subr.bf16.mxu1 %v7756_v39  ;;  %11446 = vst [vmem:[#allocation11_spill] sm:$0xff] %v9916_v33 }
 0x2bd   :  { %7163 = vmatpush3.bf16.msra.mxu1 %v7756_v39  ;;  %v9918_v39 = vpop.permute.xlu1 %4893  ;;  %v9920_v25 = vpop.permute.xlu0 %4898 }
 0x2be   :  { %7204 = vmatprep.subr.bf16.mxu1 %v7757_v58  ;;  %11447 = vst [vmem:[#allocation43_spill] sm:$0xff] %v9918_v39  ;;  %11448 = vst [vmem:[#allocation35_spill] sm:$0xff] %v9920_v25 }
 0x2bf   :  { %7125 = vmatmul.mubr.bf16.gmra.mrb[0].mxu1 %v11431_v52 }
 0x2c0   :  { %6945 = vmatmul.mubr.bf16.gmra.mrb[52].mxu0 %v11430_v49  ;;  %7128 = vmatprep.mubr.bf16.mxu1 %v11432_v23 }
 0x2c1   :  { %6948 = vmatprep.mubr.bf16.mxu0 %v9226_v56  ;;  %v11435_v56 = vshrl.u32 %v9498_v44, 16  ;;  %v9922_v10 = vpop.permute.xlu1 %4903 }
 0x2c2   :  { %11449 = vst [vmem:[#allocation47_spill] sm:$0xff] %v9922_v10 }
 0x2c3   :  { %v3739_v32 = vrot.slane %v11435_v56, 7 }
 0x2c5   :  { %v9926_v49 = vpop.permute.xlu1 %4913 }
 0x2c6   :  { %11450 = vst [vmem:[#allocation46_spill] sm:$0xff] %v9926_v49 }
 0x2c7   :  { %7129 = vmatmul.mubr.bf16.gmra.mrb[4].mxu1 %v11433_v17 }
 0x2c8   :  { %6949 = vmatmul.mubr.bf16.gmra.mrb[56].mxu0 %v9533_v19  ;;  %7132 = vmatprep.mubr.bf16.mxu1 %v11434_v3  ;;  %v11436_v19 = vshll.u32 %v9498_v44, 16 }
 0x2c9   :  { %6952 = vmatprep.mubr.bf16.mxu0 %v9576_v7  ;;  %v9930_v23 = vpop.permute.xlu1 %4923 }
 0x2ca   :  { %v3742_v7 = vor.u32 %v11436_v19, %v3739_v32  ;;  %11451 = vst [vmem:[#allocation49_spill] sm:$0xff] %v9930_v23 }
 0x2cd   :  { %v9934_v3 = vpop.permute.xlu1 %4933 }
 0x2ce   :  { %11453 = vst [vmem:[#allocation51_spill] sm:$0xff] %v9934_v3 }
 0x2cf   :  { %7133 = vmatmul.mubr.bf16.gmra.mrb[8].mxu1 %v9515_v30  ;;  %v7758_v30 = vld [vmem:[#allocation3 + $0x208] sm:$0xff]  }
 0x2d0   :  { %6953 = vmatmul.mubr.bf16.gmra.mrb[60].mxu0 %v9581_v18  ;;  %7136 = vmatprep.mubr.bf16.mxu1 %v9522_v20  ;;  %v3743_v18 = vsel %vm1536_vm0, %v9519_v42, %v3742_v7  ;;  %v7759_v20 = vld [vmem:[#allocation3 + $0x210] sm:$0xff]   ;;  %v7761_v42 = vld [vmem:[#allocation3 + $0x220] sm:$0xff]  }
 0x2d1   :  { %v9938_v32 = vpop.permute.xlu1 %4943 }
 0x2d2   :  { %11455 = vst [vmem:[#allocation54_spill] sm:$0xff] %v9938_v32 }
 0x2d7   :  { %7137 = vmatmul.mubr.bf16.gmra.mrb[12].mxu1 %v9525_v55  ;;  %v7760_v55 = vld [vmem:[#allocation3 + $0x218] sm:$0xff]  }
 0x2d8   :  { %7140 = vmatprep.mubr.bf16.mxu1 %v9536_v57  ;;  %v7762_v57 = vld [vmem:[#allocation3 + $0x228] sm:$0xff]  }
 0x2df   :  { %7141 = vmatmul.mubr.bf16.gmra.mrb[16].mxu1 %v9544_v36  ;;  %v7764_v36 = vld [vmem:[#allocation3 + $0x238] sm:$0xff]  }
 0x2e0   :  { %7144 = vmatprep.mubr.bf16.mxu1 %v9550_v9 }
 0x2e7   :  { %7145 = vmatmul.mubr.bf16.gmra.mrb[20].mxu1 %v3743_v18  ;;  %v9942_v18 = vpop.permute.xlu1 %4953 }
 0x2e8   :  { %7164 = vmatprep.mubr.bf16.mxu1 %v11353_v4  ;;  %11457 = vst [vmem:[#allocation9_spill] sm:$0xff] %v9942_v18 }
 0x2ef   :  { %7165 = vmatmul.mubr.bf16.vlgmr.msra.gmra.mrb[24].mxu1 %v9187_v37  ;;  %v7763_v37 = vld [vmem:[#allocation3 + $0x230] sm:$0xff]  }
 0x2f0   :  { %7205 = vmatpush3.bf16.msra.mxu1 %v7757_v58  ;;  %7168 = vmatprep.mubr.bf16.mxu1 %v11360_v60  ;;  %v9924_v58 = vpop.permute.xlu0 %4908 }
 0x2f1   :  { %7206 = vmatprep.subr.bf16.mxu1 %v7758_v30 }
 0x2f4   :  { %7207 = vmatpush3.bf16.msra.mxu1 %v7758_v30  ;;  %v9928_v52 = vpop.permute.xlu0 %4918 }
 0x2f5   :  { %7208 = vmatprep.subr.bf16.mxu1 %v7759_v20 }
 0x2f7   :  { %7169 = vmatmul.mubr.bf16.gmra.mrb[28].mxu1 %v9228_v62 }
 0x2f8   :  { %7172 = vmatprep.mubr.bf16.mxu1 %v11367_v22  ;;  %7209 = vmatpush3.bf16.msra.mxu1 %v7759_v20  ;;  %v9932_v17 = vpop.permute.xlu0 %4928 }
 0x2f9   :  { %7210 = vmatprep.subr.bf16.mxu1 %v7760_v55  ;;  %11452 = vst [vmem:[#allocation48_spill] sm:$0xff] %v9932_v17 }
 0x2fc   :  { %7211 = vmatpush3.bf16.msra.mxu1 %v7760_v55  ;;  %v9936_v56 = vpop.permute.xlu0 %4938 }
 0x2fd   :  { %7212 = vmatprep.subr.bf16.mxu1 %v7761_v42  ;;  %11454 = vst [vmem:[#allocation50_spill] sm:$0xff] %v9936_v56 }
 0x2ff   :  { %7173 = vmatmul.mubr.bf16.gmra.mrb[32].mxu1 %v9243_v15 }
 0x300   :  { %7176 = vmatprep.mubr.bf16.mxu1 %v9254_v27  ;;  %7213 = vmatpush3.bf16.msra.mxu1 %v7761_v42  ;;  %v9940_v19 = vpop.permute.xlu0 %4948 }
 0x301   :  { %7214 = vmatprep.subr.bf16.mxu1 %v7762_v57  ;;  %11456 = vst [vmem:[#allocation40_spill] sm:$0xff] %v9940_v19 }
 0x304   :  { %7215 = vmatpush3.bf16.msra.mxu1 %v7762_v57 }
 0x305   :  { %7216 = vmatprep.subr.bf16.mxu1 %v7763_v37 }
 0x307   :  { %7177 = vmatmul.mubr.bf16.gmra.mrb[36].mxu1 %v9259_v35 }
 0x308   :  { %7180 = vmatprep.mubr.bf16.mxu1 %v9271_v31  ;;  %7217 = vmatpush3.bf16.msra.mxu1 %v7763_v37  ;;  %v11437_v31 = vld [vmem:[#allocation28_spill] sm:$0xff] }
 0x309   :  { %7218 = vmatprep.subr.bf16.mxu1 %v7764_v36 }
 0x30c   :  { %7219 = vmatpush3.bf16.msra.mxu1 %v7764_v36  ;;  %v9950_v36 = vpop.permute.xlu0 %4958 }
 0x30d   :  { %11460 = vst [vmem:[#allocation18_spill] sm:$0xff] %v9950_v36 }
 0x30f   :  { %7181 = vmatmul.mubr.bf16.gmra.mrb[0].mxu1 %v9273_v41 }
 0x310   :  { %7184 = vmatprep.mubr.bf16.mxu1 %v9281_v12 }
 0x317   :  { %7185 = vmatmul.mubr.bf16.gmra.mrb[4].mxu1 %v9289_v11 }
 0x318   :  { %7188 = vmatprep.mubr.bf16.mxu1 %v9299_v47 }
 0x31f   :  { %7189 = vmatmul.mubr.bf16.gmra.mrb[8].mxu1 %v9313_v45 }
 0x320   :  { %7192 = vmatprep.mubr.bf16.mxu1 %v9372_v53 }
 0x327   :  { %7193 = vmatmul.mubr.bf16.gmra.mrb[12].mxu1 %v9393_v40 }
 0x328   :  { %7196 = vmatprep.mubr.bf16.mxu1 %v9415_v24 }
 0x32f   :  { %7197 = vmatmul.mubr.bf16.gmra.mrb[16].mxu1 %v9426_v0 }
 0x330   :  { %7200 = vmatprep.mubr.bf16.mxu1 %v11437_v31 }
 0x337   :  { %7201 = vmatmul.mubr.bf16.gmra.mrb[20].mxu1 %v9498_v44 }
 0x338   :  { %7220 = vmatprep.mubr.bf16.mxu1 %v9572_v1 }
 0x33f   :  { %7221 = vmatmul.mubr.bf16.vlgmr.msra.gmra.mrb[24].mxu1 %v9613_v2 }
 0x340   :  { %7224 = vmatprep.mubr.bf16.mxu1 %v9628_v14 }
 0x347   :  { %7225 = vmatmul.mubr.bf16.gmra.mrb[28].mxu1 %v9632_v26 }
 0x348   :  { %7228 = vmatprep.mubr.bf16.mxu1 %v9647_v38  ;;  %v11443_v38 = vld [vmem:[#allocation58_spill] sm:$0xff] }
 0x34f   :  { %7229 = vmatmul.mubr.bf16.gmra.mrb[32].mxu1 %v9651_v63 }
 0x350   :  { %7232 = vmatprep.mubr.bf16.mxu1 %v9666_v50 }
 0x357   :  { %7233 = vmatmul.mubr.bf16.gmra.mrb[36].mxu1 %v9670_v16 }
 0x358   :  { %7236 = vmatprep.mubr.bf16.mxu1 %v9687_v29 }
 0x35b   :  { %v9839_v45 = vpop.f32.mrb[64].mxu0 }
 0x35c   :  { %v9842_v12 = vpop.f32.mrb[65].mxu0 }
 0x35d   :  { %v9845_v62 = vpop.f32.mrb[66].mxu0 }
 0x35e   :  { %v9847_v35 = vpop.f32.mrb[67].mxu0 }
 0x35f   :  { %7237 = vmatmul.mubr.bf16.gmra.mrb[0].mxu1 %v9691_v43 }
 0x360   :  { %7240 = vmatprep.mubr.bf16.mxu1 %v9705_v21 }
 0x363   :  { %v9849_v24 = vpop.f32.mrb[68].mxu0 }
 0x364   :  { %v9852_v27 = vpop.f32.mrb[69].mxu0 }
 0x365   :  { %v9855_v15 = vpop.f32.mrb[70].mxu0 }
 0x366   :  { %v9857_v41 = vpop.f32.mrb[71].mxu0 }
 0x367   :  { %7241 = vmatmul.mubr.bf16.gmra.mrb[4].mxu1 %v9709_v5 }
 0x368   :  { %7244 = vmatprep.mubr.bf16.mxu1 %v9725_v13 }
 0x36b   :  { %v9859_v11 = vpop.f32.mrb[72].mxu0 }
 0x36c   :  { %v9862_v47 = vpop.f32.mrb[73].mxu0 }
 0x36d   :  { %v9865_v53 = vpop.f32.mrb[74].mxu0 }
 0x36e   :  { %v9867_v40 = vpop.f32.mrb[75].mxu0 }
 0x36f   :  { %7245 = vmatmul.mubr.bf16.gmra.mrb[8].mxu1 %v9729_v48 }
 0x370   :  { %7248 = vmatprep.mubr.bf16.mxu1 %v9743_v28 }
 0x373   :  { %v9869_v0 = vpop.f32.mrb[76].mxu0 }
 0x374   :  { %v9872_v44 = vpop.f32.mrb[77].mxu0 }
 0x375   :  { %v9875_v9 = vpop.f32.mrb[78].mxu0 }
 0x376   :  { %v9877_v1 = vpop.f32.mrb[79].mxu0 }
 0x377   :  { %7249 = vmatmul.mubr.bf16.gmra.mrb[12].mxu1 %v9747_v46 }
 0x378   :  { %7252 = vmatprep.mubr.bf16.mxu1 %v9759_v59 }
 0x37b   :  { %v9879_v4 = vpop.f32.mrb[80].mxu0 }
 0x37c   :  { %v9882_v60 = vpop.f32.mrb[81].mxu0 }
 0x37d   :  { %11438 = vst [vmem:[#allocation53_spill] sm:$0xff] %v9882_v60  ;;  %v9885_v2 = vpop.f32.mrb[82].mxu0 }
 0x37e   :  { %11439 = vst [vmem:[#allocation36_spill] sm:$0xff] %v9885_v2  ;;  %v9887_v22 = vpop.f32.mrb[83].mxu0 }
 0x37f   :  { %11440 = vst [vmem:[#allocation39_spill] sm:$0xff] %v9887_v22  ;;  %7253 = vmatmul.mubr.bf16.gmra.mrb[16].mxu1 %v9764_v54 }
 0x380   :  { %7256 = vmatprep.mubr.bf16.mxu1 %v11443_v38 }
 0x383   :  { %v9889_v14 = vpop.f32.mrb[84].mxu0 }
 0x384   :  { %11441 = vst [vmem:[#allocation41_spill] sm:$0xff] %v9889_v14  ;;  %v9892_v26 = vpop.f32.mrb[85].mxu0 }
 0x385   :  { %11442 = vst [vmem:[#allocation14_spill] sm:$0xff] %v9892_v26  ;;  %v9895_v63 = vpop.f32.mrb[86].mxu0 }
 0x386   :  { %11444 = vst [vmem:[#allocation42_spill] sm:$0xff] %v9895_v63  ;;  %v9897_v50 = vpop.f32.mrb[87].mxu0 }
 0x387   :  { %11445 = vst [vmem:[#allocation44_spill] sm:$0xff] %v9897_v50  ;;  %7257 = vmatmul.mubr.bf16.gmra.mrb[20].mxu1 %v9568_v8 }
 0x38b   :  { %v6942_v16 = vpop.f32.mrb[48].mxu0 }
 0x38c   :  { %v2656_v29 = vpop.f32.mrb[49].mxu0 }
 0x38d   :  { %v6943_v43 = vpop.f32.mrb[50].mxu0 }
 0x38e   :  { %v2659_v21 = vpop.f32.mrb[51].mxu0 }
 0x393   :  { %v6946_v5 = vpop.f32.mrb[52].mxu0 }
 0x394   :  { %v2672_v13 = vpop.f32.mrb[53].mxu0 }
 0x395   :  { %v6947_v48 = vpop.f32.mrb[54].mxu0 }
 0x396   :  { %v2675_v28 = vpop.f32.mrb[55].mxu0 }
 0x39b   :  { %v9900_v46 = vpop.f32.mrb[56].mxu0 }
 0x39c   :  { %v9902_v59 = vpop.f32.mrb[57].mxu0 }
 0x39d   :  { %v9904_v54 = vpop.f32.mrb[58].mxu0 }
 0x39e   :  { %v9906_v6 = vpop.f32.mrb[59].mxu0 }
 0x3a3   :  { %v9908_v61 = vpop.f32.mrb[60].mxu0 }
 0x3a4   :  { %v9910_v51 = vpop.f32.mrb[61].mxu0 }
 0x3a5   :  { %v9912_v8 = vpop.f32.mrb[62].mxu0 }
 0x3a6   :  { %v9914_v34 = vpop.f32.mrb[63].mxu0 }
 0x412   :  { %v7222_v7 = vpop.f32.mrb[24].mxu1 }
 0x413   :  { %v9944_v30 = vadd.f32 %v7222_v7, %v6942_v16  ;;  %v4647_v20 = vpop.f32.mrb[25].mxu1  ;;  %v9960_v7 = vpop.permute.xlu1 %4963 }
 0x414   :  { %v9946_v55 = vadd.f32 %v4647_v20, %v2656_v29  ;;  %v7223_v42 = vpop.f32.mrb[26].mxu1  ;;  %11462 = vst [vmem:[#allocation20_spill] sm:$0xff] %v9960_v7 }
 0x415   :  { %11458 = vst [vmem:[#allocation16_spill] sm:$0xff] %v9944_v30  ;;  %v9948_v57 = vadd.f32 %v7223_v42, %v6943_v43  ;;  %v4650_v37 = vpop.f32.mrb[27].mxu1  ;;  %v5088_v50 = vmul.f32 %v9944_v30, %v9920_v25  ;;  %v9974_v25 = vpop.permute.xlu0 %4968 }
 0x416   :  { %11459 = vst [vmem:[#allocation15_spill] sm:$0xff] %v9946_v55  ;;  %v5086_v31 = vmul.f32 %v9946_v55, %v9916_v33  ;;  %v9954_v38 = vadd.f32 %v4650_v37, %v2659_v21  ;;  %v7765_v37 = vld [vmem:[%s11014_s8] sm:$0xff]   ;;  %11463 = vst [vmem:[#allocation22_spill] sm:$0xff] %v9974_v25 }
 0x417   :  { %v5089_v29 = vmul.f32 %v9948_v57, %v9922_v10  ;;  %v5173_v10 = vmul.f32 %v9944_v30, %v5088_v50  ;;  %7260 = vmatprep.subr.bf16.mxu0 %v7765_v37  ;;  %v9986_v30 = vpop.permute.xlu1 %4973 }
 0x418   :  { %11461 = vst [vmem:[#allocation17_spill] sm:$0xff] %v9954_v38  ;;  %v5087_v16 = vmul.f32 %v9954_v38, %v9918_v39  ;;  %v5171_v43 = vmul.f32 %v9946_v55, %v5086_v31  ;;  %v7766_v39 = vld [vmem:[%s11014_s8 + $0x8] sm:$0xff]   ;;  %7261 = vmatpush3.bf16.msra.mxu0 %v7765_v37  ;;  %11464 = vst [vmem:[#allocation19_spill] sm:$0xff] %v9986_v30 }
 0x419   :  { %7262 = vmatprep.subr.bf16.mxu0 %v7766_v39 }
 0x41a   :  { %v5126_v20 = vadd.f32 %v5087_v16, %v5086_v31  ;;  %v5172_v42 = vmul.f32 %v9954_v38, %v5087_v16  ;;  %v7226_v63 = vpop.f32.mrb[28].mxu1 }
 0x41b   :  { %v9966_v33 = vadd.f32 %v7226_v63, %v6946_v5  ;;  %v4663_v21 = vpop.f32.mrb[29].mxu1  ;;  %v5174_v63 = vmul.f32 %v9948_v57, %v5089_v29 }
 0x41c   :  { %v5127_v55 = vadd.f32 %v5126_v20, %v5088_v50  ;;  %v5211_v31 = vadd.f32 %v5172_v42, %v5171_v43  ;;  %v9977_v26 = vadd.f32 %v4663_v21, %v2672_v13  ;;  %v7227_v16 = vpop.f32.mrb[30].mxu1  ;;  %v7767_v13 = vld [vmem:[%s11014_s8 + $0x10] sm:$0xff]   ;;  %7263 = vmatpush3.bf16.msra.mxu0 %v7766_v39 }
 0x41d   :  { %v9980_v5 = vadd.f32 %v7227_v16, %v6947_v48  ;;  %v4666_v38 = vpop.f32.mrb[31].mxu1  ;;  %v5092_v50 = vmul.f32 %v9966_v33, %v9928_v52  ;;  %7264 = vmatprep.subr.bf16.mxu0 %v7767_v13 }
 0x41e   :  { %v5212_v14 = vadd.f32 %v5211_v31, %v5173_v10  ;;  %v5090_v22 = vmul.f32 %v9977_v26, %v9924_v58  ;;  %v5128_v2 = vadd.f32 %v5127_v55, %v5089_v29  ;;  %v9984_v60 = vadd.f32 %v4666_v38, %v2675_v28  ;;  %v9998_v38 = vpop.permute.xlu0 %4978 }
 0x41f   :  { %v5093_v28 = vmul.f32 %v9980_v5, %v9930_v23  ;;  %11465 = vst [vmem:[#allocation24_spill] sm:$0xff] %v9998_v38 }
 0x420   :  { %v5129_v48 = vadd.f32 %v5128_v2, %v5090_v22  ;;  %v5175_v10 = vmul.f32 %v9977_v26, %v5090_v22  ;;  %v5213_v43 = vadd.f32 %v5212_v14, %v5174_v63  ;;  %v5091_v55 = vmul.f32 %v9984_v60, %v9926_v49  ;;  %v7768_v22 = vld [vmem:[%s11014_s8 + $0x18] sm:$0xff]   ;;  %7265 = vmatpush3.bf16.msra.mxu0 %v7767_v13 }
 0x421   :  { %v5177_v14 = vmul.f32 %v9966_v33, %v5092_v50  ;;  %v5178_v39 = vmul.f32 %v9980_v5, %v5093_v28  ;;  %7266 = vmatprep.subr.bf16.mxu0 %v7768_v22 }
 0x422   :  { %v5214_v29 = vadd.f32 %v5213_v43, %v5175_v10  ;;  %v5130_v20 = vadd.f32 %v5129_v48, %v5091_v55  ;;  %v5176_v42 = vmul.f32 %v9984_v60, %v5091_v55  ;;  %v7230_v21 = vpop.f32.mrb[32].mxu1  ;;  %v10011_v10 = vpop.permute.xlu1 %4983 }
 0x423   :  { %v10002_v37 = vadd.f32 %v7230_v21, %v9900_v46  ;;  %v4679_v2 = vpop.f32.mrb[33].mxu1  ;;  %11466 = vst [vmem:[#allocation23_spill] sm:$0xff] %v10011_v10 }
 0x424   :  { %v5131_v31 = vadd.f32 %v5130_v20, %v5092_v50  ;;  %v5215_v16 = vadd.f32 %v5214_v29, %v5176_v42  ;;  %v10009_v63 = vadd.f32 %v4679_v2, %v9902_v59  ;;  %v7231_v48 = vpop.f32.mrb[34].mxu1  ;;  %v7769_v29 = vld [vmem:[%s11014_s8 + $0x20] sm:$0xff]   ;;  %7267 = vmatpush3.bf16.msra.mxu0 %v7768_v22 }
 0x425   :  { %v10015_v46 = vadd.f32 %v7231_v48, %v9904_v54  ;;  %v4682_v43 = vpop.f32.mrb[35].mxu1  ;;  %v5096_v59 = vmul.f32 %v10002_v37, %v9936_v56  ;;  %v10027_v54 = vpop.permute.xlu0 %4988  ;;  %7268 = vmatprep.subr.bf16.mxu0 %v7769_v29 }
 0x426   :  { %v5216_v55 = vadd.f32 %v5215_v16, %v5177_v14  ;;  %v5094_v21 = vmul.f32 %v10009_v63, %v9932_v17  ;;  %v5132_v23 = vadd.f32 %v5131_v31, %v5093_v28  ;;  %v10020_v50 = vadd.f32 %v4682_v43, %v9906_v6  ;;  %11467 = vst [vmem:[#allocation21_spill] sm:$0xff] %v10027_v54  ;;  %v10035_v48 = vpop.permute.xlu1 %4993 }
 0x427   :  { %v5097_v6 = vmul.f32 %v10015_v46, %v9938_v32  ;;  %11468 = vst [vmem:[#allocation26_spill] sm:$0xff] %v10035_v48 }
 0x428   :  { %v5133_v20 = vadd.f32 %v5132_v23, %v5094_v21  ;;  %v5179_v42 = vmul.f32 %v10009_v63, %v5094_v21  ;;  %v5217_v2 = vadd.f32 %v5216_v55, %v5178_v39  ;;  %v5095_v28 = vmul.f32 %v10020_v50, %v9934_v3  ;;  %v7770_v39 = vld [vmem:[%s11014_s8 + $0x28] sm:$0xff]   ;;  %7269 = vmatpush3.bf16.msra.mxu0 %v7769_v29 }
 0x429   :  { %v5181_v55 = vmul.f32 %v10002_v37, %v5096_v59  ;;  %v5182_v22 = vmul.f32 %v10015_v46, %v5097_v6  ;;  %7270 = vmatprep.subr.bf16.mxu0 %v7770_v39 }
 0x42a   :  { %v5218_v13 = vadd.f32 %v5217_v2, %v5179_v42  ;;  %v5134_v14 = vadd.f32 %v5133_v20, %v5095_v28  ;;  %v5180_v31 = vmul.f32 %v10020_v50, %v5095_v28  ;;  %v7234_v16 = vpop.f32.mrb[36].mxu1 }
 0x42b   :  { %v10038_v43 = vadd.f32 %v7234_v16, %v9908_v61  ;;  %v4695_v23 = vpop.f32.mrb[37].mxu1  ;;  %v10051_v16 = vpop.permute.xlu0 %4998 }
 0x42c   :  { %v5135_v21 = vadd.f32 %v5134_v14, %v5096_v59  ;;  %v5219_v42 = vadd.f32 %v5218_v13, %v5180_v31  ;;  %v10045_v20 = vadd.f32 %v4695_v23, %v9910_v51  ;;  %v7235_v2 = vpop.f32.mrb[38].mxu1  ;;  %11469 = vst [vmem:[#allocation25_spill] sm:$0xff] %v10051_v16  ;;  %7271 = vmatpush3.bf16.msra.mxu0 %v7770_v39 }
 0x42d   :  { %v10049_v28 = vadd.f32 %v7235_v2, %v9912_v8  ;;  %v4698_v61 = vpop.f32.mrb[39].mxu1  ;;  %v5100_v51 = vmul.f32 %v10038_v43, %v9950_v36  ;;  %v7771_v8 = vld [vmem:[%s11014_s8 + $0x30] sm:$0xff]  }
 0x42e   :  { %v5220_v32 = vadd.f32 %v5219_v42, %v5181_v55  ;;  %v5098_v3 = vmul.f32 %v10045_v20, %v9940_v19  ;;  %v5136_v56 = vadd.f32 %v5135_v21, %v5097_v6  ;;  %v10056_v59 = vadd.f32 %v4698_v61, %v9914_v34  ;;  %v10066_v6 = vpop.permute.xlu1 %5003  ;;  %7272 = vmatprep.subr.bf16.mxu0 %v7771_v8 }
 0x42f   :  { %11470 = vst [vmem:[#allocation30_spill] sm:$0xff] %v10066_v6  ;;  %v5101_v34 = vmul.f32 %v10049_v28, %v9960_v7 }
 0x430   :  { %v5137_v13 = vadd.f32 %v5136_v56, %v5098_v3  ;;  %v5183_v14 = vmul.f32 %v10045_v20, %v5098_v3  ;;  %v5221_v31 = vadd.f32 %v5220_v32, %v5182_v22  ;;  %v5099_v23 = vmul.f32 %v10056_v59, %v9942_v18  ;;  %v7772_v3 = vld [vmem:[%s11014_s8 + $0x38] sm:$0xff]   ;;  %v10077_v32 = vpop.permute.xlu0 %5008  ;;  %7273 = vmatpush3.bf16.msra.mxu0 %v7771_v8 }
 0x431   :  { %11471 = vst [vmem:[#allocation27_spill] sm:$0xff] %v10077_v32  ;;  %v5185_v22 = vmul.f32 %v10038_v43, %v5100_v51  ;;  %v5186_v39 = vmul.f32 %v10049_v28, %v5101_v34  ;;  %7274 = vmatprep.subr.bf16.mxu0 %v7772_v3 }
 0x432   :  { %v5222_v29 = vadd.f32 %v5221_v31, %v5183_v14  ;;  %v5138_v55 = vadd.f32 %v5137_v13, %v5099_v23  ;;  %v5184_v21 = vmul.f32 %v10056_v59, %v5099_v23  ;;  %v7238_v42 = vpop.f32.mrb[0].mxu1 }
 0x433   :  { %v10072_v2 = vadd.f32 %v7238_v42, %v9839_v45  ;;  %v4711_v56 = vpop.f32.mrb[1].mxu1 }
 0x434   :  { %v5139_v61 = vadd.f32 %v5138_v55, %v5100_v51  ;;  %v5223_v14 = vadd.f32 %v5222_v29, %v5184_v21  ;;  %v10081_v13 = vadd.f32 %v4711_v56, %v9842_v12  ;;  %v7239_v31 = vpop.f32.mrb[2].mxu1  ;;  %v10092_v51 = vpop.permute.xlu1 %5013  ;;  %7275 = vmatpush3.bf16.msra.mxu0 %v7772_v3 }
 0x435   :  { %v10085_v45 = vadd.f32 %v7239_v31, %v9845_v62  ;;  %v4714_v23 = vpop.f32.mrb[3].mxu1  ;;  %11472 = vst [vmem:[#allocation31_spill] sm:$0xff] %v10092_v51  ;;  %v5104_v12 = vmul.f32 %v10072_v2, %v9998_v38  ;;  %v10101_v56 = vpop.permute.xlu0 %5018 }
 0x436   :  { %v5224_v42 = vadd.f32 %v5223_v14, %v5185_v22  ;;  %v5102_v7 = vmul.f32 %v10081_v13, %v9974_v25  ;;  %v5140_v18 = vadd.f32 %v5139_v61, %v5101_v34  ;;  %v10090_v36 = vadd.f32 %v4714_v23, %v9847_v35  ;;  %11473 = vst [vmem:[#allocation33_spill] sm:$0xff] %v10101_v56 }
 0x437   :  { %v5105_v34 = vmul.f32 %v10085_v45, %v10011_v10 }
 0x438   :  { %v5141_v29 = vadd.f32 %v5140_v18, %v5102_v7  ;;  %v5187_v62 = vmul.f32 %v10081_v13, %v5102_v7  ;;  %v5225_v55 = vadd.f32 %v5224_v42, %v5186_v39  ;;  %v5103_v21 = vmul.f32 %v10090_v36, %v9986_v30  ;;  %v10111_v10 = vpop.permute.xlu1 %5023  ;;  %v11492_v30 = vld [vmem:[#allocation44_spill] sm:$0xff] }
 0x439   :  { %v5189_v7 = vmul.f32 %v10072_v2, %v5104_v12  ;;  %11474 = vst [vmem:[#allocation32_spill] sm:$0xff] %v10111_v10 }
 0x43a   :  { %v5226_v35 = vadd.f32 %v5225_v55, %v5187_v62  ;;  %v5142_v8 = vadd.f32 %v5141_v29, %v5103_v21  ;;  %v5188_v22 = vmul.f32 %v10090_v36, %v5103_v21  ;;  %v7242_v61 = vpop.f32.mrb[4].mxu1  ;;  %v5190_v29 = vmul.f32 %v10085_v45, %v5105_v34 }
 0x43b   :  { %v10105_v14 = vadd.f32 %v7242_v61, %v9849_v24  ;;  %v4727_v18 = vpop.f32.mrb[5].mxu1 }
 0x43c   :  { %v5143_v31 = vadd.f32 %v5142_v8, %v5104_v12  ;;  %v5227_v39 = vadd.f32 %v5226_v35, %v5188_v22  ;;  %v10109_v23 = vadd.f32 %v4727_v18, %v9852_v27  ;;  %v7243_v42 = vpop.f32.mrb[6].mxu1  ;;  %v10124_v35 = vpop.permute.xlu0 %5028 }
 0x43d   :  { %v10115_v62 = vadd.f32 %v7243_v42, %v9855_v15  ;;  %v4730_v3 = vpop.f32.mrb[7].mxu1  ;;  %v5108_v27 = vmul.f32 %v10105_v14, %v10051_v16  ;;  %11475 = vst [vmem:[#allocation34_spill] sm:$0xff] %v10124_v35 }
 0x43e   :  { %v5228_v55 = vadd.f32 %v5227_v39, %v5189_v7  ;;  %v5106_v24 = vmul.f32 %v10109_v23, %v10027_v54  ;;  %v5144_v21 = vadd.f32 %v5143_v31, %v5105_v34  ;;  %v10120_v12 = vadd.f32 %v4730_v3, %v9857_v41  ;;  %v10132_v39 = vpop.permute.xlu1 %5033 }
 0x43f   :  { %v5109_v18 = vmul.f32 %v10115_v62, %v10066_v6  ;;  %11476 = vst [vmem:[#allocation38_spill] sm:$0xff] %v10132_v39 }
 0x440   :  { %v5145_v8 = vadd.f32 %v5144_v21, %v5106_v24  ;;  %v5191_v22 = vmul.f32 %v10109_v23, %v5106_v24  ;;  %v5229_v61 = vadd.f32 %v5228_v55, %v5190_v29  ;;  %v5107_v15 = vmul.f32 %v10120_v12, %v10035_v48 }
 0x441   :  { %v5193_v24 = vmul.f32 %v10105_v14, %v5108_v27 }
 0x442   :  { %v5230_v7 = vadd.f32 %v5229_v61, %v5191_v22  ;;  %v5146_v34 = vadd.f32 %v5145_v8, %v5107_v15  ;;  %v5192_v41 = vmul.f32 %v10120_v12, %v5107_v15  ;;  %v7246_v31 = vpop.f32.mrb[8].mxu1  ;;  %v5194_v22 = vmul.f32 %v10115_v62, %v5109_v18  ;;  %v10145_v15 = vpop.permute.xlu0 %5038 }
 0x443   :  { %v10135_v42 = vadd.f32 %v7246_v31, %v9859_v11  ;;  %v4743_v3 = vpop.f32.mrb[9].mxu1  ;;  %11477 = vst [vmem:[#allocation13_spill] sm:$0xff] %v10145_v15 }
 0x444   :  { %v5147_v29 = vadd.f32 %v5146_v34, %v5108_v27  ;;  %v5231_v55 = vadd.f32 %v5230_v7, %v5192_v41  ;;  %v10139_v21 = vadd.f32 %v4743_v3, %v9862_v47  ;;  %v7247_v48 = vpop.f32.mrb[10].mxu1 }
 0x445   :  { %v10143_v8 = vadd.f32 %v7247_v48, %v9865_v53  ;;  %v4746_v61 = vpop.f32.mrb[11].mxu1  ;;  %v5112_v47 = vmul.f32 %v10135_v42, %v10101_v56  ;;  %v10157_v48 = vpop.permute.xlu1 %5043 }
 0x446   :  { %v5232_v6 = vadd.f32 %v5231_v55, %v5193_v24  ;;  %v5110_v11 = vmul.f32 %v10139_v21, %v10077_v32  ;;  %v5148_v31 = vadd.f32 %v5147_v29, %v5109_v18  ;;  %v10150_v27 = vadd.f32 %v4746_v61, %v9867_v40  ;;  %11478 = vst [vmem:[#allocation10_spill] sm:$0xff] %v10157_v48  ;;  %v11485_v32 = vld [vmem:[#allocation39_spill] sm:$0xff] }
 0x447   :  { %v5113_v3 = vmul.f32 %v10143_v8, %v10111_v10 }
 0x448   :  { %v5149_v7 = vadd.f32 %v5148_v31, %v5110_v11  ;;  %v5195_v34 = vmul.f32 %v10139_v21, %v5110_v11  ;;  %v5233_v41 = vadd.f32 %v5232_v6, %v5194_v22  ;;  %v5111_v53 = vmul.f32 %v10150_v27, %v10092_v51  ;;  %v10165_v31 = vpop.permute.xlu0 %5048 }
 0x449   :  { %11479 = vst [vmem:[#allocation37_spill] sm:$0xff] %v10165_v31  ;;  %v5197_v6 = vmul.f32 %v10135_v42, %v5112_v47 }
 0x44a   :  { %v5234_v24 = vadd.f32 %v5233_v41, %v5195_v34  ;;  %v5150_v18 = vadd.f32 %v5149_v7, %v5111_v53  ;;  %v5196_v40 = vmul.f32 %v10150_v27, %v5111_v53  ;;  %v7250_v29 = vpop.f32.mrb[12].mxu1  ;;  %v5198_v34 = vmul.f32 %v10143_v8, %v5113_v3 }
 0x44b   :  { %v10163_v55 = vadd.f32 %v7250_v29, %v9869_v0  ;;  %v4759_v61 = vpop.f32.mrb[13].mxu1 }
 0x44c   :  { %v5151_v22 = vadd.f32 %v5150_v18, %v5112_v47  ;;  %v5235_v11 = vadd.f32 %v5234_v24, %v5196_v40  ;;  %v10169_v51 = vadd.f32 %v4759_v61, %v9872_v44  ;;  %v7251_v56 = vpop.f32.mrb[14].mxu1  ;;  %v10180_v47 = vpop.permute.xlu1 %5053 }
 0x44d   :  { %v10173_v7 = vadd.f32 %v7251_v56, %v9875_v9  ;;  %v4762_v41 = vpop.f32.mrb[15].mxu1  ;;  %11480 = vst [vmem:[#allocation45_spill] sm:$0xff] %v10180_v47  ;;  %v5116_v44 = vmul.f32 %v10163_v55, %v10145_v15  ;;  %v10189_v61 = vpop.permute.xlu0 %5058 }
 0x44e   :  { %v5236_v53 = vadd.f32 %v5235_v11, %v5197_v6  ;;  %v5114_v0 = vmul.f32 %v10169_v51, %v10124_v35  ;;  %v5152_v29 = vadd.f32 %v5151_v22, %v5113_v3  ;;  %v10178_v10 = vadd.f32 %v4762_v41, %v9877_v1  ;;  %11481 = vst [vmem:[#allocation12_spill] sm:$0xff] %v10189_v61 }
 0x44f   :  { %v5117_v56 = vmul.f32 %v10173_v7, %v10157_v48 }
 0x450   :  { %v5153_v24 = vadd.f32 %v5152_v29, %v5114_v0  ;;  %v5199_v18 = vmul.f32 %v10169_v51, %v5114_v0  ;;  %v5237_v40 = vadd.f32 %v5236_v53, %v5198_v34  ;;  %v5115_v9 = vmul.f32 %v10178_v10, %v10132_v39  ;;  %v11482_v29 = vld [vmem:[#allocation53_spill] sm:$0xff]  ;;  %v10199_v48 = vpop.permute.xlu1 %5063 }
 0x451   :  { %v5201_v0 = vmul.f32 %v10163_v55, %v5116_v44  ;;  %11483 = vst [vmem:[#allocation29_spill] sm:$0xff] %v10199_v48 }
 0x452   :  { %v5238_v3 = vadd.f32 %v5237_v40, %v5199_v18  ;;  %v5154_v1 = vadd.f32 %v5153_v24, %v5115_v9  ;;  %v5200_v6 = vmul.f32 %v10178_v10, %v5115_v9  ;;  %v7254_v22 = vpop.f32.mrb[16].mxu1  ;;  %v5202_v18 = vmul.f32 %v10173_v7, %v5117_v56  ;;  %v11484_v24 = vld [vmem:[#allocation36_spill] sm:$0xff] }
 0x453   :  { %v10193_v11 = vadd.f32 %v7254_v22, %v9879_v4  ;;  %v4775_v41 = vpop.f32.mrb[17].mxu1 }
 0x454   :  { %v5155_v34 = vadd.f32 %v5154_v1, %v5116_v44  ;;  %v5239_v53 = vadd.f32 %v5238_v3, %v5200_v6  ;;  %v10197_v39 = vadd.f32 %v4775_v41, %v11482_v29  ;;  %v7255_v15 = vpop.f32.mrb[18].mxu1  ;;  %v10212_v1 = vpop.permute.xlu0 %5068 }
 0x455   :  { %v10203_v40 = vadd.f32 %v7255_v15, %v11484_v24  ;;  %v4778_v9 = vpop.f32.mrb[19].mxu1  ;;  %v5120_v3 = vmul.f32 %v10193_v11, %v10189_v61  ;;  %11486 = vst [vmem:[#allocation55_spill] sm:$0xff] %v10212_v1  ;;  %v10220_v24 = vpop.permute.xlu1 %5073 }
 0x456   :  { %v5240_v35 = vadd.f32 %v5239_v53, %v5201_v0  ;;  %v5118_v4 = vmul.f32 %v10197_v39, %v10165_v31  ;;  %v5156_v22 = vadd.f32 %v5155_v34, %v5117_v56  ;;  %v10208_v44 = vadd.f32 %v4778_v9, %v11485_v32  ;;  %11487 = vst [vmem:[#allocation56_spill] sm:$0xff] %v10220_v24  ;;  %v11488_v9 = vld [vmem:[#allocation41_spill] sm:$0xff]  ;;  %v11489_v31 = vld [vmem:[#allocation14_spill] sm:$0xff] }
 0x457   :  { %v5121_v0 = vmul.f32 %v10203_v40, %v10199_v48 }
 0x458   :  { %v5157_v6 = vadd.f32 %v5156_v22, %v5118_v4  ;;  %v5203_v41 = vmul.f32 %v10197_v39, %v5118_v4  ;;  %v5241_v29 = vadd.f32 %v5240_v35, %v5202_v18  ;;  %v5119_v15 = vmul.f32 %v10208_v44, %v10180_v47  ;;  %v10233_v48 = vpop.permute.xlu0 %5078 }
 0x459   :  { %v5205_v4 = vmul.f32 %v10193_v11, %v5120_v3  ;;  %11491 = vst [vmem:[#allocation57_spill] sm:$0xff] %v10233_v48 }
 0x45a   :  { %v5242_v53 = vadd.f32 %v5241_v29, %v5203_v41  ;;  %v5158_v56 = vadd.f32 %v5157_v6, %v5119_v15  ;;  %v5204_v32 = vmul.f32 %v10208_v44, %v5119_v15  ;;  %v7258_v34 = vpop.f32.mrb[20].mxu1  ;;  %v5206_v41 = vmul.f32 %v10203_v40, %v5121_v0  ;;  %v11490_v6 = vld [vmem:[#allocation42_spill] sm:$0xff] }
 0x45b   :  { %v10223_v61 = vadd.f32 %v7258_v34, %v11488_v9  ;;  %v4791_v22 = vpop.f32.mrb[21].mxu1 }
 0x45c   :  { %v5159_v35 = vadd.f32 %v5158_v56, %v5120_v3  ;;  %v5243_v18 = vadd.f32 %v5242_v53, %v5204_v32  ;;  %v10227_v47 = vadd.f32 %v4791_v22, %v11489_v31  ;;  %v7259_v16 = vpop.f32.mrb[22].mxu1  ;;  %v10242_v22 = vpop.permute.xlu1 %5083 }
 0x45d   :  { %v10231_v29 = vadd.f32 %v7259_v16, %v11490_v6  ;;  %v4794_v15 = vpop.f32.mrb[23].mxu1  ;;  %v5124_v31 = vmul.f32 %v10223_v61, %v10233_v48  ;;  %11493 = vst [vmem:[#allocation28_spill] sm:$0xff] %v10242_v22 }
 0x45e   :  { %v5244_v54 = vadd.f32 %v5243_v18, %v5205_v4  ;;  %v5122_v34 = vmul.f32 %v10227_v47, %v10212_v1  ;;  %v5160_v9 = vadd.f32 %v5159_v35, %v5121_v0  ;;  %v7371_v3 = vadd.f32 %v4794_v15, %v11492_v30 }
 0x45f   :  { %v5125_v4 = vmul.f32 %v10231_v29, %v10242_v22  ;;  %v5209_v0 = vmul.f32 %v10223_v61, %v5124_v31 }
 0x460   :  { %v5161_v53 = vadd.f32 %v5160_v9, %v5122_v34  ;;  %v5207_v56 = vmul.f32 %v10227_v47, %v5122_v34  ;;  %v5245_v32 = vadd.f32 %v5244_v54, %v5206_v41  ;;  %v5123_v16 = vmul.f32 %v7371_v3, %v10220_v24 }
 0x461   :  { %v5210_v15 = vmul.f32 %v10231_v29, %v5125_v4 }
 0x462   :  { %v5246_v6 = vadd.f32 %v5245_v32, %v5207_v56  ;;  %v5162_v18 = vadd.f32 %v5161_v53, %v5123_v16  ;;  %v5208_v1 = vmul.f32 %v7371_v3, %v5123_v16 }
 0x464   :  { %v5163_v30 = vadd.f32 %v5162_v18, %v5124_v31  ;;  %v5247_v35 = vadd.f32 %v5246_v6, %v5208_v1 }
 0x466   :  { %v5164_v9 = vadd.f32 %v5163_v30, %v5125_v4  ;;  %v5248_v48 = vadd.f32 %v5247_v35, %v5209_v0  ;;  %v11495_v35 = vld [vmem:[#allocation15_spill] sm:$0xff] }
 0x468   :  { %v5165_v34 = vrot.slane %v5164_v9, 4  ;;  %v5249_v54 = vadd.f32 %v5248_v48, %v5210_v15  ;;  %v5256_v48 = vld [vmem:[%s11012_s6] sm:$0x1] }
 0x46a   :  { %v5166_v41 = vadd.f32 %v5165_v34, %v5164_v9  ;;  %v5250_v24 = vrot.slane %v5249_v54, 4  ;;  %v11496_v9 = vld [vmem:[#allocation17_spill] sm:$0xff] }
 0x46c   :  { %v5167_v38 = vrot.slane %v5166_v41, 2  ;;  %v5251_v25 = vadd.f32 %v5250_v24, %v5249_v54  ;;  %v11497_v54 = vld [vmem:[#allocation16_spill] sm:$0xff] }
 0x46e   :  { %v5168_v56 = vadd.f32 %v5167_v38, %v5166_v41  ;;  %v5252_v32 = vrot.slane %v5251_v25, 2  ;;  %v11494_v38 = vld [vmem:[#allocation52_spill] sm:$0xff] }
 0x470   :  { %v5169_v19 = vrot.slane %v5168_v56, 1  ;;  %v5253_v22 = vadd.f32 %v5252_v32, %v5251_v25  ;;  %v5257_v25 = vld [vmem:[%s11013_s7] sm:$0x1] }
 0x472   :  { %v5170_v53 = vadd.f32 %v5169_v19, %v5168_v56  ;;  %v5254_v16 = vrot.slane %v5253_v22, 1 }
 0x474   :  { %v5255_v17 = vadd.f32 %v5254_v16, %v5253_v22  ;;  %v5258_v49 = vmul.f32 0.0078125, %v5170_v53 }
 0x476   :  { %v5259_v31 = vmul.f32 0.0078125, %v5255_v17  ;;  %v5260_v1 = vmul.f32 %v5258_v49, %v5258_v49 }
 0x478   :  { %v5261_v6 = vsub.f32 %v5259_v31, %v5260_v1 }
 0x47a   :  { %v5262_v18 = vmax.f32 %v5261_v6, 0.0 }
 0x47c   :  { %v5263_v4 = vadd.f32 1e-05, %v5262_v18 }
 0x47e   :  { %7775 = vrsqrt.f32 %v5263_v4 }
 0x488   :  { %v7776_v0 = vpop.eup %7775 }
 0x489   :  { %v5265_v24 = vmul.f32 %v7776_v0, %v5256_v48 }
 0x48b   :  { %v5266_v19 = vmul.f32 %v5265_v24, %v5258_v49  ;;  %v5272_v22 = vrot.slane %v5265_v24, %v11494_v38 }
 0x48d   :  { %v5267_v30 = vsub.f32 %v5257_v25, %v5266_v19  ;;  %v10255_v17 = vmul.f32 %v7371_v3, %v5272_v22  ;;  %v5274_v15 = vmul.f32 %v11495_v35, %v5272_v22  ;;  %v5275_v34 = vmul.f32 %v11496_v9, %v5272_v22 }
 0x48e   :  { %v5276_v41 = vmul.f32 %v11497_v54, %v5272_v22  ;;  %v5277_v56 = vmul.f32 %v9948_v57, %v5272_v22  ;;  %v5278_v32 = vmul.f32 %v9977_v26, %v5272_v22  ;;  %v5279_v53 = vmul.f32 %v9984_v60, %v5272_v22 }
 0x48f   :  { %v10264_v16 = vrot.slane %v5267_v30, %v11494_v38  ;;  %v5280_v49 = vmul.f32 %v9966_v33, %v5272_v22  ;;  %v5281_v3 = vmul.f32 %v9980_v5, %v5272_v22  ;;  %v5282_v31 = vmul.f32 %v10009_v63, %v5272_v22 }
 0x490   :  { %v5283_v1 = vmul.f32 %v10020_v50, %v5272_v22  ;;  %v5284_v6 = vmul.f32 %v10002_v37, %v5272_v22  ;;  %v5285_v18 = vmul.f32 %v10015_v46, %v5272_v22  ;;  %v5286_v57 = vmul.f32 %v10045_v20, %v5272_v22 }
 0x491   :  { %v5287_v26 = vmul.f32 %v10056_v59, %v5272_v22  ;;  %v5288_v60 = vmul.f32 %v10038_v43, %v5272_v22  ;;  %v5289_v4 = vmul.f32 %v10049_v28, %v5272_v22  ;;  %v5290_v33 = vmul.f32 %v10081_v13, %v5272_v22 }
 0x492   :  { %v5291_v5 = vmul.f32 %v10090_v36, %v5272_v22  ;;  %v10279_v63 = vmul.f32 %v10072_v2, %v5272_v22  ;;  %v10282_v50 = vmul.f32 %v10085_v45, %v5272_v22  ;;  %v10285_v37 = vmul.f32 %v10109_v23, %v5272_v22 }
 0x493   :  { %v10288_v46 = vmul.f32 %v10120_v12, %v5272_v22  ;;  %v10291_v43 = vmul.f32 %v10105_v14, %v5272_v22  ;;  %v10294_v20 = vmul.f32 %v10115_v62, %v5272_v22  ;;  %v10297_v36 = vmul.f32 %v10139_v21, %v5272_v22 }
 0x494   :  { %v10300_v28 = vmul.f32 %v10150_v27, %v5272_v22  ;;  %v10303_v59 = vmul.f32 %v10135_v42, %v5272_v22  ;;  %v10306_v2 = vmul.f32 %v10143_v8, %v5272_v22  ;;  %v10309_v13 = vmul.f32 %v10169_v51, %v5272_v22 }
 0x495   :  { %v10312_v45 = vmul.f32 %v10178_v10, %v5272_v22  ;;  %v10315_v14 = vmul.f32 %v10163_v55, %v5272_v22  ;;  %v10318_v23 = vmul.f32 %v10173_v7, %v5272_v22  ;;  %v10321_v62 = vmul.f32 %v10197_v39, %v5272_v22 }
 0x496   :  { %v10324_v12 = vmul.f32 %v10208_v44, %v5272_v22  ;;  %v10327_v42 = vmul.f32 %v10193_v11, %v5272_v22  ;;  %v10330_v51 = vmul.f32 %v10203_v40, %v5272_v22  ;;  %v10333_v10 = vmul.f32 %v10227_v47, %v5272_v22 }
 0x497   :  { %v10336_v21 = vmul.f32 %v10223_v61, %v5272_v22  ;;  %v10339_v8 = vmul.f32 %v10231_v29, %v5272_v22  ;;  %v5322_v39 = vadd.f32 %v10264_v16, %v5276_v41  ;;  %v5323_v27 = vadd.f32 %v10264_v16, %v5277_v56 }
 0x498   :  { %v5320_v55 = vadd.f32 %v10264_v16, %v5274_v15  ;;  %v5321_v7 = vadd.f32 %v10264_v16, %v5275_v34  ;;  %v5324_v11 = vadd.f32 %v10264_v16, %v5278_v32  ;;  %v5325_v40 = vadd.f32 %v10264_v16, %v5279_v53 }
 0x499   :  { %v5362_v47 = vmax.f32 %v5322_v39, 0.0  ;;  %v5363_v44 = vmax.f32 %v5323_v27, 0.0  ;;  %v5326_v61 = vadd.f32 %v10264_v16, %v5280_v49  ;;  %v5327_v48 = vadd.f32 %v10264_v16, %v5281_v3 }
 0x49a   :  { %v5360_v29 = vmax.f32 %v5320_v55, 0.0  ;;  %v5361_v0 = vmax.f32 %v5321_v7, 0.0  ;;  %v5364_v24 = vmax.f32 %v5324_v11, 0.0  ;;  %v5365_v25 = vmax.f32 %v5325_v40, 0.0 }
 0x49b   :  { %v5417_v19 = vpack.c.bf16 %v5363_v44, %v5362_v47  ;;  %v5366_v22 = vmax.f32 %v5326_v61, 0.0  ;;  %v5367_v30 = vmax.f32 %v5327_v48, 0.0  ;;  %v5328_v35 = vadd.f32 %v10264_v16, %v5282_v31 }
 0x49c   :  { %v5416_v15 = vpack.c.bf16 %v5361_v0, %v5360_v29  ;;  %v5418_v9 = vpack.c.bf16 %v5365_v25, %v5364_v24  ;;  %v5329_v34 = vadd.f32 %v10264_v16, %v5283_v1  ;;  %v5330_v54 = vadd.f32 %v10264_v16, %v5284_v6 }
 0x49d   :  { %v5419_v41 = vpack.c.bf16 %v5367_v30, %v5366_v22  ;;  %v5368_v56 = vmax.f32 %v5328_v35, 0.0  ;;  %v5331_v32 = vadd.f32 %v10264_v16, %v5285_v18  ;;  %v5332_v53 = vadd.f32 %v10264_v16, %v5286_v57 }
 0x49e   :  { %7276 = vmatprep.mubr.bf16.mxu0 %v5416_v15  ;;  %v5369_v49 = vmax.f32 %v5329_v34, 0.0  ;;  %v5370_v3 = vmax.f32 %v5330_v54, 0.0  ;;  %v5333_v39 = vadd.f32 %v10264_v16, %v5287_v26  ;;  %v5334_v27 = vadd.f32 %v10264_v16, %v5288_v60 }
 0x49f   :  { %7277 = vmatmul.mubr.bf16.vlgmr.msra.gmra.mrb[88].mxu0 %v5417_v19  ;;  %v5371_v31 = vmax.f32 %v5331_v32, 0.0  ;;  %v5372_v55 = vmax.f32 %v5332_v53, 0.0  ;;  %v5335_v1 = vadd.f32 %v10264_v16, %v5289_v4  ;;  %v5336_v6 = vadd.f32 %v10264_v16, %v5290_v33 }
 0x4a0   :  { %7280 = vmatprep.mubr.bf16.mxu0 %v5418_v9  ;;  %v5420_v7 = vpack.c.bf16 %v5369_v49, %v5368_v56  ;;  %v5373_v11 = vmax.f32 %v5333_v39, 0.0  ;;  %v5374_v18 = vmax.f32 %v5334_v27, 0.0  ;;  %v5337_v57 = vadd.f32 %v10264_v16, %v5291_v5 }
 0x4a1   :  { %v5421_v40 = vpack.c.bf16 %v5371_v31, %v5370_v3  ;;  %v5375_v47 = vmax.f32 %v5335_v1, 0.0  ;;  %v5376_v44 = vmax.f32 %v5336_v6, 0.0  ;;  %v5338_v26 = vadd.f32 %v10264_v16, %v10279_v63 }
 0x4a2   :  { %v5422_v60 = vpack.c.bf16 %v5373_v11, %v5372_v55  ;;  %v5377_v61 = vmax.f32 %v5337_v57, 0.0  ;;  %v5339_v48 = vadd.f32 %v10264_v16, %v10282_v50  ;;  %v5340_v4 = vadd.f32 %v10264_v16, %v10285_v37 }
 0x4a3   :  { %v5423_v33 = vpack.c.bf16 %v5375_v47, %v5374_v18  ;;  %v5378_v29 = vmax.f32 %v5338_v26, 0.0  ;;  %v5341_v0 = vadd.f32 %v10264_v16, %v10288_v46  ;;  %v5342_v5 = vadd.f32 %v10264_v16, %v10291_v43 }
 0x4a4   :  { %v5424_v24 = vpack.c.bf16 %v5377_v61, %v5376_v44  ;;  %v5379_v25 = vmax.f32 %v5339_v48, 0.0  ;;  %v5380_v19 = vmax.f32 %v5340_v4, 0.0  ;;  %v5343_v63 = vadd.f32 %v10264_v16, %v10294_v20  ;;  %v11499_v4 = vld [vmem:[#allocation35_spill] sm:$0xff] }
 0x4a5   :  { %v5381_v22 = vmax.f32 %v5341_v0, 0.0  ;;  %v5382_v30 = vmax.f32 %v5342_v5, 0.0  ;;  %v5344_v50 = vadd.f32 %v10264_v16, %v10297_v36  ;;  %v5345_v37 = vadd.f32 %v10264_v16, %v10300_v28 }
 0x4a6   :  { %v5425_v35 = vpack.c.bf16 %v5379_v25, %v5378_v29  ;;  %v5383_v15 = vmax.f32 %v5343_v63, 0.0  ;;  %v5346_v46 = vadd.f32 %v10264_v16, %v10303_v59  ;;  %v5347_v43 = vadd.f32 %v10264_v16, %v10306_v2  ;;  %v11500_v29 = vld [vmem:[#allocation43_spill] sm:$0xff] }
 0x4a7   :  { %7281 = vmatmul.mubr.bf16.gmra.mrb[92].mxu0 %v5419_v41  ;;  %v5426_v9 = vpack.c.bf16 %v5381_v22, %v5380_v19  ;;  %v5384_v34 = vmax.f32 %v5344_v50, 0.0  ;;  %v5385_v20 = vmax.f32 %v5345_v37, 0.0  ;;  %v5348_v54 = vadd.f32 %v10264_v16, %v10309_v13 }
 0x4a8   :  { %7284 = vmatprep.mubr.bf16.mxu0 %v5420_v7  ;;  %v5427_v36 = vpack.c.bf16 %v5383_v15, %v5382_v30  ;;  %v5386_v56 = vmax.f32 %v5346_v46, 0.0  ;;  %v5387_v32 = vmax.f32 %v5347_v43, 0.0  ;;  %v5349_v28 = vadd.f32 %v10264_v16, %v10312_v45 }
 0x4a9   :  { %v5428_v53 = vpack.c.bf16 %v5385_v20, %v5384_v34  ;;  %v5388_v49 = vmax.f32 %v5348_v54, 0.0  ;;  %v5350_v59 = vadd.f32 %v10264_v16, %v10315_v14  ;;  %v5351_v2 = vadd.f32 %v10264_v16, %v10318_v23 }
 0x4aa   :  { %v5429_v41 = vpack.c.bf16 %v5387_v32, %v5386_v56  ;;  %v5389_v3 = vmax.f32 %v5349_v28, 0.0  ;;  %v5352_v13 = vadd.f32 %v10264_v16, %v10321_v62  ;;  %v5353_v39 = vadd.f32 %v10264_v16, %v10324_v12  ;;  %v11502_v28 = vld [vmem:[#allocation46_spill] sm:$0xff] }
 0x4ab   :  { %v5390_v27 = vmax.f32 %v5350_v59, 0.0  ;;  %v5391_v31 = vmax.f32 %v5351_v2, 0.0  ;;  %v5354_v45 = vadd.f32 %v10264_v16, %v10327_v42  ;;  %v5355_v55 = vadd.f32 %v10264_v16, %v10330_v51  ;;  %v11503_v59 = vld [vmem:[#allocation49_spill] sm:$0xff] }
 0x4ac   :  { %v5430_v14 = vpack.c.bf16 %v5389_v3, %v5388_v49  ;;  %v5392_v1 = vmax.f32 %v5352_v13, 0.0  ;;  %v5393_v6 = vmax.f32 %v5353_v39, 0.0  ;;  %v5356_v23 = vadd.f32 %v10264_v16, %v10333_v10 }
 0x4ad   :  { %v5431_v7 = vpack.c.bf16 %v5391_v31, %v5390_v27  ;;  %v5394_v11 = vmax.f32 %v5354_v45, 0.0  ;;  %v5395_v62 = vmax.f32 %v5355_v55, 0.0  ;;  %v5357_v12 = vadd.f32 %v10264_v16, %v10255_v17  ;;  %v11504_v55 = vld [vmem:[#allocation48_spill] sm:$0xff] }
 0x4ae   :  { %v5432_v18 = vpack.c.bf16 %v5393_v6, %v5392_v1  ;;  %v5396_v57 = vmax.f32 %v5356_v23, 0.0  ;;  %v5358_v42 = vadd.f32 %v10264_v16, %v10336_v21  ;;  %v5359_v51 = vadd.f32 %v10264_v16, %v10339_v8  ;;  %v11498_v21 = vld [vmem:[#allocation11_spill] sm:$0xff]  ;;  %v11505_v23 = vld [vmem:[#allocation50_spill] sm:$0xff] }
 0x4af   :  { %7285 = vmatmul.mubr.bf16.gmra.mrb[96].mxu0 %v5421_v40  ;;  %v5433_v47 = vpack.c.bf16 %v5395_v62, %v5394_v11  ;;  %v5397_v44 = vmax.f32 %v5357_v12, 0.0 }
 0x4b0   :  { %7288 = vmatprep.mubr.bf16.mxu0 %v5422_v60  ;;  %v5398_v26 = vmax.f32 %v5358_v42, 0.0  ;;  %v5399_v10 = vmax.f32 %v5359_v51, 0.0 }
 0x4b1   :  { %v5434_v61 = vpack.c.bf16 %v5397_v44, %v5396_v57  ;;  %v11506_v57 = vld [vmem:[#allocation51_spill] sm:$0xff] }
 0x4b2   :  { %v5435_v48 = vpack.c.bf16 %v5399_v10, %v5398_v26 }
 0x4b7   :  { %7289 = vmatmul.mubr.bf16.gmra.mrb[100].mxu0 %v5423_v33 }
 0x4b8   :  { %7292 = vmatprep.mubr.bf16.mxu0 %v5424_v24  ;;  %v11501_v24 = vld [vmem:[#allocation47_spill] sm:$0xff] }
 0x4bf   :  { %7293 = vmatmul.mubr.bf16.gmra.mrb[104].mxu0 %v5425_v35 }
 0x4c0   :  { %7296 = vmatprep.mubr.bf16.mxu0 %v5426_v9 }
 0x4c7   :  { %7297 = vmatmul.mubr.bf16.gmra.mrb[108].mxu0 %v5427_v36 }
 0x4c8   :  { %7300 = vmatprep.mubr.bf16.mxu0 %v5428_v53 }
 0x4cf   :  { %7301 = vmatmul.mubr.bf16.gmra.mrb[112].mxu0 %v5429_v41 }
 0x4d0   :  { %7304 = vmatprep.mubr.bf16.mxu0 %v5430_v14 }
 0x4d7   :  { %7305 = vmatmul.mubr.bf16.gmra.mrb[116].mxu0 %v5431_v7 }
 0x4d8   :  { %7308 = vmatprep.mubr.bf16.mxu0 %v5432_v18 }
 0x4df   :  { %7309 = vmatmul.mubr.bf16.gmra.mrb[120].mxu0 %v5433_v47  ;;  %v11507_v47 = vld [vmem:[#allocation54_spill] sm:$0xff] }
 0x4e0   :  { %7312 = vmatprep.mubr.bf16.mxu0 %v5434_v61 }
 0x4e7   :  { %7313 = vmatmul.mubr.bf16.gmra.mrb[124].mxu0 %v5435_v48 }
 0x572   :  { %v10403_v17 = vpop.f32.mrb[88].mxu0 }
 0x573   :  { %v10405_v16 = vpop.f32.mrb[89].mxu0  ;;  %v5679_v33 = vmul.f32 %v10403_v17, %v11499_v4 }
 0x574   :  { %v5677_v8 = vmul.f32 %v10405_v16, %v11498_v21  ;;  %v10409_v40 = vpop.f32.mrb[90].mxu0 }
 0x575   :  { %v10411_v60 = vpop.f32.mrb[91].mxu0  ;;  %v5680_v25 = vmul.f32 %v10409_v40, %v11501_v24  ;;  %v5764_v22 = vmul.f32 %v10403_v17, %v5679_v33 }
 0x576   :  { %v5678_v0 = vmul.f32 %v10411_v60, %v11500_v29  ;;  %v5762_v5 = vmul.f32 %v5677_v8, %v10405_v16 }
 0x577   :  { %v5765_v15 = vmul.f32 %v10409_v40, %v5680_v25 }
 0x578   :  { %v5717_v19 = vadd.f32 %v5678_v0, %v5677_v8  ;;  %v5763_v63 = vmul.f32 %v5678_v0, %v10411_v60  ;;  %v11508_v0 = vld [vmem:[#allocation40_spill] sm:$0xff] }
 0x57a   :  { %v5718_v30 = vadd.f32 %v5717_v19, %v5679_v33  ;;  %v5802_v50 = vadd.f32 %v5763_v63, %v5762_v5  ;;  %v10422_v37 = vpop.f32.mrb[92].mxu0  ;;  %v11509_v19 = vld [vmem:[#allocation18_spill] sm:$0xff] }
 0x57b   :  { %v10424_v35 = vpop.f32.mrb[93].mxu0  ;;  %v5683_v20 = vmul.f32 %v10422_v37, %v9928_v52 }
 0x57c   :  { %v5803_v46 = vadd.f32 %v5802_v50, %v5764_v22  ;;  %v5681_v43 = vmul.f32 %v10424_v35, %v9924_v58  ;;  %v5719_v9 = vadd.f32 %v5718_v30, %v5680_v25  ;;  %v10429_v34 = vpop.f32.mrb[94].mxu0 }
 0x57d   :  { %v10433_v54 = vpop.f32.mrb[95].mxu0  ;;  %v5684_v2 = vmul.f32 %v10429_v34, %v11503_v59  ;;  %v5768_v3 = vmul.f32 %v10422_v37, %v5683_v20 }
 0x57e   :  { %v5720_v36 = vadd.f32 %v5719_v9, %v5681_v43  ;;  %v5766_v56 = vmul.f32 %v5681_v43, %v10424_v35  ;;  %v5804_v32 = vadd.f32 %v5803_v46, %v5765_v15  ;;  %v5682_v53 = vmul.f32 %v10433_v54, %v11502_v28  ;;  %v11510_v46 = vld [vmem:[#allocation9_spill] sm:$0xff] }
 0x57f   :  { %v5769_v31 = vmul.f32 %v10429_v34, %v5684_v2 }
 0x580   :  { %v5805_v49 = vadd.f32 %v5804_v32, %v5766_v56  ;;  %v5721_v58 = vadd.f32 %v5720_v36, %v5682_v53  ;;  %v5767_v41 = vmul.f32 %v5682_v53, %v10433_v54 }
 0x582   :  { %v5722_v13 = vadd.f32 %v5721_v58, %v5683_v20  ;;  %v5806_v52 = vadd.f32 %v5805_v49, %v5767_v41  ;;  %v10442_v39 = vpop.f32.mrb[96].mxu0  ;;  %v11511_v20 = vld [vmem:[#allocation20_spill] sm:$0xff] }
 0x583   :  { %v10444_v27 = vpop.f32.mrb[97].mxu0  ;;  %v5687_v7 = vmul.f32 %v10442_v39, %v11505_v23 }
 0x584   :  { %v5807_v45 = vadd.f32 %v5806_v52, %v5768_v3  ;;  %v5685_v14 = vmul.f32 %v10444_v27, %v11504_v55  ;;  %v5723_v1 = vadd.f32 %v5722_v13, %v5684_v2  ;;  %v10449_v6 = vpop.f32.mrb[98].mxu0  ;;  %v11512_v3 = vld [vmem:[#allocation22_spill] sm:$0xff] }
 0x585   :  { %v10453_v11 = vpop.f32.mrb[99].mxu0  ;;  %v5688_v44 = vmul.f32 %v10449_v6, %v11507_v47  ;;  %v5772_v61 = vmul.f32 %v10442_v39, %v5687_v7 }
 0x586   :  { %v5724_v62 = vadd.f32 %v5723_v1, %v5685_v14  ;;  %v5770_v12 = vmul.f32 %v5685_v14, %v10444_v27  ;;  %v5808_v18 = vadd.f32 %v5807_v45, %v5769_v31  ;;  %v5686_v42 = vmul.f32 %v10453_v11, %v11506_v57  ;;  %v11513_v45 = vld [vmem:[#allocation24_spill] sm:$0xff]  ;;  %v11515_v57 = vld [vmem:[#allocation23_spill] sm:$0xff] }
 0x587   :  { %v5773_v33 = vmul.f32 %v10449_v6, %v5688_v44 }
 0x588   :  { %v5809_v51 = vadd.f32 %v5808_v18, %v5770_v12  ;;  %v5725_v26 = vadd.f32 %v5724_v62, %v5686_v42  ;;  %v5771_v10 = vmul.f32 %v5686_v42, %v10453_v11  ;;  %v11514_v62 = vld [vmem:[#allocation19_spill] sm:$0xff] }
 0x58a   :  { %v5726_v48 = vadd.f32 %v5725_v26, %v5687_v7  ;;  %v5810_v21 = vadd.f32 %v5809_v51, %v5771_v10  ;;  %v10462_v8 = vpop.f32.mrb[100].mxu0 }
 0x58b   :  { %v10464_v4 = vpop.f32.mrb[101].mxu0  ;;  %v5691_v63 = vmul.f32 %v10462_v8, %v11509_v19  ;;  %v11517_v19 = vld [vmem:[#allocation25_spill] sm:$0xff] }
 0x58c   :  { %v5811_v29 = vadd.f32 %v5810_v21, %v5772_v61  ;;  %v5689_v5 = vmul.f32 %v10464_v4, %v11508_v0  ;;  %v5727_v24 = vadd.f32 %v5726_v48, %v5688_v44  ;;  %v10469_v25 = vpop.f32.mrb[102].mxu0 }
 0x58d   :  { %v10473_v22 = vpop.f32.mrb[103].mxu0  ;;  %v5692_v36 = vmul.f32 %v10469_v25, %v11511_v20  ;;  %v5776_v28 = vmul.f32 %v10462_v8, %v5691_v63 }
 0x58e   :  { %v5728_v30 = vadd.f32 %v5727_v24, %v5689_v5  ;;  %v5774_v50 = vmul.f32 %v5689_v5, %v10464_v4  ;;  %v5812_v15 = vadd.f32 %v5811_v29, %v5773_v33  ;;  %v5690_v43 = vmul.f32 %v10473_v22, %v11510_v46  ;;  %v11516_v29 = vld [vmem:[#allocation21_spill] sm:$0xff] }
 0x58f   :  { %v5777_v58 = vmul.f32 %v10469_v25, %v5692_v36 }
 0x590   :  { %v5813_v9 = vadd.f32 %v5812_v15, %v5774_v50  ;;  %v5729_v56 = vadd.f32 %v5728_v30, %v5690_v43  ;;  %v5775_v32 = vmul.f32 %v5690_v43, %v10473_v22  ;;  %v11518_v43 = vld [vmem:[#allocation26_spill] sm:$0xff] }
 0x592   :  { %v5730_v53 = vadd.f32 %v5729_v56, %v5691_v63  ;;  %v5814_v49 = vadd.f32 %v5813_v9, %v5775_v32  ;;  %v10482_v59 = vpop.f32.mrb[104].mxu0 }
 0x593   :  { %v10484_v2 = vpop.f32.mrb[105].mxu0  ;;  %v5695_v55 = vmul.f32 %v10482_v59, %v11513_v45  ;;  %v11520_v45 = vld [vmem:[#allocation27_spill] sm:$0xff] }
 0x594   :  { %v5815_v41 = vadd.f32 %v5814_v49, %v5776_v28  ;;  %v5693_v13 = vmul.f32 %v10484_v2, %v11512_v3  ;;  %v5731_v52 = vadd.f32 %v5730_v53, %v5692_v36  ;;  %v10489_v31 = vpop.f32.mrb[106].mxu0  ;;  %v11519_v36 = vld [vmem:[#allocation30_spill] sm:$0xff] }
 0x595   :  { %v10493_v14 = vpop.f32.mrb[107].mxu0  ;;  %v5696_v42 = vmul.f32 %v10489_v31, %v11515_v57  ;;  %v5780_v44 = vmul.f32 %v10482_v59, %v5695_v55 }
 0x596   :  { %v5732_v1 = vadd.f32 %v5731_v52, %v5693_v13  ;;  %v5778_v23 = vmul.f32 %v5693_v13, %v10484_v2  ;;  %v5816_v7 = vadd.f32 %v5815_v41, %v5777_v58  ;;  %v5694_v12 = vmul.f32 %v10493_v14, %v11514_v62 }
 0x597   :  { %v5781_v21 = vmul.f32 %v10489_v31, %v5696_v42 }
 0x598   :  { %v5817_v18 = vadd.f32 %v5816_v7, %v5778_v23  ;;  %v5733_v51 = vadd.f32 %v5732_v1, %v5694_v12  ;;  %v5779_v47 = vmul.f32 %v5694_v12, %v10493_v14  ;;  %v11521_v7 = vld [vmem:[#allocation33_spill] sm:$0xff] }
 0x59a   :  { %v5734_v26 = vadd.f32 %v5733_v51, %v5695_v55  ;;  %v5818_v10 = vadd.f32 %v5817_v18, %v5779_v47  ;;  %v10502_v61 = vpop.f32.mrb[108].mxu0  ;;  %v11522_v51 = vld [vmem:[#allocation31_spill] sm:$0xff] }
 0x59b   :  { %v10504_v48 = vpop.f32.mrb[109].mxu0  ;;  %v5699_v63 = vmul.f32 %v10502_v61, %v11517_v19 }
 0x59c   :  { %v5819_v33 = vadd.f32 %v5818_v10, %v5780_v44  ;;  %v5697_v0 = vmul.f32 %v10504_v48, %v11516_v29  ;;  %v5735_v5 = vadd.f32 %v5734_v26, %v5696_v42  ;;  %v10509_v24 = vpop.f32.mrb[110].mxu0  ;;  %v11523_v26 = vld [vmem:[#allocation32_spill] sm:$0xff] }
 0x59d   :  { %v10513_v30 = vpop.f32.mrb[111].mxu0  ;;  %v5700_v56 = vmul.f32 %v10509_v24, %v11519_v36  ;;  %v5784_v53 = vmul.f32 %v10502_v61, %v5699_v63  ;;  %v11525_v36 = vld [vmem:[#allocation13_spill] sm:$0xff] }
 0x59e   :  { %v5736_v50 = vadd.f32 %v5735_v5, %v5697_v0  ;;  %v5782_v15 = vmul.f32 %v5697_v0, %v10504_v48  ;;  %v5820_v46 = vadd.f32 %v5819_v33, %v5781_v21  ;;  %v5698_v9 = vmul.f32 %v10513_v30, %v11518_v43 }
 0x59f   :  { %v5785_v13 = vmul.f32 %v10509_v24, %v5700_v56 }
 0x5a0   :  { %v5821_v20 = vadd.f32 %v5820_v46, %v5782_v15  ;;  %v5737_v32 = vadd.f32 %v5736_v50, %v5698_v9  ;;  %v5783_v28 = vmul.f32 %v5698_v9, %v10513_v30  ;;  %v11524_v46 = vld [vmem:[#allocation34_spill] sm:$0xff] }
 0x5a2   :  { %v5738_v49 = vadd.f32 %v5737_v32, %v5699_v63  ;;  %v5822_v58 = vadd.f32 %v5821_v20, %v5783_v28  ;;  %v10522_v41 = vpop.f32.mrb[112].mxu0 }
 0x5a3   :  { %v10524_v3 = vpop.f32.mrb[113].mxu0  ;;  %v5703_v62 = vmul.f32 %v10522_v41, %v11521_v7 }
 0x5a4   :  { %v5823_v52 = vadd.f32 %v5822_v58, %v5784_v53  ;;  %v5701_v55 = vmul.f32 %v10524_v3, %v11520_v45  ;;  %v5739_v1 = vadd.f32 %v5738_v49, %v5700_v56  ;;  %v10529_v23 = vpop.f32.mrb[114].mxu0  ;;  %v11526_v58 = vld [vmem:[#allocation38_spill] sm:$0xff] }
 0x5a5   :  { %v10533_v12 = vpop.f32.mrb[115].mxu0  ;;  %v5704_v10 = vmul.f32 %v10529_v23, %v11523_v26  ;;  %v5788_v29 = vmul.f32 %v10522_v41, %v5703_v62  ;;  %v11527_v45 = vld [vmem:[#allocation10_spill] sm:$0xff]  ;;  %v11528_v26 = vld [vmem:[#allocation37_spill] sm:$0xff] }
 0x5a6   :  { %v5740_v18 = vadd.f32 %v5739_v1, %v5701_v55  ;;  %v5786_v57 = vmul.f32 %v5701_v55, %v10524_v3  ;;  %v5824_v42 = vadd.f32 %v5823_v52, %v5785_v13  ;;  %v5702_v47 = vmul.f32 %v10533_v12, %v11522_v51 }
 0x5a7   :  { %v5789_v50 = vmul.f32 %v10529_v23, %v5704_v10 }
 0x5a8   :  { %v5825_v44 = vadd.f32 %v5824_v42, %v5786_v57  ;;  %v5741_v21 = vadd.f32 %v5740_v18, %v5702_v47  ;;  %v5787_v33 = vmul.f32 %v5702_v47, %v10533_v12 }
 0x5aa   :  { %v5742_v0 = vadd.f32 %v5741_v21, %v5703_v62  ;;  %v5826_v5 = vadd.f32 %v5825_v44, %v5787_v33  ;;  %v10542_v19 = vpop.f32.mrb[116].mxu0 }
 0x5ab   :  { %v10544_v63 = vpop.f32.mrb[117].mxu0  ;;  %v5707_v56 = vmul.f32 %v10542_v19, %v11525_v36 }
 0x5ac   :  { %v5827_v15 = vadd.f32 %v5826_v5, %v5788_v29  ;;  %v5705_v43 = vmul.f32 %v10544_v63, %v11524_v46  ;;  %v5743_v9 = vadd.f32 %v5742_v0, %v5704_v10  ;;  %v10549_v20 = vpop.f32.mrb[118].mxu0  ;;  %v11529_v29 = vld [vmem:[#allocation12_spill] sm:$0xff] }
 0x5ad   :  { %v10553_v32 = vpop.f32.mrb[119].mxu0  ;;  %v5708_v55 = vmul.f32 %v10549_v20, %v11527_v45  ;;  %v5792_v62 = vmul.f32 %v10542_v19, %v5707_v56 }
 0x5ae   :  { %v5744_v28 = vadd.f32 %v5743_v9, %v5705_v43  ;;  %v5790_v53 = vmul.f32 %v5705_v43, %v10544_v63  ;;  %v5828_v49 = vadd.f32 %v5827_v15, %v5789_v50  ;;  %v5706_v13 = vmul.f32 %v10553_v32, %v11526_v58  ;;  %v11530_v43 = vld [vmem:[#allocation45_spill] sm:$0xff] }
 0x5af   :  { %v5793_v47 = vmul.f32 %v10549_v20, %v5708_v55 }
 0x5b0   :  { %v5829_v52 = vadd.f32 %v5828_v49, %v5790_v53  ;;  %v5745_v1 = vadd.f32 %v5744_v28, %v5706_v13  ;;  %v5791_v7 = vmul.f32 %v5706_v13, %v10553_v32 }
 0x5b2   :  { %v5746_v18 = vadd.f32 %v5745_v1, %v5707_v56  ;;  %v5830_v57 = vadd.f32 %v5829_v52, %v5791_v7  ;;  %v10562_v42 = vpop.f32.mrb[120].mxu0  ;;  %v11531_v56 = vld [vmem:[#allocation29_spill] sm:$0xff] }
 0x5b3   :  { %v10564_v51 = vpop.f32.mrb[121].mxu0  ;;  %v5711_v0 = vmul.f32 %v10562_v42, %v11529_v29 }
 0x5b4   :  { %v5831_v44 = vadd.f32 %v5830_v57, %v5792_v62  ;;  %v5709_v10 = vmul.f32 %v10564_v51, %v11528_v26  ;;  %v5747_v21 = vadd.f32 %v5746_v18, %v5708_v55  ;;  %v10569_v33 = vpop.f32.mrb[122].mxu0  ;;  %v11534_v62 = vld [vmem:[#allocation55_spill] sm:$0xff] }
 0x5b5   :  { %v10573_v5 = vpop.f32.mrb[123].mxu0  ;;  %v5712_v28 = vmul.f32 %v10569_v33, %v11531_v56  ;;  %v5796_v58 = vmul.f32 %v10562_v42, %v5711_v0 }
 0x5b6   :  { %v5748_v50 = vadd.f32 %v5747_v21, %v5709_v10  ;;  %v5794_v15 = vmul.f32 %v5709_v10, %v10564_v51  ;;  %v5832_v46 = vadd.f32 %v5831_v44, %v5793_v47  ;;  %v5710_v9 = vmul.f32 %v10573_v5, %v11530_v43  ;;  %v11535_v44 = vld [vmem:[#allocation57_spill] sm:$0xff]  ;;  %v11537_v43 = vld [vmem:[#allocation28_spill] sm:$0xff] }
 0x5b7   :  { %v5797_v1 = vmul.f32 %v10569_v33, %v5712_v28 }
 0x5b8   :  { %v5833_v36 = vadd.f32 %v5832_v46, %v5794_v15  ;;  %v5749_v53 = vadd.f32 %v5748_v50, %v5710_v9  ;;  %v5795_v49 = vmul.f32 %v5710_v9, %v10573_v5  ;;  %v11536_v50 = vld [vmem:[#allocation56_spill] sm:$0xff] }
 0x5ba   :  { %v5750_v13 = vadd.f32 %v5749_v53, %v5711_v0  ;;  %v5834_v52 = vadd.f32 %v5833_v36, %v5795_v49  ;;  %v10582_v45 = vpop.f32.mrb[124].mxu0 }
 0x5bb   :  { %11532 = vst [vmem:[#allocation58_spill] sm:$0xff] %v10582_v45  ;;  %v10584_v55 = vpop.f32.mrb[125].mxu0  ;;  %v5715_v26 = vmul.f32 %v10582_v45, %v11535_v44 }
 0x5bc   :  { %11533 = vst [vmem:[#allocation53_spill] sm:$0xff] %v10584_v55  ;;  %v5835_v7 = vadd.f32 %v5834_v52, %v5796_v58  ;;  %v5713_v18 = vmul.f32 %v10584_v55, %v11534_v62  ;;  %v5751_v57 = vadd.f32 %v5750_v13, %v5712_v28  ;;  %v10589_v47 = vpop.f32.mrb[126].mxu0 }
 0x5bd   :  { %v10593_v10 = vpop.f32.mrb[127].mxu0  ;;  %v5716_v9 = vmul.f32 %v10589_v47, %v11537_v43  ;;  %v5800_v28 = vmul.f32 %v10582_v45, %v5715_v26 }
 0x5be   :  { %v5752_v21 = vadd.f32 %v5751_v57, %v5713_v18  ;;  %v5798_v29 = vmul.f32 %v5713_v18, %v10584_v55  ;;  %v5836_v0 = vadd.f32 %v5835_v7, %v5797_v1  ;;  %v5714_v15 = vmul.f32 %v10593_v10, %v11536_v50 }
 0x5bf   :  { %v5801_v58 = vmul.f32 %v10589_v47, %v5716_v9 }
 0x5c0   :  { %v5837_v46 = vadd.f32 %v5836_v0, %v5798_v29  ;;  %v5753_v36 = vadd.f32 %v5752_v21, %v5714_v15  ;;  %v5799_v56 = vmul.f32 %v5714_v15, %v10593_v10 }
 0x5c2   :  { %v5754_v53 = vadd.f32 %v5753_v36, %v5715_v26  ;;  %v5838_v49 = vadd.f32 %v5837_v46, %v5799_v56 }
 0x5c4   :  { %v5755_v13 = vadd.f32 %v5754_v53, %v5716_v9  ;;  %v5839_v52 = vadd.f32 %v5838_v49, %v5800_v28  ;;  %v10610_v28 = vld [vmem:[%s11006_s0 + $0x18] sm:$0xff]   ;;  %v10615_v53 = vld [vmem:[%s11006_s0 + $0x10] sm:$0xff]   ;;  %v10625_v49 = vld [vmem:[%s11006_s0 + $0x20] sm:$0xff]  }
 0x5c6   :  { %v5756_v62 = vrot.slane %v5755_v13, 4  ;;  %v5840_v1 = vadd.f32 %v5839_v52, %v5801_v58  ;;  %v10630_v58 = vld [vmem:[%s11006_s0 + $0x38] sm:$0xff]  }
 0x5c8   :  { %v5757_v7 = vadd.f32 %v5756_v62, %v5755_v13  ;;  %v5841_v18 = vrot.slane %v5840_v1, 4  ;;  %v10635_v13 = vld [vmem:[%s11006_s0 + $0x30] sm:$0xff]   ;;  %v10733_v62 = vld [vmem:[%s11006_s0 + $0xa8] sm:$0xff]  }
 0x5ca   :  { %v5758_v57 = vrot.slane %v5757_v7, 2  ;;  %v5842_v44 = vadd.f32 %v5841_v18, %v5840_v1  ;;  %v10648_v18 = vld [vmem:[%s11006_s0 + $0x40] sm:$0xff]  }
 0x5cc   :  { %v5759_v29 = vadd.f32 %v5758_v57, %v5757_v7  ;;  %v5843_v0 = vrot.slane %v5842_v44, 2  ;;  %v10643_v7 = vld [vmem:[%s11006_s0 + $0x48] sm:$0xff]  }
 0x5ce   :  { %v5760_v50 = vrot.slane %v5759_v29, 1  ;;  %v5844_v21 = vadd.f32 %v5843_v0, %v5842_v44  ;;  %v10690_v44 = vld [vmem:[%s11006_s0 + $0x70] sm:$0xff]   ;;  %v10716_v0 = vld [vmem:[%s11006_s0 + $0x98] sm:$0xff]  }
 0x5cf   :  { %11543 = vst [vmem:[#allocation44_spill] sm:$0xff] %v10690_v44  ;;  %11546 = vst [vmem:[#allocation17_spill] sm:$0xff] %v10716_v0 }
 0x5d0   :  { %v5761_v43 = vadd.f32 %v5760_v50, %v5759_v29  ;;  %v5845_v15 = vrot.slane %v5844_v21, 1  ;;  %v10657_v50 = vld [vmem:[%s11006_s0 + $0x58] sm:$0xff]   ;;  %v5847_v29 = vld [vmem:[%s11015_s9] sm:$0x1] }
 0x5d1   :  { %11538 = vst [vmem:[#allocation36_spill] sm:$0xff] %v10657_v50 }
 0x5d2   :  { %v5846_v55 = vadd.f32 %v5845_v15, %v5844_v21  ;;  %v10603_v45 = vmul.f32 0.0078125, %v5761_v43  ;;  %v10662_v21 = vld [vmem:[%s11006_s0 + $0x50] sm:$0xff]   ;;  %v10711_v15 = vld [vmem:[%s11006_s0 + $0x80] sm:$0xff]  }
 0x5d3   :  { %11539 = vst [vmem:[#allocation39_spill] sm:$0xff] %v10662_v21  ;;  %11545 = vst [vmem:[#allocation15_spill] sm:$0xff] %v10711_v15  ;;  %v10738_v43 = vld [vmem:[%s11006_s0 + $0xa0] sm:$0xff]  }
 0x5d4   :  { %v5850_v26 = vmul.f32 0.0078125, %v5846_v55  ;;  %v5851_v46 = vmul.f32 %v10603_v45, %v10603_v45  ;;  %v10620_v55 = vld [vmem:[%s11006_s0 + $0x28] sm:$0xff]   ;;  %v5848_v21 = vld [vmem:[%s11016_s10] sm:$0x1]  ;;  %v6355_v50 = vunpack.c.h.bf16 %v10738_v43 }
 0x5d6   :  { %v5852_v9 = vsub.f32 %v5850_v26, %v5851_v46  ;;  %v10685_v46 = vld [vmem:[%s11006_s0 + $0x78] sm:$0xff]   ;;  %v10699_v26 = vld [vmem:[%s11006_s0 + $0x88] sm:$0xff]  }
 0x5d7   :  { %11542 = vst [vmem:[#allocation42_spill] sm:$0xff] %v10685_v46  ;;  %11544 = vst [vmem:[#allocation52_spill] sm:$0xff] %v10699_v26 }
 0x5d8   :  { %v5853_v36 = vmax.f32 %v5852_v9, 0.0  ;;  %v10671_v9 = vld [vmem:[%s11006_s0 + $0x68] sm:$0xff]  }
 0x5d9   :  { %11540 = vst [vmem:[#allocation41_spill] sm:$0xff] %v10671_v9 }
 0x5da   :  { %v5854_v56 = vadd.f32 1e-05, %v5853_v36  ;;  %v10676_v36 = vld [vmem:[%s11006_s0 + $0x60] sm:$0xff]  }
 0x5db   :  { %11541 = vst [vmem:[#allocation14_spill] sm:$0xff] %v10676_v36 }
 0x5dc   :  { %7777 = vrsqrt.f32 %v5854_v56  ;;  %v10725_v56 = vld [vmem:[%s11006_s0 + $0x90] sm:$0xff]   ;;  %s7839_s0 = smov [#allocation6]  }
 0x5dd   :  { %s6156_s10 = sshll.u32 %s7839_s0, 4  ;;  %s6157_s10 = int_to_ptr.vmem [resolvable:$true] %s6156_s10 }
 0x5de   :  { %s7809_s15 = scalar_lea.vmem %s6157_s10, 5120  ;;  %p7814_p9 = scmp.lt.s32.totalorder %s6157_s10, %s6157_s10 }
 0x5df   :  { %p7810_p8 = scmp.ne.s32.totalorder %s6157_s10, %s7809_s15  ;;  %p7815_p10 = scmp.lt.s32.totalorder %s7809_s15, %s7809_s15 }
 0x5e1   :  { %p7816_p11 = por %p7815_p10, %p7814_p9 }
 0x5e3   :  { %p7817_p12 = pnand %p7816_p11, %p7810_p8 }
 0x5e6   :  { %v7778_v57 = vpop.eup %7777 }
 0x5e7   :  { %v5856_v1 = vmul.f32 %v7778_v57, %v5847_v29 }
 0x5e9   :  { %v5857_v36 = vmul.f32 %v5856_v1, %v10603_v45  ;;  %v5943_v57 = vrot.slane %v5856_v1, %v11494_v38 }
 0x5eb   :  { %v5858_v52 = vsub.f32 %v5848_v21, %v5857_v36  ;;  %v5982_v0 = vmul.f32 %v5943_v57, %v10593_v10  ;;  %v5945_v15 = vmul.f32 %v5943_v57, %v10405_v16  ;;  %v5946_v26 = vmul.f32 %v5943_v57, %v10411_v60 }
 0x5ec   :  { %v5947_v44 = vmul.f32 %v10403_v17, %v5943_v57  ;;  %v5948_v45 = vmul.f32 %v10409_v40, %v5943_v57  ;;  %v5949_v1 = vmul.f32 %v5943_v57, %v10424_v35  ;;  %v5950_v29 = vmul.f32 %v5943_v57, %v10433_v54 }
 0x5ed   :  { %v10763_v46 = vrot.slane %v5858_v52, %v11494_v38  ;;  %v5951_v9 = vmul.f32 %v10422_v37, %v5943_v57  ;;  %v5952_v21 = vmul.f32 %v10429_v34, %v5943_v57  ;;  %v5953_v10 = vmul.f32 %v5943_v57, %v10444_v27 }
 0x5ee   :  { %v5954_v16 = vmul.f32 %v5943_v57, %v10453_v11  ;;  %v5955_v60 = vmul.f32 %v10442_v39, %v5943_v57  ;;  %v5956_v17 = vmul.f32 %v10449_v6, %v5943_v57  ;;  %v5957_v40 = vmul.f32 %v5943_v57, %v10464_v4 }
 0x5ef   :  { %v6028_v35 = vadd.f32 %v10763_v46, %v5982_v0  ;;  %v5958_v54 = vmul.f32 %v5943_v57, %v10473_v22  ;;  %v5959_v38 = vmul.f32 %v10462_v8, %v5943_v57  ;;  %v5960_v37 = vmul.f32 %v10469_v25, %v5943_v57 }
 0x5f0   :  { %v5961_v34 = vmul.f32 %v5943_v57, %v10484_v2  ;;  %v5962_v27 = vmul.f32 %v5943_v57, %v10493_v14  ;;  %v5963_v11 = vmul.f32 %v10482_v59, %v5943_v57  ;;  %v5964_v39 = vmul.f32 %v10489_v31, %v5943_v57 }
 0x5f1   :  { %v6068_v52 = vadd.f32 %v6355_v50, %v6028_v35  ;;  %v5965_v6 = vmul.f32 %v5943_v57, %v10504_v48  ;;  %v5966_v4 = vmul.f32 %v5943_v57, %v10513_v30  ;;  %v5967_v0 = vmul.f32 %v10502_v61, %v5943_v57 }
 0x5f2   :  { %v5968_v22 = vmul.f32 %v10509_v24, %v5943_v57  ;;  %v5969_v8 = vmul.f32 %v5943_v57, %v10524_v3  ;;  %v5970_v25 = vmul.f32 %v5943_v57, %v10533_v12  ;;  %v5971_v2 = vmul.f32 %v10522_v41, %v5943_v57  ;;  %v11547_v12 = vld [vmem:[#allocation53_spill] sm:$0xff] }
 0x5f3   :  { %v6108_v14 = vmax.f32 %v6068_v52, 0.0  ;;  %v5972_v59 = vmul.f32 %v10529_v23, %v5943_v57  ;;  %v5973_v31 = vmul.f32 %v5943_v57, %v10544_v63  ;;  %v5974_v50 = vmul.f32 %v5943_v57, %v10553_v32  ;;  %v11548_v23 = vld [vmem:[#allocation58_spill] sm:$0xff] }
 0x5f4   :  { %v5975_v48 = vmul.f32 %v10542_v19, %v5943_v57  ;;  %v5976_v30 = vmul.f32 %v10549_v20, %v5943_v57  ;;  %v5977_v61 = vmul.f32 %v5943_v57, %v10564_v51  ;;  %v5978_v24 = vmul.f32 %v5943_v57, %v10573_v5 }
 0x5f5   :  { %6148 = vst [vmem:[#allocation6 + $0x128] sm:$0xff] %v6108_v14  ;;  %v5979_v3 = vmul.f32 %v10562_v42, %v5943_v57  ;;  %v5980_v41 = vmul.f32 %v10569_v33, %v5943_v57  ;;  %v5981_v36 = vmul.f32 %v5943_v57, %v11547_v12  ;;  %v5983_v35 = vmul.f32 %v11548_v23, %v5943_v57 }
 0x5f6   :  { %v5984_v63 = vmul.f32 %v10589_v47, %v5943_v57  ;;  %v5991_v32 = vadd.f32 %v10763_v46, %v5945_v15  ;;  %v5992_v19 = vadd.f32 %v10763_v46, %v5946_v26  ;;  %v5993_v20 = vadd.f32 %v10763_v46, %v5947_v44 }
 0x5f7   :  { %v5994_v51 = vadd.f32 %v10763_v46, %v5948_v45  ;;  %v5995_v5 = vadd.f32 %v10763_v46, %v5949_v1  ;;  %v5996_v42 = vadd.f32 %v10763_v46, %v5950_v29  ;;  %v5997_v33 = vadd.f32 %v10763_v46, %v5951_v9 }
 0x5f8   :  { %v5998_v52 = vadd.f32 %v10763_v46, %v5952_v21  ;;  %v5999_v14 = vadd.f32 %v10763_v46, %v5953_v10  ;;  %v6000_v47 = vadd.f32 %v10763_v46, %v5954_v16  ;;  %v6001_v15 = vadd.f32 %v10763_v46, %v5955_v60 }
 0x5f9   :  { %v6002_v26 = vadd.f32 %v10763_v46, %v5956_v17  ;;  %v6003_v44 = vadd.f32 %v10763_v46, %v5957_v40  ;;  %v6004_v57 = vadd.f32 %v10763_v46, %v5958_v54  ;;  %v6005_v45 = vadd.f32 %v10763_v46, %v5959_v38 }
 0x5fa   :  { %v6006_v29 = vadd.f32 %v10763_v46, %v5960_v37  ;;  %v6007_v9 = vadd.f32 %v10763_v46, %v5961_v34  ;;  %v6008_v1 = vadd.f32 %v10763_v46, %v5962_v27  ;;  %v6009_v21 = vadd.f32 %v10763_v46, %v5963_v11 }
 0x5fb   :  { %v6010_v10 = vadd.f32 %v10763_v46, %v5964_v39  ;;  %v6011_v16 = vadd.f32 %v10763_v46, %v5965_v6  ;;  %v6012_v60 = vadd.f32 %v10763_v46, %v5966_v4  ;;  %v6013_v17 = vadd.f32 %v10763_v46, %v5967_v0 }
 0x5fc   :  { %v6014_v40 = vadd.f32 %v10763_v46, %v5968_v22  ;;  %v6015_v54 = vadd.f32 %v10763_v46, %v5969_v8  ;;  %v6016_v38 = vadd.f32 %v10763_v46, %v5970_v25  ;;  %v6017_v37 = vadd.f32 %v10763_v46, %v5971_v2 }
 0x5fd   :  { %v6018_v34 = vadd.f32 %v10763_v46, %v5972_v59  ;;  %v6019_v27 = vadd.f32 %v10763_v46, %v5973_v31  ;;  %v6020_v11 = vadd.f32 %v10763_v46, %v5974_v50  ;;  %v6021_v39 = vadd.f32 %v10763_v46, %v5975_v48 }
 0x5fe   :  { %v6022_v6 = vadd.f32 %v10763_v46, %v5976_v30  ;;  %v6023_v4 = vadd.f32 %v10763_v46, %v5977_v61  ;;  %v6024_v0 = vadd.f32 %v10763_v46, %v5978_v24  ;;  %v6025_v22 = vadd.f32 %v10763_v46, %v5979_v3 }
 0x5ff   :  { %v6026_v8 = vadd.f32 %v10763_v46, %v5980_v41  ;;  %v6027_v25 = vadd.f32 %v10763_v46, %v5981_v36  ;;  %v6029_v2 = vadd.f32 %v10763_v46, %v5983_v35  ;;  %v6030_v59 = vadd.f32 %v10763_v46, %v5984_v63 }
 0x600   :  { %v11549_v31 = vunpack.c.l.bf16 %v10615_v53  ;;  %v11550_v48 = vunpack.c.h.bf16 %v10615_v53  ;;  %v11551_v61 = vunpack.c.l.bf16 %v10610_v28  ;;  %v11552_v24 = vunpack.c.h.bf16 %v10610_v28 }
 0x601   :  { %v11553_v41 = vunpack.c.l.bf16 %v10625_v49  ;;  %v11554_v36 = vunpack.c.h.bf16 %v10625_v49  ;;  %v11555_v46 = vunpack.c.l.bf16 %v10620_v55  ;;  %v11557_v53 = vunpack.c.l.bf16 %v10635_v13 }
 0x602   :  { %v6031_v50 = vadd.f32 %v11549_v31, %v5991_v32  ;;  %v6032_v30 = vadd.f32 %v11550_v48, %v5992_v19  ;;  %v6033_v12 = vadd.f32 %v11551_v61, %v5993_v20  ;;  %v6034_v3 = vadd.f32 %v11552_v24, %v5994_v51 }
 0x603   :  { %v6035_v23 = vadd.f32 %v11553_v41, %v5995_v5  ;;  %v6036_v35 = vadd.f32 %v11554_v36, %v5996_v42  ;;  %v6037_v63 = vadd.f32 %v11555_v46, %v5997_v33  ;;  %v11556_v32 = vunpack.c.h.bf16 %v10620_v55  ;;  %v11571_v46 = vld [vmem:[#allocation14_spill] sm:$0xff] }
 0x604   :  { %v6039_v19 = vadd.f32 %v11557_v53, %v5999_v14  ;;  %v11558_v20 = vunpack.c.h.bf16 %v10635_v13  ;;  %v11559_v28 = vunpack.c.l.bf16 %v10630_v58  ;;  %v11560_v5 = vunpack.c.h.bf16 %v10630_v58  ;;  %v11574_v53 = vld [vmem:[#allocation41_spill] sm:$0xff] }
 0x605   :  { %v6038_v31 = vadd.f32 %v11556_v32, %v5998_v52  ;;  %v11561_v49 = vunpack.c.l.bf16 %v10648_v18  ;;  %v11562_v33 = vunpack.c.h.bf16 %v10648_v18  ;;  %v11563_v55 = vunpack.c.l.bf16 %v10643_v7 }
 0x606   :  { %v6040_v48 = vadd.f32 %v11558_v20, %v6000_v47  ;;  %v6041_v51 = vadd.f32 %v11559_v28, %v6001_v15  ;;  %v6042_v61 = vadd.f32 %v11560_v5, %v6002_v26  ;;  %v11564_v13 = vunpack.c.h.bf16 %v10643_v7  ;;  %v11565_v47 = vld [vmem:[#allocation39_spill] sm:$0xff]  ;;  %v11577_v5 = vld [vmem:[#allocation44_spill] sm:$0xff] }
 0x607   :  { %v6043_v42 = vadd.f32 %v11561_v49, %v6003_v44  ;;  %v10866_v24 = vadd.f32 %v11562_v33, %v6004_v57  ;;  %v10870_v52 = vadd.f32 %v11563_v55, %v6005_v45  ;;  %v11566_v15 = vunpack.c.l.bf16 %v11565_v47  ;;  %v11568_v44 = vld [vmem:[#allocation36_spill] sm:$0xff]  ;;  %v11580_v55 = vld [vmem:[#allocation42_spill] sm:$0xff] }
 0x608   :  { %v10874_v14 = vadd.f32 %v11564_v13, %v6006_v29  ;;  %v11567_v58 = vunpack.c.h.bf16 %v11565_v47  ;;  %v11569_v18 = vunpack.c.l.bf16 %v11568_v44  ;;  %v11570_v36 = vunpack.c.h.bf16 %v11568_v44 }
 0x609   :  { %v10878_v41 = vadd.f32 %v11566_v15, %v6007_v9  ;;  %v11572_v7 = vunpack.c.l.bf16 %v11571_v46  ;;  %v11573_v32 = vunpack.c.h.bf16 %v11571_v46  ;;  %v11575_v20 = vunpack.c.l.bf16 %v11574_v53  ;;  %v11583_v15 = vld [vmem:[#allocation15_spill] sm:$0xff] }
 0x60a   :  { %v10882_v26 = vadd.f32 %v11567_v58, %v6008_v1  ;;  %v10886_v57 = vadd.f32 %v11569_v18, %v6009_v21  ;;  %v10890_v45 = vadd.f32 %v11570_v36, %v6010_v10  ;;  %v11576_v28 = vunpack.c.h.bf16 %v11574_v53  ;;  %v11586_v18 = vld [vmem:[#allocation52_spill] sm:$0xff]  ;;  %v11591_v53 = vld [vmem:[#allocation17_spill] sm:$0xff] }
 0x60b   :  { %v10894_v29 = vadd.f32 %v11572_v7, %v6011_v16  ;;  %v10898_v9 = vadd.f32 %v11573_v32, %v6012_v60  ;;  %v10902_v1 = vadd.f32 %v11575_v20, %v6013_v17  ;;  %v11578_v49 = vunpack.c.l.bf16 %v11577_v5 }
 0x60c   :  { %v10906_v21 = vadd.f32 %v11576_v28, %v6014_v40  ;;  %v11579_v33 = vunpack.c.h.bf16 %v11577_v5  ;;  %v11581_v13 = vunpack.c.l.bf16 %v11580_v55  ;;  %v11582_v47 = vunpack.c.h.bf16 %v11580_v55 }
 0x60d   :  { %v10910_v10 = vadd.f32 %v11578_v49, %v6015_v54  ;;  %v11584_v58 = vunpack.c.l.bf16 %v11583_v15  ;;  %v11585_v44 = vunpack.c.h.bf16 %v11583_v15  ;;  %v11587_v36 = vunpack.c.l.bf16 %v11586_v18 }
 0x60e   :  { %v10914_v16 = vadd.f32 %v11579_v33, %v6016_v38  ;;  %v10918_v60 = vadd.f32 %v11581_v13, %v6017_v37  ;;  %v10922_v17 = vadd.f32 %v11582_v47, %v6018_v34  ;;  %v11588_v46 = vunpack.c.h.bf16 %v11586_v18 }
 0x60f   :  { %v10926_v40 = vadd.f32 %v11584_v58, %v6019_v27  ;;  %v10930_v54 = vadd.f32 %v11585_v44, %v6020_v11  ;;  %v10934_v38 = vadd.f32 %v11587_v36, %v6021_v39  ;;  %v11589_v7 = vunpack.c.l.bf16 %v10725_v56 }
 0x610   :  { %v10938_v37 = vadd.f32 %v11588_v46, %v6022_v6  ;;  %v11590_v32 = vunpack.c.h.bf16 %v10725_v56  ;;  %v11592_v20 = vunpack.c.l.bf16 %v11591_v53  ;;  %v11593_v28 = vunpack.c.h.bf16 %v11591_v53 }
 0x611   :  { %v10942_v34 = vadd.f32 %v11589_v7, %v6023_v4  ;;  %v11594_v5 = vunpack.c.l.bf16 %v10738_v43  ;;  %v11595_v49 = vunpack.c.l.bf16 %v10733_v62  ;;  %v11596_v56 = vunpack.c.h.bf16 %v10733_v62 }
 0x612   :  { %v10946_v27 = vadd.f32 %v11590_v32, %v6024_v0  ;;  %v10950_v11 = vadd.f32 %v11592_v20, %v6025_v22  ;;  %v10954_v39 = vadd.f32 %v11593_v28, %v6026_v8  ;;  %v6071_v33 = vmax.f32 %v6031_v50, 0.0 }
 0x613   :  { %v10958_v6 = vadd.f32 %v11594_v5, %v6027_v25  ;;  %v10962_v4 = vadd.f32 %v11595_v49, %v6029_v2  ;;  %v10966_v0 = vadd.f32 %v11596_v56, %v6030_v59  ;;  %v6072_v55 = vmax.f32 %v6032_v30, 0.0 }
 0x614   :  { %v6073_v22 = vmax.f32 %v6033_v12, 0.0  ;;  %v6074_v13 = vmax.f32 %v6034_v3, 0.0  ;;  %v6075_v47 = vmax.f32 %v6035_v23, 0.0  ;;  %v6076_v15 = vmax.f32 %v6036_v35, 0.0  ;;  %6111 = vst [vmem:[#allocation6] sm:$0xff] %v6071_v33 }
 0x615   :  { %v6077_v8 = vmax.f32 %v6037_v63, 0.0  ;;  %v6078_v58 = vmax.f32 %v6038_v31, 0.0  ;;  %v6079_v44 = vmax.f32 %v6039_v19, 0.0  ;;  %v6080_v43 = vmax.f32 %v6040_v48, 0.0  ;;  %6112 = vst [vmem:[#allocation6 + $0x8] sm:$0xff] %v6072_v55 }
 0x616   :  { %v6081_v25 = vmax.f32 %v6041_v51, 0.0  ;;  %v6082_v18 = vmax.f32 %v6042_v61, 0.0  ;;  %v6083_v36 = vmax.f32 %v6043_v42, 0.0  ;;  %6113 = vst [vmem:[#allocation6 + $0x10] sm:$0xff] %v6073_v22  ;;  %6114 = vst [vmem:[#allocation6 + $0x18] sm:$0xff] %v6074_v13  ;;  %v6084_v62 = vmax.f32 %v10866_v24, 0.0 }
 0x617   :  { %6115 = vst [vmem:[#allocation6 + $0x20] sm:$0xff] %v6075_v47  ;;  %v6085_v2 = vmax.f32 %v10870_v52, 0.0  ;;  %v6086_v59 = vmax.f32 %v10874_v14, 0.0  ;;  %v6087_v50 = vmax.f32 %v10878_v41, 0.0  ;;  %6116 = vst [vmem:[#allocation6 + $0x28] sm:$0xff] %v6076_v15  ;;  %v6088_v30 = vmax.f32 %v10882_v26, 0.0 }
 0x618   :  { %6117 = vst [vmem:[#allocation6 + $0x30] sm:$0xff] %v6077_v8  ;;  %6118 = vst [vmem:[#allocation6 + $0x38] sm:$0xff] %v6078_v58  ;;  %v6089_v12 = vmax.f32 %v10886_v57, 0.0  ;;  %v6090_v3 = vmax.f32 %v10890_v45, 0.0  ;;  %v6091_v23 = vmax.f32 %v10894_v29, 0.0  ;;  %v6092_v35 = vmax.f32 %v10898_v9, 0.0 }
 0x619   :  { %6119 = vst [vmem:[#allocation6 + $0x40] sm:$0xff] %v6079_v44  ;;  %6120 = vst [vmem:[#allocation6 + $0x48] sm:$0xff] %v6080_v43  ;;  %v6093_v63 = vmax.f32 %v10902_v1, 0.0  ;;  %v6094_v31 = vmax.f32 %v10906_v21, 0.0  ;;  %v6095_v19 = vmax.f32 %v10910_v10, 0.0  ;;  %v6096_v48 = vmax.f32 %v10914_v16, 0.0 }
 0x61a   :  { %6121 = vst [vmem:[#allocation6 + $0x50] sm:$0xff] %v6081_v25  ;;  %6122 = vst [vmem:[#allocation6 + $0x58] sm:$0xff] %v6082_v18  ;;  %v6097_v51 = vmax.f32 %v10918_v60, 0.0  ;;  %v6098_v61 = vmax.f32 %v10922_v17, 0.0  ;;  %v6099_v42 = vmax.f32 %v10926_v40, 0.0  ;;  %v6100_v24 = vmax.f32 %v10930_v54, 0.0 }
 0x61b   :  { %6123 = vst [vmem:[#allocation6 + $0x60] sm:$0xff] %v6083_v36  ;;  %6124 = vst [vmem:[#allocation6 + $0x68] sm:$0xff] %v6084_v62  ;;  %v6101_v52 = vmax.f32 %v10934_v38, 0.0  ;;  %v6102_v14 = vmax.f32 %v10938_v37, 0.0  ;;  %v6103_v41 = vmax.f32 %v10942_v34, 0.0  ;;  %v6104_v26 = vmax.f32 %v10946_v27, 0.0 }
 0x61c   :  { %6125 = vst [vmem:[#allocation6 + $0x70] sm:$0xff] %v6085_v2  ;;  %6126 = vst [vmem:[#allocation6 + $0x78] sm:$0xff] %v6086_v59  ;;  %v6105_v57 = vmax.f32 %v10950_v11, 0.0  ;;  %v6106_v45 = vmax.f32 %v10954_v39, 0.0  ;;  %v6107_v29 = vmax.f32 %v10958_v6, 0.0  ;;  %v6109_v9 = vmax.f32 %v10962_v4, 0.0 }
 0x61d   :  { %6127 = vst [vmem:[#allocation6 + $0x80] sm:$0xff] %v6087_v50  ;;  %6128 = vst [vmem:[#allocation6 + $0x88] sm:$0xff] %v6088_v30  ;;  %v6110_v1 = vmax.f32 %v10966_v0, 0.0 }
 0x61e   :  { %6129 = vst [vmem:[#allocation6 + $0x90] sm:$0xff] %v6089_v12  ;;  %6130 = vst [vmem:[#allocation6 + $0x98] sm:$0xff] %v6090_v3 }
 0x61f   :  { %6131 = vst [vmem:[#allocation6 + $0xa0] sm:$0xff] %v6091_v23  ;;  %6132 = vst [vmem:[#allocation6 + $0xa8] sm:$0xff] %v6092_v35 }
 0x620   :  { %6133 = vst [vmem:[#allocation6 + $0xb0] sm:$0xff] %v6093_v63  ;;  %6134 = vst [vmem:[#allocation6 + $0xb8] sm:$0xff] %v6094_v31 }
 0x621   :  { %6135 = vst [vmem:[#allocation6 + $0xc0] sm:$0xff] %v6095_v19  ;;  %6136 = vst [vmem:[#allocation6 + $0xc8] sm:$0xff] %v6096_v48 }
 0x622   :  { %6137 = vst [vmem:[#allocation6 + $0xd0] sm:$0xff] %v6097_v51  ;;  %6138 = vst [vmem:[#allocation6 + $0xd8] sm:$0xff] %v6098_v61 }
 0x623   :  { %6139 = vst [vmem:[#allocation6 + $0xe0] sm:$0xff] %v6099_v42  ;;  %6140 = vst [vmem:[#allocation6 + $0xe8] sm:$0xff] %v6100_v24 }
 0x624   :  { %6141 = vst [vmem:[#allocation6 + $0xf0] sm:$0xff] %v6101_v52  ;;  %6142 = vst [vmem:[#allocation6 + $0xf8] sm:$0xff] %v6102_v14 }
 0x625   :  { %6143 = vst [vmem:[#allocation6 + $0x100] sm:$0xff] %v6103_v41  ;;  %6144 = vst [vmem:[#allocation6 + $0x108] sm:$0xff] %v6104_v26 }
 0x626   :  { %6145 = vst [vmem:[#allocation6 + $0x110] sm:$0xff] %v6105_v57  ;;  %6146 = vst [vmem:[#allocation6 + $0x118] sm:$0xff] %v6106_v45 }
 0x627   :  { %6147 = vst [vmem:[#allocation6 + $0x120] sm:$0xff] %v6107_v29  ;;  %6149 = vst [vmem:[#allocation6 + $0x130] sm:$0xff] %v6109_v9 }
 0x628   :  { %6150 = vst [vmem:[#allocation6 + $0x138] sm:$0xff] %v6110_v1 }
 0x629   :  { %7820 = shalt.err (!%p7817_p12)
}
 0x62a   :  { %s7821_s5 = scalar_lea.hbm %s11017_s11, 5120 }
 0x62b   :  { %p7822_p13 = scmp.ne.s32.totalorder %s11017_s11, %s7821_s5  ;;  %p7825_p0 = scmp.lt.u32.totalorder %s7821_s5, %s11017_s11 }
 0x62d   :  { %p7827_p1 = pnand %p7825_p0, %p7822_p13 }
 0x62f   :  { %7830 = shalt.err (!%p7827_p1)
}
 0x630   :  { %s7840_s21 = smov 128   ;;  %s7841_s22 = smov 8  }
 0x631   :  { %6162 = dma.vmem_to_hbm [thread:$0]  %s6157_s10, 5120, %s11017_s11, [#allocation5], %s7840_s21, %s7840_s21, %s7841_s22  }
 0x632   :  { %7833 = dma.done.wait [#allocation5], 5120  }
 0x633   :  { %7834 = vsyncadd [#allocation5], 4294962176 }
 0x634   :  { %6166 = vsyncpa [#allocation4], 1 }
 0x635   :  { %6167 = vsyncpa [#allocation5], 1 }

</bundles_post_ra>
